<compile_context>
chip_gen: v5e
topology: v5e:2x2
jax: 0.10.0
libtpu: 0.0.40
codegen_flags: <defaults>
</compile_context>

<pallas_src>
import jax
import jax.numpy as jnp
import numpy as np
from jax import lax
from jax.experimental import pallas as pl
from jax.experimental.pallas import tpu as pltpu

K = 15      # kernel width of the (1, 15) convs
S = 7       # stride
EPS = 1e-5  # BatchNorm eps


def conv_out_len(w, k=K, s=S):
    return (w - k) // s + 1


def convT_out_len(w, k=K, s=S):
    return (w - 1) * s + k


# ---------------------------------------------------------------------------
# kernel: the whole forward pass as back-to-back MXU matmuls (all VMEM resident)
# ---------------------------------------------------------------------------
def autoencoder_kernel(x_ref,
                       t1_ref, b1_ref, p1_ref, g1_ref, be1_ref,
                       t2_ref, b2_ref, p2_ref, g2_ref, be2_ref,
                       t3_ref, b3_ref, p3_ref, g3_ref, be3_ref,
                       t4_ref, b4_ref,
                       t5_ref, b5_ref,
                       enc_ref, dec_ref):
    def bn_relu(h, p_ref, g_ref, be_ref):
        # h: (N, W*C) in (w, c)-minor order. p averages over W per channel and
        # tiles the result back to (1, W*C), keeping everything 2-D/lane-dense.
        mean = jnp.dot(jnp.mean(h, axis=0, keepdims=True), p_ref[...],
                       preferred_element_type=jnp.float32)            # (1, W*C)
        cent = h - mean
        var = jnp.dot(jnp.mean(cent * cent, axis=0, keepdims=True), p_ref[...],
                      preferred_element_type=jnp.float32)              # (1, W*C)
        hn = cent * lax.rsqrt(var + EPS)
        return jnp.maximum(hn * g_ref[...] + be_ref[...], 0.0)

    def mm(a, t_ref, b_ref):
        return jnp.dot(a, t_ref[...], preferred_element_type=jnp.float32) + b_ref[...]

    # --- encoder ---
    h = bn_relu(mm(x_ref[...], t1_ref, b1_ref), p1_ref, g1_ref, be1_ref)
    enc = bn_relu(mm(h, t2_ref, b2_ref), p2_ref, g2_ref, be2_ref)
    enc_ref[...] = enc
    # --- decoder ---
    d = bn_relu(mm(enc, t3_ref, b3_ref), p3_ref, g3_ref, be3_ref)
    d = mm(d, t4_ref, b4_ref)
    dec_ref[...] = mm(d, t5_ref, b5_ref)


# ---------------------------------------------------------------------------
# wrapper-side weight folding (runs as cheap XLA ops, not inside the kernel)
# ---------------------------------------------------------------------------
def _conv_toeplitz(w, win, stride):
    # w: (Cout, Cin, K) -> dense (Win*Cin, Wout*Cout) acting on (w, c)-flat vectors.
    cout, cin, k = w.shape
    wout = conv_out_len(win, k, stride)
    wo, kk, ci, co = jnp.meshgrid(jnp.arange(wout), jnp.arange(k),
                                  jnp.arange(cin), jnp.arange(cout), indexing="ij")
    rows = (wo * stride + kk) * cin + ci
    cols = wo * cout + co
    t = jnp.zeros((win * cin, wout * cout), jnp.float32)
    return t.at[rows.ravel(), cols.ravel()].set(w[co, ci, kk].ravel())


def _convT_toeplitz(w, win, stride):
    # w: (Cin, Cout, K) -> dense (Win*Cin, Wout*Cout) acting on (w, c)-flat vectors.
    cin, cout, k = w.shape
    wout = convT_out_len(win, k, stride)
    wi, kk, ci, co = jnp.meshgrid(jnp.arange(win), jnp.arange(k),
                                  jnp.arange(cin), jnp.arange(cout), indexing="ij")
    rows = wi * cin + ci
    cols = (wi * stride + kk) * cout + co
    t = jnp.zeros((win * cin, wout * cout), jnp.float32)
    return t.at[rows.ravel(), cols.ravel()].set(w[ci, co, kk].ravel())


def _tile_c(v, w):
    # (C,) -> (1, W*C) in (w, c) order
    return jnp.tile(v, w).reshape(1, -1)


def _bn_reduce_tile(c, w):
    # per-channel "mean over W, tile back" matrix: (W*C, W*C)
    return jnp.tile(jnp.eye(c, dtype=jnp.float32), (w, w)) / w


@jax.jit
def autoencoder_forward(x_nchw, params):
    n, c, h, w = x_nchw.shape
    assert c == 1 and h == 1, "module expects single-channel, height-1 input"
    x = x_nchw.reshape(n, w)

    w1 = conv_out_len(w)           # encoder widths
    w2 = conv_out_len(w1)
    wd1 = convT_out_len(w2)        # decoder widths
    wd2 = convT_out_len(wd1)

    args = (
        x,
        _conv_toeplitz(params["w1"], w, S),    _tile_c(params["b1"], w1),
        _bn_reduce_tile(16, w1), _tile_c(params["g1"], w1), _tile_c(params["be1"], w1),
        _conv_toeplitz(params["w2"], w1, S),   _tile_c(params["b2"], w2),
        _bn_reduce_tile(8, w2),  _tile_c(params["g2"], w2), _tile_c(params["be2"], w2),
        _convT_toeplitz(params["w3"], w2, S),  _tile_c(params["b3"], wd1),
        _bn_reduce_tile(16, wd1), _tile_c(params["g3"], wd1), _tile_c(params["be3"], wd1),
        _convT_toeplitz(params["w4"], wd1, S), _tile_c(params["b4"], wd2),
        _convT_toeplitz(params["w5"], wd2, 1), _tile_c(params["b5"], wd2),
    )

    matmul_flops = 2 * n * (w * (w1 * 16) + (w1 * 16) * (w2 * 8)
                            + (w2 * 8) * (wd1 * 16) + (wd1 * 16) * (wd2 * 16)
                            + (wd2 * 16) * wd2)
    bytes_accessed = 4 * (sum(int(a.size) for a in args) + n * w2 * 8 + n * wd2)
    cost = pl.CostEstimate(flops=int(matmul_flops),
                           transcendentals=int(w1 * 16 + w2 * 8 + wd1 * 16),
                           bytes_accessed=int(bytes_accessed))

    enc_flat, dec = pl.pallas_call(
        autoencoder_kernel,
        out_shape=(jax.ShapeDtypeStruct((n, w2 * 8), jnp.float32),
                   jax.ShapeDtypeStruct((n, wd2), jnp.float32)),
        in_specs=[pl.BlockSpec(memory_space=pltpu.MemorySpace.VMEM)] * len(args),
        out_specs=(pl.BlockSpec(memory_space=pltpu.MemorySpace.VMEM),
                   pl.BlockSpec(memory_space=pltpu.MemorySpace.VMEM)),
        cost_estimate=cost,
    )(*args)

    # back to PyTorch NCHW
    encoded = jnp.transpose(enc_flat.reshape(n, w2, 8), (0, 2, 1)).reshape(n, 8, 1, w2)
    decoded = dec.reshape(n, 1, 1, wd2)
    return encoded, decoded


# ---------------------------------------------------------------------------
# parameters
# ---------------------------------------------------------------------------
def init_params(key):
    ks = jax.random.split(key, 10)

    def u(k, shape, fan_in):
        bound = 1.0 / (fan_in ** 0.5)
        return jax.random.uniform(k, shape, jnp.float32, -bound, bound)

    p = {}
    p["w1"] = u(ks[0], (16, 1, K), 1 * K)    # Conv2d(1, 16, (1,15))    (Cout, Cin, K)
    p["b1"] = u(ks[1], (16,), 1 * K)
    p["w2"] = u(ks[2], (8, 16, K), 16 * K)   # Conv2d(16, 8, (1,15))
    p["b2"] = u(ks[3], (8,), 16 * K)
    p["w3"] = u(ks[4], (8, 16, K), 16 * K)   # ConvT(8, 16, (1,15))     (Cin, Cout, K)
    p["b3"] = u(ks[5], (16,), 16 * K)
    p["w4"] = u(ks[6], (16, 16, K), 16 * K)  # ConvT(16, 16, (1,15))
    p["b4"] = u(ks[7], (16,), 16 * K)
    p["w5"] = u(ks[8], (16, 1, 1), 1)        # ConvT(16, 1, kernel=1)
    p["b5"] = u(ks[9], (1,), 1)
    p["g1"] = jnp.ones((16,), jnp.float32); p["be1"] = jnp.zeros((16,), jnp.float32)
    p["g2"] = jnp.ones((8,),  jnp.float32); p["be2"] = jnp.zeros((8,),  jnp.float32)
    p["g3"] = jnp.ones((16,), jnp.float32); p["be3"] = jnp.zeros((16,), jnp.float32)
    return p


# ---------------------------------------------------------------------------
# pure-JAX reference (direct translation of the PyTorch module) for validation
# ---------------------------------------------------------------------------
def _ref_conv(h, w, b, stride):      # h (N, Win, Cin), w (Cout, Cin, K)
    cout, cin, k = w.shape
    wout = conv_out_len(h.shape[1], k, stride)
    cols = [jnp.einsum("nkc,ock->no", h[:, i * stride:i * stride + k, :], w,
                       precision=lax.Precision.HIGHEST) for i in range(wout)]
    return jnp.stack(cols, axis=1) + b.reshape(1, 1, -1)


def _ref_convT(h, w, b, stride):     # h (N, Win, Cin), w (Cin, Cout, K)
    cin, cout, k = w.shape
    n, win, _ = h.shape
    wout = convT_out_len(win, k, stride)
    out = jnp.zeros((n, wout, cout), jnp.float32)
    for i in range(win):
        out = out.at[:, i * stride:i * stride + k, :].add(
            jnp.einsum("nc,cok->nko", h[:, i, :], w,
                       precision=lax.Precision.HIGHEST))
    return out + b.reshape(1, 1, -1)


def _ref_bn_relu(h, g, b):
    m = jnp.mean(h, axis=(0, 1), keepdims=True)
    v = jnp.mean((h - m) ** 2, axis=(0, 1), keepdims=True)
    return jnp.maximum((h - m) / jnp.sqrt(v + EPS) * g.reshape(1, 1, -1)
                       + b.reshape(1, 1, -1), 0.0)


def reference_forward(x_nchw, p):
    n, _, _, w = x_nchw.shape
    h = x_nchw.reshape(n, w, 1)
    h = _ref_bn_relu(_ref_conv(h, p["w1"], p["b1"], S), p["g1"], p["be1"])
    enc = _ref_bn_relu(_ref_conv(h, p["w2"], p["b2"], S), p["g2"], p["be2"])
    d = _ref_bn_relu(_ref_convT(enc, p["w3"], p["b3"], S), p["g3"], p["be3"])
    d = _ref_convT(d, p["w4"], p["b4"], S)
    dec = _ref_convT(d, p["w5"], p["b5"], 1)
    encoded = jnp.transpose(enc, (0, 2, 1))[:, :, None, :]
    decoded = jnp.transpose(dec, (0, 2, 1))[:, :, None, :]
    return encoded, decoded


if __name__ == "__main__":
    key = jax.random.PRNGKey(0)
    pkey, xkey = jax.random.split(key)
    params = init_params(pkey)

    # W = 113: encoder widths 113 -> 15 -> 1, decoder widths 1 -> 15 -> 113
    x = jax.random.normal(xkey, (2, 1, 1, 113), jnp.float32)

    encoded, decoded = autoencoder_forward(x, params)
    jax.block_until_ready((encoded, decoded))

    assert encoded.shape == (2, 8, 1, 1), encoded.shape
    assert decoded.shape == (2, 1, 1, 113), decoded.shape

    enc_ref, dec_ref = reference_forward(x, params)
    np.testing.assert_allclose(np.asarray(encoded), np.asarray(enc_ref),
                               rtol=1e-2, atol=1e-2)
    np.testing.assert_allclose(np.asarray(decoded), np.asarray(dec_ref),
                               rtol=1e-2, atol=1e-2)
    print("KERNEL_OK")
</pallas_src>

<mosaic_0001>
module attributes {stable_mosaic.version = 11 : i64} {
  func.func @autoencoder_kernel(%arg0: memref<2x113xf32, #tpu.memory_space<vmem>>, %arg1: memref<113x240xf32, #tpu.memory_space<vmem>>, %arg2: memref<1x240xf32, #tpu.memory_space<vmem>>, %arg3: memref<240x240xf32, #tpu.memory_space<vmem>>, %arg4: memref<1x240xf32, #tpu.memory_space<vmem>>, %arg5: memref<1x240xf32, #tpu.memory_space<vmem>>, %arg6: memref<240x8xf32, #tpu.memory_space<vmem>>, %arg7: memref<1x8xf32, #tpu.memory_space<vmem>>, %arg8: memref<8x8xf32, #tpu.memory_space<vmem>>, %arg9: memref<1x8xf32, #tpu.memory_space<vmem>>, %arg10: memref<1x8xf32, #tpu.memory_space<vmem>>, %arg11: memref<8x240xf32, #tpu.memory_space<vmem>>, %arg12: memref<1x240xf32, #tpu.memory_space<vmem>>, %arg13: memref<240x240xf32, #tpu.memory_space<vmem>>, %arg14: memref<1x240xf32, #tpu.memory_space<vmem>>, %arg15: memref<1x240xf32, #tpu.memory_space<vmem>>, %arg16: memref<240x1808xf32, #tpu.memory_space<vmem>>, %arg17: memref<1x1808xf32, #tpu.memory_space<vmem>>, %arg18: memref<1808x113xf32, #tpu.memory_space<vmem>>, %arg19: memref<1x113xf32, #tpu.memory_space<vmem>>, %arg20: memref<2x8xf32, #tpu.memory_space<vmem>>, %arg21: memref<2x113xf32, #tpu.memory_space<vmem>>) attributes {dimension_semantics = [], scalar_prefetch = 0 : i64, scratch_operands = 0 : i64, tpu.core_type = #tpu.core_type<tc>} {
    %c0 = arith.constant 0 : index
    %c0_0 = arith.constant 0 : index
    %0 = vector.load %arg0[%c0, %c0_0] : memref<2x113xf32, #tpu.memory_space<vmem>>, vector<2x113xf32>
    %c0_1 = arith.constant 0 : index
    %c0_2 = arith.constant 0 : index
    %1 = vector.load %arg1[%c0_1, %c0_2] : memref<113x240xf32, #tpu.memory_space<vmem>>, vector<113x240xf32>
    %cst = arith.constant dense<0.000000e+00> : vector<2x240xf32>
    %2 = tpu.matmul %0, %1, %cst {dimension_numbers = #tpu.dot_dimension_numbers<[1], [0], [0], [1], [0, 0, 1, 1], [], []>} : vector<2x113xf32>, vector<113x240xf32>, vector<2x240xf32> -> vector<2x240xf32>
    %c0_3 = arith.constant 0 : index
    %c0_4 = arith.constant 0 : index
    %3 = vector.load %arg2[%c0_3, %c0_4] : memref<1x240xf32, #tpu.memory_space<vmem>>, vector<1x240xf32>
    %4 = vector.broadcast %3 : vector<1x240xf32> to vector<2x240xf32>
    %5 = arith.addf %2, %4 : vector<2x240xf32>
    %cst_5 = arith.constant dense<0.000000e+00> : vector<240xf32>
    %6 = vector.multi_reduction <add>, %5, %cst_5 [0] : vector<2x240xf32> to vector<240xf32>
    %7 = vector.shape_cast %6 : vector<240xf32> to vector<1x240xf32>
    %cst_6 = arith.constant 2.000000e+00 : f32
    %8 = vector.broadcast %cst_6 : f32 to vector<1x240xf32>
    %9 = arith.divf %7, %8 : vector<1x240xf32>
    %c0_7 = arith.constant 0 : index
    %c0_8 = arith.constant 0 : index
    %10 = vector.load %arg3[%c0_7, %c0_8] : memref<240x240xf32, #tpu.memory_space<vmem>>, vector<240x240xf32>
    %cst_9 = arith.constant dense<0.000000e+00> : vector<1x240xf32>
    %11 = tpu.matmul %9, %10, %cst_9 {dimension_numbers = #tpu.dot_dimension_numbers<[1], [0], [0], [1], [0, 0, 1, 1], [], []>} : vector<1x240xf32>, vector<240x240xf32>, vector<1x240xf32> -> vector<1x240xf32>
    %12 = vector.broadcast %11 : vector<1x240xf32> to vector<2x240xf32>
    %13 = arith.subf %5, %12 : vector<2x240xf32>
    %14 = arith.mulf %13, %13 : vector<2x240xf32>
    %cst_10 = arith.constant dense<0.000000e+00> : vector<240xf32>
    %15 = vector.multi_reduction <add>, %14, %cst_10 [0] : vector<2x240xf32> to vector<240xf32>
    %16 = vector.shape_cast %15 : vector<240xf32> to vector<1x240xf32>
    %cst_11 = arith.constant 2.000000e+00 : f32
    %17 = vector.broadcast %cst_11 : f32 to vector<1x240xf32>
    %18 = arith.divf %16, %17 : vector<1x240xf32>
    %c0_12 = arith.constant 0 : index
    %c0_13 = arith.constant 0 : index
    %19 = vector.load %arg3[%c0_12, %c0_13] : memref<240x240xf32, #tpu.memory_space<vmem>>, vector<240x240xf32>
    %cst_14 = arith.constant dense<0.000000e+00> : vector<1x240xf32>
    %20 = tpu.matmul %18, %19, %cst_14 {dimension_numbers = #tpu.dot_dimension_numbers<[1], [0], [0], [1], [0, 0, 1, 1], [], []>} : vector<1x240xf32>, vector<240x240xf32>, vector<1x240xf32> -> vector<1x240xf32>
    %cst_15 = arith.constant 9.99999974E-6 : f32
    %21 = vector.broadcast %cst_15 : f32 to vector<1x240xf32>
    %22 = arith.addf %20, %21 : vector<1x240xf32>
    %23 = math.rsqrt %22 : vector<1x240xf32>
    %24 = vector.broadcast %23 : vector<1x240xf32> to vector<2x240xf32>
    %25 = arith.mulf %13, %24 : vector<2x240xf32>
    %c0_16 = arith.constant 0 : index
    %c0_17 = arith.constant 0 : index
    %26 = vector.load %arg4[%c0_16, %c0_17] : memref<1x240xf32, #tpu.memory_space<vmem>>, vector<1x240xf32>
    %27 = vector.broadcast %26 : vector<1x240xf32> to vector<2x240xf32>
    %28 = arith.mulf %25, %27 : vector<2x240xf32>
    %c0_18 = arith.constant 0 : index
    %c0_19 = arith.constant 0 : index
    %29 = vector.load %arg5[%c0_18, %c0_19] : memref<1x240xf32, #tpu.memory_space<vmem>>, vector<1x240xf32>
    %30 = vector.broadcast %29 : vector<1x240xf32> to vector<2x240xf32>
    %31 = arith.addf %28, %30 : vector<2x240xf32>
    %cst_20 = arith.constant 0.000000e+00 : f32
    %32 = vector.broadcast %cst_20 : f32 to vector<2x240xf32>
    %33 = arith.maximumf %31, %32 : vector<2x240xf32>
    %c0_21 = arith.constant 0 : index
    %c0_22 = arith.constant 0 : index
    %34 = vector.load %arg6[%c0_21, %c0_22] : memref<240x8xf32, #tpu.memory_space<vmem>>, vector<240x8xf32>
    %cst_23 = arith.constant dense<0.000000e+00> : vector<2x8xf32>
    %35 = tpu.matmul %33, %34, %cst_23 {dimension_numbers = #tpu.dot_dimension_numbers<[1], [0], [0], [1], [0, 0, 1, 1], [], []>} : vector<2x240xf32>, vector<240x8xf32>, vector<2x8xf32> -> vector<2x8xf32>
    %c0_24 = arith.constant 0 : index
    %c0_25 = arith.constant 0 : index
    %36 = vector.load %arg7[%c0_24, %c0_25] : memref<1x8xf32, #tpu.memory_space<vmem>>, vector<1x8xf32>
    %37 = vector.broadcast %36 : vector<1x8xf32> to vector<2x8xf32>
    %38 = arith.addf %35, %37 : vector<2x8xf32>
    %cst_26 = arith.constant dense<0.000000e+00> : vector<8xf32>
    %39 = vector.multi_reduction <add>, %38, %cst_26 [0] : vector<2x8xf32> to vector<8xf32>
    %40 = vector.shape_cast %39 : vector<8xf32> to vector<1x8xf32>
    %cst_27 = arith.constant 2.000000e+00 : f32
    %41 = vector.broadcast %cst_27 : f32 to vector<1x8xf32>
    %42 = arith.divf %40, %41 : vector<1x8xf32>
    %c0_28 = arith.constant 0 : index
    %c0_29 = arith.constant 0 : index
    %43 = vector.load %arg8[%c0_28, %c0_29] : memref<8x8xf32, #tpu.memory_space<vmem>>, vector<8x8xf32>
    %cst_30 = arith.constant dense<0.000000e+00> : vector<1x8xf32>
    %44 = tpu.matmul %42, %43, %cst_30 {dimension_numbers = #tpu.dot_dimension_numbers<[1], [0], [0], [1], [0, 0, 1, 1], [], []>} : vector<1x8xf32>, vector<8x8xf32>, vector<1x8xf32> -> vector<1x8xf32>
    %45 = vector.broadcast %44 : vector<1x8xf32> to vector<2x8xf32>
    %46 = arith.subf %38, %45 : vector<2x8xf32>
    %47 = arith.mulf %46, %46 : vector<2x8xf32>
    %cst_31 = arith.constant dense<0.000000e+00> : vector<8xf32>
    %48 = vector.multi_reduction <add>, %47, %cst_31 [0] : vector<2x8xf32> to vector<8xf32>
    %49 = vector.shape_cast %48 : vector<8xf32> to vector<1x8xf32>
    %cst_32 = arith.constant 2.000000e+00 : f32
    %50 = vector.broadcast %cst_32 : f32 to vector<1x8xf32>
    %51 = arith.divf %49, %50 : vector<1x8xf32>
    %c0_33 = arith.constant 0 : index
    %c0_34 = arith.constant 0 : index
    %52 = vector.load %arg8[%c0_33, %c0_34] : memref<8x8xf32, #tpu.memory_space<vmem>>, vector<8x8xf32>
    %cst_35 = arith.constant dense<0.000000e+00> : vector<1x8xf32>
    %53 = tpu.matmul %51, %52, %cst_35 {dimension_numbers = #tpu.dot_dimension_numbers<[1], [0], [0], [1], [0, 0, 1, 1], [], []>} : vector<1x8xf32>, vector<8x8xf32>, vector<1x8xf32> -> vector<1x8xf32>
    %cst_36 = arith.constant 9.99999974E-6 : f32
    %54 = vector.broadcast %cst_36 : f32 to vector<1x8xf32>
    %55 = arith.addf %53, %54 : vector<1x8xf32>
    %56 = math.rsqrt %55 : vector<1x8xf32>
    %57 = vector.broadcast %56 : vector<1x8xf32> to vector<2x8xf32>
    %58 = arith.mulf %46, %57 : vector<2x8xf32>
    %c0_37 = arith.constant 0 : index
    %c0_38 = arith.constant 0 : index
    %59 = vector.load %arg9[%c0_37, %c0_38] : memref<1x8xf32, #tpu.memory_space<vmem>>, vector<1x8xf32>
    %60 = vector.broadcast %59 : vector<1x8xf32> to vector<2x8xf32>
    %61 = arith.mulf %58, %60 : vector<2x8xf32>
    %c0_39 = arith.constant 0 : index
    %c0_40 = arith.constant 0 : index
    %62 = vector.load %arg10[%c0_39, %c0_40] : memref<1x8xf32, #tpu.memory_space<vmem>>, vector<1x8xf32>
    %63 = vector.broadcast %62 : vector<1x8xf32> to vector<2x8xf32>
    %64 = arith.addf %61, %63 : vector<2x8xf32>
    %cst_41 = arith.constant 0.000000e+00 : f32
    %65 = vector.broadcast %cst_41 : f32 to vector<2x8xf32>
    %66 = arith.maximumf %64, %65 : vector<2x8xf32>
    %c0_42 = arith.constant 0 : index
    %c0_43 = arith.constant 0 : index
    %67 = vector.load %arg20[%c0_42, %c0_43] : memref<2x8xf32, #tpu.memory_space<vmem>>, vector<2x8xf32>
    tpu.vector_store %arg20[%c0_42, %c0_43], %66 {strides = array<i32>} : memref<2x8xf32, #tpu.memory_space<vmem>>, vector<2x8xf32>,
    %c0_44 = arith.constant 0 : index
    %c0_45 = arith.constant 0 : index
    %68 = vector.load %arg11[%c0_44, %c0_45] : memref<8x240xf32, #tpu.memory_space<vmem>>, vector<8x240xf32>
    %cst_46 = arith.constant dense<0.000000e+00> : vector<2x240xf32>
    %69 = tpu.matmul %66, %68, %cst_46 {dimension_numbers = #tpu.dot_dimension_numbers<[1], [0], [0], [1], [0, 0, 1, 1], [], []>} : vector<2x8xf32>, vector<8x240xf32>, vector<2x240xf32> -> vector<2x240xf32>
    %c0_47 = arith.constant 0 : index
    %c0_48 = arith.constant 0 : index
    %70 = vector.load %arg12[%c0_47, %c0_48] : memref<1x240xf32, #tpu.memory_space<vmem>>, vector<1x240xf32>
    %71 = vector.broadcast %70 : vector<1x240xf32> to vector<2x240xf32>
    %72 = arith.addf %69, %71 : vector<2x240xf32>
    %cst_49 = arith.constant dense<0.000000e+00> : vector<240xf32>
    %73 = vector.multi_reduction <add>, %72, %cst_49 [0] : vector<2x240xf32> to vector<240xf32>
    %74 = vector.shape_cast %73 : vector<240xf32> to vector<1x240xf32>
    %cst_50 = arith.constant 2.000000e+00 : f32
    %75 = vector.broadcast %cst_50 : f32 to vector<1x240xf32>
    %76 = arith.divf %74, %75 : vector<1x240xf32>
    %c0_51 = arith.constant 0 : index
    %c0_52 = arith.constant 0 : index
    %77 = vector.load %arg13[%c0_51, %c0_52] : memref<240x240xf32, #tpu.memory_space<vmem>>, vector<240x240xf32>
    %cst_53 = arith.constant dense<0.000000e+00> : vector<1x240xf32>
    %78 = tpu.matmul %76, %77, %cst_53 {dimension_numbers = #tpu.dot_dimension_numbers<[1], [0], [0], [1], [0, 0, 1, 1], [], []>} : vector<1x240xf32>, vector<240x240xf32>, vector<1x240xf32> -> vector<1x240xf32>
    %79 = vector.broadcast %78 : vector<1x240xf32> to vector<2x240xf32>
    %80 = arith.subf %72, %79 : vector<2x240xf32>
    %81 = arith.mulf %80, %80 : vector<2x240xf32>
    %cst_54 = arith.constant dense<0.000000e+00> : vector<240xf32>
    %82 = vector.multi_reduction <add>, %81, %cst_54 [0] : vector<2x240xf32> to vector<240xf32>
    %83 = vector.shape_cast %82 : vector<240xf32> to vector<1x240xf32>
    %cst_55 = arith.constant 2.000000e+00 : f32
    %84 = vector.broadcast %cst_55 : f32 to vector<1x240xf32>
    %85 = arith.divf %83, %84 : vector<1x240xf32>
    %c0_56 = arith.constant 0 : index
    %c0_57 = arith.constant 0 : index
    %86 = vector.load %arg13[%c0_56, %c0_57] : memref<240x240xf32, #tpu.memory_space<vmem>>, vector<240x240xf32>
    %cst_58 = arith.constant dense<0.000000e+00> : vector<1x240xf32>
    %87 = tpu.matmul %85, %86, %cst_58 {dimension_numbers = #tpu.dot_dimension_numbers<[1], [0], [0], [1], [0, 0, 1, 1], [], []>} : vector<1x240xf32>, vector<240x240xf32>, vector<1x240xf32> -> vector<1x240xf32>
    %cst_59 = arith.constant 9.99999974E-6 : f32
    %88 = vector.broadcast %cst_59 : f32 to vector<1x240xf32>
    %89 = arith.addf %87, %88 : vector<1x240xf32>
    %90 = math.rsqrt %89 : vector<1x240xf32>
    %91 = vector.broadcast %90 : vector<1x240xf32> to vector<2x240xf32>
    %92 = arith.mulf %80, %91 : vector<2x240xf32>
    %c0_60 = arith.constant 0 : index
    %c0_61 = arith.constant 0 : index
    %93 = vector.load %arg14[%c0_60, %c0_61] : memref<1x240xf32, #tpu.memory_space<vmem>>, vector<1x240xf32>
    %94 = vector.broadcast %93 : vector<1x240xf32> to vector<2x240xf32>
    %95 = arith.mulf %92, %94 : vector<2x240xf32>
    %c0_62 = arith.constant 0 : index
    %c0_63 = arith.constant 0 : index
    %96 = vector.load %arg15[%c0_62, %c0_63] : memref<1x240xf32, #tpu.memory_space<vmem>>, vector<1x240xf32>
    %97 = vector.broadcast %96 : vector<1x240xf32> to vector<2x240xf32>
    %98 = arith.addf %95, %97 : vector<2x240xf32>
    %cst_64 = arith.constant 0.000000e+00 : f32
    %99 = vector.broadcast %cst_64 : f32 to vector<2x240xf32>
    %100 = arith.maximumf %98, %99 : vector<2x240xf32>
    %c0_65 = arith.constant 0 : index
    %c0_66 = arith.constant 0 : index
    %101 = vector.load %arg16[%c0_65, %c0_66] : memref<240x1808xf32, #tpu.memory_space<vmem>>, vector<240x1808xf32>
    %cst_67 = arith.constant dense<0.000000e+00> : vector<2x1808xf32>
    %102 = tpu.matmul %100, %101, %cst_67 {dimension_numbers = #tpu.dot_dimension_numbers<[1], [0], [0], [1], [0, 0, 1, 1], [], []>} : vector<2x240xf32>, vector<240x1808xf32>, vector<2x1808xf32> -> vector<2x1808xf32>
    %c0_68 = arith.constant 0 : index
    %c0_69 = arith.constant 0 : index
    %103 = vector.load %arg17[%c0_68, %c0_69] : memref<1x1808xf32, #tpu.memory_space<vmem>>, vector<1x1808xf32>
    %104 = vector.broadcast %103 : vector<1x1808xf32> to vector<2x1808xf32>
    %105 = arith.addf %102, %104 : vector<2x1808xf32>
    %c0_70 = arith.constant 0 : index
    %c0_71 = arith.constant 0 : index
    %106 = vector.load %arg18[%c0_70, %c0_71] : memref<1808x113xf32, #tpu.memory_space<vmem>>, vector<1808x113xf32>
    %cst_72 = arith.constant dense<0.000000e+00> : vector<2x113xf32>
    %107 = tpu.matmul %105, %106, %cst_72 {dimension_numbers = #tpu.dot_dimension_numbers<[1], [0], [0], [1], [0, 0, 1, 1], [], []>} : vector<2x1808xf32>, vector<1808x113xf32>, vector<2x113xf32> -> vector<2x113xf32>
    %c0_73 = arith.constant 0 : index
    %c0_74 = arith.constant 0 : index
    %108 = vector.load %arg19[%c0_73, %c0_74] : memref<1x113xf32, #tpu.memory_space<vmem>>, vector<1x113xf32>
    %109 = vector.broadcast %108 : vector<1x113xf32> to vector<2x113xf32>
    %110 = arith.addf %107, %109 : vector<2x113xf32>
    %c0_75 = arith.constant 0 : index
    %c0_76 = arith.constant 0 : index
    %111 = vector.load %arg21[%c0_75, %c0_76] : memref<2x113xf32, #tpu.memory_space<vmem>>, vector<2x113xf32>
    tpu.vector_store %arg21[%c0_75, %c0_76], %110 {strides = array<i32>} : memref<2x113xf32, #tpu.memory_space<vmem>>, vector<2x113xf32>,
    return
  }
}

</mosaic_0001>

<bundles_post_ra>
// kernel: tile.56
= control target key start
LH: loop header
LB: loop body
LE: loop exit
PB: predicated region body
PF: predicated region fallthrough
CT: control target
= control target key end

     0   :  { %s28_s0 = inlined_call_operand.vmem [shape: f32[16], index: 0, kind: input, shape index: {}]   ;;  %s29_s1 = inlined_call_operand.vmem [shape: f32[15,16], index: 1, kind: output, shape index: {}]  }
   0x1   :  { %v4_v0 = vld [vmem:[%s28_s0] ss:$0 sm:$0xff] }
   0x2   :  { %5 = vst [vmem:[%s29_s1] sm:$0xff] %v4_v0 }
   0x3   :  { %8 = vst [vmem:[%s29_s1 + $0x8] sm:$0xff] %v4_v0 }

// kernel: tile.57
= control target key start
LH: loop header
LB: loop body
LE: loop exit
PB: predicated region body
PF: predicated region fallthrough
CT: control target
= control target key end

     0   :  { %s21_s8 = smov 3  ;;  %s120_s9 = smov 112   ;;  %s165_s0 = inlined_call_operand.vmem [shape: f32[15,16], index: 0, kind: input, shape index: {}]   ;;  %s166_s1 = inlined_call_operand.hbm [shape: f32[1,240], index: 1, kind: output, shape index: {}]  }
   0x1   :  { %v79_v0 = vld [vmem:[%s165_s0 + $0x7] sm:$0x1]   ;;  %v81_v1 = vld [vmem:[%s165_s0 + $0x5] ss:$8 sm:%s21_s8]  }
   0x2   :  { %9 = vrot.lane.b32.xlu0 %v79_v0, %s120_s9 }
   0x3   :  { %2 = vsyncpa [#allocation1], 0  ;;  %s121_s12 = smov 80   ;;  %s14_s13 = smov 3  ;;  %vm5_vm0 = vcmask 130048   ;;  %vm11_vm1 = vcmask 1048448  }
   0x4   :  { %23 = vrot.lane.b32.xlu1 %v81_v1, %s121_s12  ;;  %s28_s14 = smov 3  ;;  %s35_s15 = smov 3  ;;  %v80_v3 = vld [vmem:[%s165_s0 + $0x6] ss:$8 sm:%s14_s13]   ;;  %vm18_vm2 = vcmask 917248   ;;  %vm25_vm3 = vcmask 786048  }
   0x5   :  { %v83_v2 = vld [vmem:[%s165_s0 + $0x3] ss:$8 sm:%s35_s15]   ;;  %s122_s20 = smov 48   ;;  %v82_v4 = vld [vmem:[%s165_s0 + $0x4] ss:$8 sm:%s28_s14]   ;;  %s42_s23 = smov 3 }
   0x6   :  { %37 = vrot.lane.b32.xlu2 %v83_v2, %s122_s20  ;;  %s123_s24 = smov 96   ;;  %s124_s25 = smov 64   ;;  %v84_v5 = vld [vmem:[%s165_s0 + $0x2] ss:$8 sm:%s42_s23]   ;;  %vm32_vm4 = vcmask 654848   ;;  %vm39_vm5 = vcmask 523648  }
   0x7   :  { %s49_s26 = smov 3  ;;  %s125_s2 = smov 32   ;;  %vm46_vm6 = vcmask 392448   ;;  %vm53_vm7 = vcmask 261248  }
   0x8   :  { %v85_v6 = vld [vmem:[%s165_s0 + $0x1] ss:$8 sm:%s49_s26]   ;;  %s126_s3 = smov 16   ;;  %s3_s4 = smov 3 }
   0x9   :  { %v4_v7 = vld [vmem:[%s165_s0] ss:$8 sm:%s3_s4]   ;;  %s127_s0 = smov [#allocation0]   ;;  %s72_s1 = sshll.u32 %s166_s1, 4  ;;  %s73_s1 = int_to_ptr.hbm [resolvable:$true] %s72_s1 }
   0xa   :  { %16 = vrot.lane.b32.xlu0 %v80_v3, %s123_s24  ;;  %6 = vst.msk [vmem:[#allocation2] ss:$8 sm:$0x3] %vm5_vm0, %v4_v7   ;;  %s70_s7 = sshll.u32 %s127_s0, 4  ;;  %s71_s7 = int_to_ptr.vmem [resolvable:$true] %s70_s7 }
   0xc   :  { %30 = vrot.lane.b32.xlu1 %v82_v4, %s124_s25 }
   0xe   :  { %44 = vrot.lane.b32.xlu2 %v84_v5, %s125_s2 }
  0x12   :  { %51 = vrot.lane.b32.xlu0 %v85_v6, %s126_s3 }
  0x60   :  { %v38_v8 = vpop.permute.xlu2 %37  }
  0x68   :  { %v45_v9 = vpop.permute.xlu2 %44  }
  0x74   :  { %v10_v10 = vpop.permute.xlu0 %9  }
  0x75   :  { %12 = vst.msk [vmem:[#allocation2] sm:$0x1] %vm11_vm1, %v10_v10  }
  0x76   :  { %v24_v11 = vpop.permute.xlu1 %23  }
  0x7c   :  { %v17_v12 = vpop.permute.xlu0 %16  }
  0x7d   :  { %19 = vst.msk [vmem:[#allocation2] ss:$8 sm:$0x3] %vm18_vm2, %v17_v12  }
  0x7e   :  { %v31_v13 = vpop.permute.xlu1 %30   ;;  %26 = vst.msk [vmem:[#allocation2] ss:$8 sm:$0x3] %vm25_vm3, %v24_v11  }
  0x7f   :  { %33 = vst.msk [vmem:[#allocation2] ss:$8 sm:$0x3] %vm32_vm4, %v31_v13  }
  0x80   :  { %40 = vst.msk [vmem:[#allocation2] ss:$8 sm:$0x3] %vm39_vm5, %v38_v8  }
  0x81   :  { %47 = vst.msk [vmem:[#allocation2] ss:$8 sm:$0x3] %vm46_vm6, %v45_v9  }
  0x84   :  { %v52_v14 = vpop.permute.xlu0 %51  }
  0x85   :  { %54 = vst.msk [vmem:[#allocation2] ss:$8 sm:$0x3] %vm53_vm7, %v52_v14  }
  0x8c   :  { %v57_v15 = vld [vmem:[#allocation2] sm:$0x1]  ;;  %v62_v16 = vld [vmem:[#allocation2 + $0x8] sm:$0x1] }
  0x8d   :  { %60 = vst [vmem:[#allocation0] sm:$0x1] %v57_v15 }
  0x8e   :  { %66 = vst [vmem:[#allocation0 + $0x1] sm:$0x1] %v62_v16 }
  0x8f   :  { %75 = dma.vmem_to_hbm [thread:$0]  %s71_s7, 32, %s73_s1, [#allocation1]  }
  0x90   :  { %118 = dma.done.wait [#allocation1], 32  }
  0x91   :  { %119 = vsyncadd [#allocation1], 4294967264 }
  0x92   :  { %78 = vsyncpa [#allocation1], 1 }

// kernel: tile.99
= control target key start
LH: loop header
LB: loop body
LE: loop exit
PB: predicated region body
PF: predicated region fallthrough
CT: control target
= control target key end

     0   :  { %s106_s0 = inlined_call_operand.vmem [shape: f32[16], index: 0, kind: input, shape index: {}]   ;;  %s107_s1 = inlined_call_operand.vmem [shape: f32[113,16], index: 1, kind: output, shape index: {}]  }
   0x1   :  { %v4_v0 = vld [vmem:[%s106_s0] ss:$0 sm:$0xff] }
   0x2   :  { %5 = vst [vmem:[%s107_s1] sm:$0xff] %v4_v0 }
   0x3   :  { %34 = vst [vmem:[%s107_s1 + $0x8] sm:$0xff] %v4_v0 }
   0x4   :  { %35 = vst [vmem:[%s107_s1 + $0x10] sm:$0xff] %v4_v0 }
   0x5   :  { %36 = vst [vmem:[%s107_s1 + $0x18] sm:$0xff] %v4_v0 }
   0x6   :  { %37 = vst [vmem:[%s107_s1 + $0x20] sm:$0xff] %v4_v0 }
   0x7   :  { %38 = vst [vmem:[%s107_s1 + $0x28] sm:$0xff] %v4_v0 }
   0x8   :  { %39 = vst [vmem:[%s107_s1 + $0x30] sm:$0xff] %v4_v0 }
   0x9   :  { %40 = vst [vmem:[%s107_s1 + $0x38] sm:$0xff] %v4_v0 }
   0xa   :  { %41 = vst [vmem:[%s107_s1 + $0x40] sm:$0xff] %v4_v0 }
   0xb   :  { %42 = vst [vmem:[%s107_s1 + $0x48] sm:$0xff] %v4_v0 }
   0xc   :  { %43 = vst [vmem:[%s107_s1 + $0x50] sm:$0xff] %v4_v0 }
   0xd   :  { %44 = vst [vmem:[%s107_s1 + $0x58] sm:$0xff] %v4_v0 }
   0xe   :  { %45 = vst [vmem:[%s107_s1 + $0x60] sm:$0xff] %v4_v0 }
   0xf   :  { %46 = vst [vmem:[%s107_s1 + $0x68] sm:$0xff] %v4_v0 }
  0x10   :  { %47 = vst [vmem:[%s107_s1 + $0x70] sm:$0xff] %v4_v0 }

// kernel: tile.100
= control target key start
LH: loop header
LB: loop body
LE: loop exit
PB: predicated region body
PF: predicated region fallthrough
CT: control target
= control target key end

     0   :  { %vm4_vm0 = vcmask 1047556   ;;  %s59_s14 = smov 48  ;;  %s336_s15 = smov 96   ;;  %vm36_vm1 = vcmask 1045508   ;;  %vm6_vm2 = vcmask 130048   ;;  %vm13_vm3 = vcmask 1046532   ;;  %s517_s0 = inlined_call_operand.vmem [shape: f32[113,16], index: 0, kind: input, shape index: {}]   ;;  %s518_s1 = inlined_call_operand.vmem [shape: f32[1,1808], index: 1, kind: output, shape index: {}]  }
   0x1   :  { %v291_v0 = vld [vmem:[%s517_s0 + $0x6] ss:$8 sm:$0xf]   ;;  %v287_v2 = vld [vmem:[%s517_s0 + $0x7] ss:$8 sm:$0xf]  }
   0x2   :  { %v292_v1 = vld [vmem:[%s517_s0 + $0x6] ss:$8 sm:$0xf0]   ;;  %v288_v4 = vld [vmem:[%s517_s0 + $0x7] ss:$8 sm:$0xf0]  }
   0x3   :  { %v50_v3 = vsel %vm4_vm0, %v292_v1, %v291_v0  ;;  %v25_v5 = vsel %vm4_vm0, %v288_v4, %v287_v2  ;;  %s34_s16 = smov 48  ;;  %s337_s17 = smov 112   ;;  %v293_v6 = vld [vmem:[%s517_s0 + $0x46] ss:$8 sm:$0xf]   ;;  %vm28_vm4 = vcmask 1048448  }
   0x4   :  { %51 = vrot.lane.b32.xlu1 %v50_v3, %s336_s15  ;;  %26 = vrot.lane.b32.xlu0 %v25_v5, %s337_s17  ;;  %v294_v7 = vld [vmem:[%s517_s0 + $0x46] ss:$8 sm:%s59_s14]   ;;  %s109_s26 = smov 48  ;;  %s84_s4 = smov 48  ;;  %vm53_vm5 = vcmask 917248   ;;  %vm78_vm6 = vcmask 786048  }
   0x5   :  { %v289_v8 = vld [vmem:[%s517_s0 + $0x47] ss:$8 sm:$0xf]   ;;  %v62_v10 = vsel %vm36_vm1, %v294_v7, %v293_v6  ;;  %v295_v12 = vld [vmem:[%s517_s0 + $0x5] ss:$8 sm:$0xf]  }
   0x6   :  { %v290_v9 = vld [vmem:[%s517_s0 + $0x47] ss:$8 sm:%s34_s16]   ;;  %v296_v13 = vld [vmem:[%s517_s0 + $0x5] ss:$8 sm:$0xf0]   ;;  %s338_s7 = smov 80  }
   0x7   :  { %v37_v11 = vsel %vm36_vm1, %v290_v9, %v289_v8  ;;  %v301_v14 = vld [vmem:[%s517_s0 + $0x44] ss:$8 sm:$0xf]   ;;  %v75_v15 = vsel %vm4_vm0, %v296_v13, %v295_v12  ;;  %v297_v19 = vld [vmem:[%s517_s0 + $0x45] ss:$8 sm:$0xf]  }
   0x8   :  { %v302_v16 = vld [vmem:[%s517_s0 + $0x44] ss:$8 sm:%s109_s26]   ;;  %76 = vrot.lane.b32.xlu2 %v75_v15, %s338_s7  ;;  %s134_s16 = smov 48  ;;  %v307_v24 = vld [vmem:[%s517_s0 + $0x2] ss:$8 sm:$0xf]  }
   0x9   :  { %v299_v17 = vld [vmem:[%s517_s0 + $0x4] ss:$8 sm:$0xf]   ;;  %v298_v20 = vld [vmem:[%s517_s0 + $0x45] ss:$8 sm:%s84_s4]   ;;  %v112_v21 = vsel %vm36_vm1, %v302_v16, %v301_v14  ;;  %s184_s30 = smov 48 }
   0xa   :  { %v300_v18 = vld [vmem:[%s517_s0 + $0x4] ss:$8 sm:$0xf0]   ;;  %v87_v23 = vsel %vm36_vm1, %v298_v20, %v297_v19  ;;  %v308_v25 = vld [vmem:[%s517_s0 + $0x2] ss:$8 sm:$0xf0]  }
   0xb   :  { %v100_v22 = vsel %vm4_vm0, %v300_v18, %v299_v17  ;;  %v305_v26 = vld [vmem:[%s517_s0 + $0x43] ss:$8 sm:$0xf]   ;;  %v150_v30 = vsel %vm4_vm0, %v308_v25, %v307_v24  ;;  %s340_s2 = smov 32   ;;  %s159_s5 = smov 48  ;;  %vm103_vm7 = vcmask 654848  }
   0xc   :  { %63 = vrot.lane.b32.xlu1 %v62_v10, %s336_s15  ;;  %38 = vrot.lane.b32.xlu0 %v37_v11, %s337_s17  ;;  %s339_s17 = smov 64   ;;  %v306_v27 = vld [vmem:[%s517_s0 + $0x43] ss:$8 sm:%s134_s16]   ;;  %s341_s6 = smov 48   ;;  %vm128_vm8 = vcmask 523648   ;;  %vm153_vm9 = vcmask 392448  }
   0xd   :  { %v303_v28 = vld [vmem:[%s517_s0 + $0x3] ss:$8 sm:$0xf]   ;;  %v137_v31 = vsel %vm36_vm1, %v306_v27, %v305_v26  ;;  %v313_v33 = vld [vmem:[%s517_s0 + $0x41] ss:$8 sm:$0xf]  }
   0xe   :  { %v304_v29 = vld [vmem:[%s517_s0 + $0x3] ss:$8 sm:$0xf0]   ;;  %v314_v34 = vld [vmem:[%s517_s0 + $0x41] ss:$8 sm:%s184_s30]   ;;  %vm178_vm10 = vcmask 261248  }
   0xf   :  { %v125_v32 = vsel %vm4_vm0, %v304_v29, %v303_v28  ;;  %v311_v35 = vld [vmem:[%s517_s0 + $0x1] ss:$8 sm:$0xf]   ;;  %v309_v37 = vld [vmem:[%s517_s0 + $0x42] ss:$8 sm:$0xf]   ;;  %v187_v39 = vsel %vm36_vm1, %v314_v34, %v313_v33 }
  0x10   :  { %88 = vrot.lane.b32.xlu2 %v87_v23, %s338_s7  ;;  %v312_v36 = vld [vmem:[%s517_s0 + $0x1] ss:$8 sm:$0xf0]   ;;  %v310_v38 = vld [vmem:[%s517_s0 + $0x42] ss:$8 sm:%s159_s5]  }
  0x11   :  { %v175_v40 = vsel %vm4_vm0, %v312_v36, %v311_v35  ;;  %v162_v41 = vsel %vm36_vm1, %v310_v38, %v309_v37  ;;  %v2_v42 = vld [vmem:[%s517_s0] ss:$8 sm:$0xf]  }
  0x12   :  { %v3_v43 = vld [vmem:[%s517_s0] ss:$8 sm:$0xf0]  }
  0x13   :  { %v5_v44 = vsel %vm4_vm0, %v3_v43, %v2_v42  ;;  %v285_v45 = vld [vmem:[%s517_s0 + $0x40] ss:$8 sm:$0xf]  }
  0x14   :  { %113 = vrot.lane.b32.xlu1 %v112_v21, %s339_s17  ;;  %101 = vrot.lane.b32.xlu0 %v100_v22, %s339_s17  ;;  %s342_s17 = smov 16   ;;  %7 = vst.msk [vmem:[#allocation0] ss:$8 sm:$0xf] %vm6_vm2, %v5_v44  }
  0x15   :  { %8 = vst.msk [vmem:[#allocation0] ss:$8 sm:$0xf0] %vm6_vm2, %v5_v44   ;;  %v286_v46 = vld [vmem:[%s517_s0 + $0x40] ss:$8 sm:$0x70]  }
  0x16   :  { %v14_v47 = vsel %vm13_vm3, %v286_v46, %v285_v45 }
  0x17   :  { %17 = vst.msk [vmem:[#allocation0 + $0x40] ss:$8 sm:$0xf] %vm6_vm2, %v14_v47  }
  0x18   :  { %126 = vrot.lane.b32.xlu2 %v125_v32, %s341_s6  ;;  %19 = vst.msk [vmem:[#allocation0 + $0x40] ss:$8 sm:$0x70] %vm6_vm2, %v14_v47  }
  0x1c   :  { %151 = vrot.lane.b32.xlu1 %v150_v30, %s340_s2  ;;  %138 = vrot.lane.b32.xlu0 %v137_v31, %s341_s6 }
  0x1f   :  { %v280_v49 = vld [vmem:[#allocation0 + $0x70] sm:$0x1] }
  0x20   :  { %163 = vrot.lane.b32.xlu2 %v162_v41, %s340_s2  ;;  %328 = vst [vmem:[%s518_s1 + $0xe] sm:$0x1] %v280_v49 }
  0x24   :  { %188 = vrot.lane.b32.xlu1 %v187_v39, %s342_s17  ;;  %176 = vrot.lane.b32.xlu0 %v175_v40, %s342_s17 }
  0x62   :  { %v77_v48 = vpop.permute.xlu2 %76  }
  0x6a   :  { %v89_v50 = vpop.permute.xlu2 %88  }
  0x72   :  { %v127_v53 = vpop.permute.xlu2 %126  }
  0x76   :  { %v52_v51 = vpop.permute.xlu1 %51   ;;  %v27_v52 = vpop.permute.xlu0 %26  }
  0x77   :  { %29 = vst.msk [vmem:[#allocation0] ss:$8 sm:$0xf] %vm28_vm4, %v27_v52  }
  0x78   :  { %30 = vst.msk [vmem:[#allocation0] ss:$8 sm:$0xf0] %vm28_vm4, %v27_v52  }
  0x79   :  { %54 = vst.msk [vmem:[#allocation0] ss:$8 sm:$0xf] %vm53_vm5, %v52_v51  }
  0x7a   :  { %55 = vst.msk [vmem:[#allocation0] ss:$8 sm:$0xf0] %vm53_vm5, %v52_v51   ;;  %v164_v56 = vpop.permute.xlu2 %163  }
  0x7b   :  { %79 = vst.msk [vmem:[#allocation0] ss:$8 sm:$0xf] %vm78_vm6, %v77_v48  }
  0x7c   :  { %80 = vst.msk [vmem:[#allocation0] ss:$8 sm:$0xf0] %vm78_vm6, %v77_v48  }
  0x7e   :  { %v64_v54 = vpop.permute.xlu1 %63   ;;  %v39_v55 = vpop.permute.xlu0 %38  }
  0x7f   :  { %42 = vst.msk [vmem:[#allocation0 + $0x40] ss:$8 sm:$0xf] %vm28_vm4, %v39_v55  }
  0x80   :  { %44 = vst.msk [vmem:[#allocation0 + $0x40] ss:$8 sm:$0x30] %vm28_vm4, %v39_v55  }
  0x81   :  { %67 = vst.msk [vmem:[#allocation0 + $0x40] ss:$8 sm:$0xf] %vm53_vm5, %v64_v54  }
  0x82   :  { %69 = vst.msk [vmem:[#allocation0 + $0x40] ss:$8 sm:$0x30] %vm53_vm5, %v64_v54  }
  0x83   :  { %92 = vst.msk [vmem:[#allocation0 + $0x40] ss:$8 sm:$0xf] %vm78_vm6, %v89_v50  }
  0x84   :  { %94 = vst.msk [vmem:[#allocation0 + $0x40] ss:$8 sm:$0x30] %vm78_vm6, %v89_v50  }
  0x86   :  { %v114_v57 = vpop.permute.xlu1 %113   ;;  %v102_v58 = vpop.permute.xlu0 %101  }
  0x87   :  { %117 = vst.msk [vmem:[#allocation0 + $0x40] ss:$8 sm:$0xf] %vm103_vm7, %v114_v57  }
  0x88   :  { %119 = vst.msk [vmem:[#allocation0 + $0x40] ss:$8 sm:$0x30] %vm103_vm7, %v114_v57  }
  0x89   :  { %104 = vst.msk [vmem:[#allocation0] ss:$8 sm:$0xf] %vm103_vm7, %v102_v58  }
  0x8a   :  { %105 = vst.msk [vmem:[#allocation0] ss:$8 sm:$0xf0] %vm103_vm7, %v102_v58  }
  0x8b   :  { %129 = vst.msk [vmem:[#allocation0] ss:$8 sm:$0xf] %vm128_vm8, %v127_v53  }
  0x8c   :  { %130 = vst.msk [vmem:[#allocation0] ss:$8 sm:$0xf0] %vm128_vm8, %v127_v53  }
  0x8e   :  { %v152_v59 = vpop.permute.xlu1 %151   ;;  %v139_v60 = vpop.permute.xlu0 %138  }
  0x8f   :  { %154 = vst.msk [vmem:[#allocation0] ss:$8 sm:$0xf] %vm153_vm9, %v152_v59  }
  0x90   :  { %155 = vst.msk [vmem:[#allocation0] ss:$8 sm:$0xf0] %vm153_vm9, %v152_v59  }
  0x91   :  { %142 = vst.msk [vmem:[#allocation0 + $0x40] ss:$8 sm:$0xf] %vm128_vm8, %v139_v60  }
  0x92   :  { %144 = vst.msk [vmem:[#allocation0 + $0x40] ss:$8 sm:$0x30] %vm128_vm8, %v139_v60  }
  0x93   :  { %167 = vst.msk [vmem:[#allocation0 + $0x40] ss:$8 sm:$0xf] %vm153_vm9, %v164_v56  }
  0x94   :  { %169 = vst.msk [vmem:[#allocation0 + $0x40] ss:$8 sm:$0x30] %vm153_vm9, %v164_v56  }
  0x96   :  { %v189_v61 = vpop.permute.xlu1 %188   ;;  %v177_v62 = vpop.permute.xlu0 %176  }
  0x97   :  { %192 = vst.msk [vmem:[#allocation0 + $0x40] ss:$8 sm:$0xf] %vm178_vm10, %v189_v61  }
  0x98   :  { %194 = vst.msk [vmem:[#allocation0 + $0x40] ss:$8 sm:$0x30] %vm178_vm10, %v189_v61  }
  0x99   :  { %179 = vst.msk [vmem:[#allocation0] ss:$8 sm:$0xf] %vm178_vm10, %v177_v62  }
  0x9a   :  { %180 = vst.msk [vmem:[#allocation0] ss:$8 sm:$0xf0] %vm178_vm10, %v177_v62  }
  0x9e   :  { %v244_v63 = vld [vmem:[#allocation0 + $0x40] sm:$0x1]  ;;  %v250_v0 = vld [vmem:[#allocation0 + $0x48] sm:$0x1]  ;;  %v256_v1 = vld [vmem:[#allocation0 + $0x50] sm:$0x1] }
  0x9f   :  { %322 = vst [vmem:[%s518_s1 + $0x8] sm:$0x1] %v244_v63  ;;  %v262_v2 = vld [vmem:[#allocation0 + $0x58] sm:$0x1]  ;;  %v268_v3 = vld [vmem:[#allocation0 + $0x60] sm:$0x1] }
  0xa0   :  { %323 = vst [vmem:[%s518_s1 + $0x9] sm:$0x1] %v250_v0  ;;  %v274_v4 = vld [vmem:[#allocation0 + $0x68] sm:$0x1]  ;;  %v197_v5 = vld [vmem:[#allocation0] sm:$0x1] }
  0xa1   :  { %324 = vst [vmem:[%s518_s1 + $0xa] sm:$0x1] %v256_v1  ;;  %v202_v6 = vld [vmem:[#allocation0 + $0x8] sm:$0x1]  ;;  %v208_v7 = vld [vmem:[#allocation0 + $0x10] sm:$0x1] }
  0xa2   :  { %325 = vst [vmem:[%s518_s1 + $0xb] sm:$0x1] %v262_v2  ;;  %v214_v8 = vld [vmem:[#allocation0 + $0x18] sm:$0x1]  ;;  %v220_v9 = vld [vmem:[#allocation0 + $0x20] sm:$0x1] }
  0xa3   :  { %326 = vst [vmem:[%s518_s1 + $0xc] sm:$0x1] %v268_v3  ;;  %v226_v10 = vld [vmem:[#allocation0 + $0x28] sm:$0x1]  ;;  %v232_v11 = vld [vmem:[#allocation0 + $0x30] sm:$0x1] }
  0xa4   :  { %327 = vst [vmem:[%s518_s1 + $0xd] sm:$0x1] %v274_v4  ;;  %v238_v12 = vld [vmem:[#allocation0 + $0x38] sm:$0x1] }
  0xa5   :  { %200 = vst [vmem:[%s518_s1] sm:$0x1] %v197_v5 }
  0xa6   :  { %315 = vst [vmem:[%s518_s1 + $0x1] sm:$0x1] %v202_v6 }
  0xa7   :  { %316 = vst [vmem:[%s518_s1 + $0x2] sm:$0x1] %v208_v7 }
  0xa8   :  { %317 = vst [vmem:[%s518_s1 + $0x3] sm:$0x1] %v214_v8 }
  0xa9   :  { %318 = vst [vmem:[%s518_s1 + $0x4] sm:$0x1] %v220_v9 }
  0xaa   :  { %319 = vst [vmem:[%s518_s1 + $0x5] sm:$0x1] %v226_v10 }
  0xab   :  { %320 = vst [vmem:[%s518_s1 + $0x6] sm:$0x1] %v232_v11 }
  0xac   :  { %321 = vst [vmem:[%s518_s1 + $0x7] sm:$0x1] %v238_v12 }

// kernel: autoencoder_forward.1
= control target key start
LH: loop header
LB: loop body
LE: loop exit
PB: predicated region body
PF: predicated region fallthrough
CT: control target
= control target key end

     0   :  { %s6060_s0 = inlined_call_operand.vmem [shape: f32[2,113], index: 0, kind: input, shape index: {}]   ;;  %s6061_s1 = inlined_call_operand.vmem [shape: f32[113,240], index: 1, kind: input, shape index: {}]   ;;  %s6062_s2 = inlined_call_operand.vmem [shape: f32[1,240], index: 2, kind: input, shape index: {}]   ;;  %s6063_s3 = inlined_call_operand.vmem [shape: f32[240,240], index: 3, kind: input, shape index: {}, may-alias: {3,13}]   ;;  %s6064_s4 = inlined_call_operand.vmem [shape: f32[1,240], index: 4, kind: input, shape index: {}]   ;;  %s6065_s5 = inlined_call_operand.vmem [shape: f32[1,240], index: 5, kind: input, shape index: {}]   ;;  %s6066_s6 = inlined_call_operand.vmem [shape: f32[240,8], index: 6, kind: input, shape index: {}]   ;;  %s6067_s7 = inlined_call_operand.vmem [shape: f32[1,8], index: 7, kind: input, shape index: {}]   ;;  %s6068_s8 = inlined_call_operand.vmem [shape: f32[8,8], index: 8, kind: input, shape index: {}]   ;;  %s6069_s9 = inlined_call_operand.vmem [shape: f32[1,8], index: 9, kind: input, shape index: {}]   ;;  %s6070_s10 = inlined_call_operand.vmem [shape: f32[1,8], index: 10, kind: input, shape index: {}]   ;;  %s6071_s11 = inlined_call_operand.vmem [shape: f32[8,240], index: 11, kind: input, shape index: {}]   ;;  %s6072_s12 = inlined_call_operand.vmem [shape: f32[1,240], index: 12, kind: input, shape index: {}]   ;;  %s6073_s13 = inlined_call_operand.vmem [shape: f32[240,240], index: 13, kind: input, shape index: {}, may-alias: {3,13}]   ;;  %s6074_s14 = inlined_call_operand.vmem [shape: f32[1,240], index: 14, kind: input, shape index: {}]   ;;  %s6075_s15 = inlined_call_operand.vmem [shape: f32[1,240], index: 15, kind: input, shape index: {}]   ;;  %s6076_s16 = inlined_call_operand.vmem [shape: f32[240,1808], index: 16, kind: input, shape index: {}]   ;;  %s6077_s17 = inlined_call_operand.vmem [shape: f32[1,1808], index: 17, kind: input, shape index: {}]   ;;  %s6078_s18 = inlined_call_operand.vmem [shape: f32[1808,113], index: 18, kind: input, shape index: {}]   ;;  %s6079_s19 = inlined_call_operand.vmem [shape: f32[1,113], index: 19, kind: input, shape index: {}]   ;;  %s6080_s20 = inlined_call_operand.hbm [shape: f32[2,8], index: 20, kind: output, shape index: {0}]   ;;  %s6081_s21 = inlined_call_operand.hbm [shape: f32[2,113], index: 21, kind: output, shape index: {1}]  }
   0x1   :  { %6084 = sst [smem:[#allocation8_spill]] %s6060_s0 }
   0x2   :  { %6085 = sst [smem:[#allocation9_spill]] %s6061_s1 }
   0x3   :  { %6086 = sst [smem:[#allocation10_spill]] %s6062_s2 }
   0x4   :  { %6087 = sst [smem:[#allocation11_spill]] %s6063_s3 }
   0x5   :  { %6088 = sst [smem:[#allocation12_spill]] %s6064_s4 }
   0x6   :  { %6089 = sst [smem:[#allocation13_spill]] %s6065_s5 }
   0x7   :  { %27 = vsyncpa [#allocation3], 0  ;;  %s6090_s26 = sld [smem:[#allocation9_spill]]  ;;  %vm110_vm0 = vcmask 1040384  }
   0x8   :  { %s6091_s27 = sld [smem:[#allocation11_spill]] }
   0xd   :  { %v98_v0 = vld [vmem:[%s6090_s26 + $0xe0] sm:$0x1]  ;;  %v99_v1 = vld [vmem:[%s6090_s26 + $0xe8] sm:$0x1]  ;;  %v96_v2 = vld [vmem:[%s6090_s26 + $0xd0] sm:$0xff] }
   0xe   :  { %2654 = vmatpush.msk.msra.mxu0 %vm110_vm0, %v98_v0  ;;  %2656 = vmatpush.msk.msra.mxu1 %vm110_vm0, %v99_v1  ;;  %v97_v3 = vld [vmem:[%s6090_s26 + $0xd8] sm:$0xff]  ;;  %v94_v4 = vld [vmem:[%s6090_s26 + $0xc0] sm:$0xff]  ;;  %v95_v5 = vld [vmem:[%s6090_s26 + $0xc8] sm:$0xff] }
   0xf   :  { %v92_v6 = vld [vmem:[%s6090_s26 + $0xb0] sm:$0xff]  ;;  %v93_v7 = vld [vmem:[%s6090_s26 + $0xb8] sm:$0xff]  ;;  %v90_v8 = vld [vmem:[%s6090_s26 + $0xa0] sm:$0xff] }
  0x10   :  { %119 = vmatpush.msra.mxu0 %v96_v2  ;;  %139 = vmatpush.msra.mxu1 %v97_v3  ;;  %v91_v9 = vld [vmem:[%s6090_s26 + $0xa8] sm:$0xff]  ;;  %v88_v10 = vld [vmem:[%s6090_s26 + $0x90] sm:$0xff]  ;;  %v89_v11 = vld [vmem:[%s6090_s26 + $0x98] sm:$0xff] }
  0x11   :  { %v86_v12 = vld [vmem:[%s6090_s26 + $0x80] sm:$0xff]  ;;  %v87_v13 = vld [vmem:[%s6090_s26 + $0x88] sm:$0xff]  ;;  %v2916_v14 = vld [vmem:[%s6091_s27 + $0x1d0] sm:$0xff] }
  0x12   :  { %120 = vmatpush.msra.mxu0 %v94_v4  ;;  %140 = vmatpush.msra.mxu1 %v95_v5  ;;  %v2921_v15 = vld [vmem:[%s6091_s27 + $0x1c0] sm:$0xff]  ;;  %v84_v16 = vld [vmem:[%s6090_s26 + $0x70] sm:$0xff]  ;;  %v85_v17 = vld [vmem:[%s6090_s26 + $0x78] sm:$0xff] }
  0x13   :  { %268 = vmatpush.msra.mxu3 %v2916_v14  ;;  %v2933_v18 = vld [vmem:[%s6091_s27 + $0x1b0] sm:$0xff]  ;;  %v82_v20 = vld [vmem:[%s6090_s26 + $0x60] sm:$0xff]  ;;  %v83_v21 = vld [vmem:[%s6090_s26 + $0x68] sm:$0xff] }
  0x14   :  { %121 = vmatpush.msra.mxu0 %v92_v6  ;;  %141 = vmatpush.msra.mxu1 %v93_v7  ;;  %v2938_v19 = vld [vmem:[%s6091_s27 + $0xf0] sm:$0xff]  ;;  %v2951_v22 = vld [vmem:[%s6091_s27 + $0xe0] sm:$0xff]  ;;  %v81_v26 = vld [vmem:[%s6090_s26 + $0x58] sm:$0xff] }
  0x15   :  { %269 = vmatpush.msra.mxu3 %v2921_v15  ;;  %246 = vmatpush.msra.mxu2 %v2938_v19  ;;  %v2956_v23 = vld [vmem:[%s6091_s27 + $0x1a0] sm:$0xff]  ;;  %v2961_v24 = vld [vmem:[%s6091_s27 + $0xd0] sm:$0xff]  ;;  %v79_v30 = vld [vmem:[%s6090_s26 + $0x48] sm:$0xff] }
  0x16   :  { %122 = vmatpush.msra.mxu0 %v90_v8  ;;  %142 = vmatpush.msra.mxu1 %v91_v9  ;;  %v80_v25 = vld [vmem:[%s6090_s26 + $0x50] sm:$0xff]  ;;  %v2979_v28 = vld [vmem:[%s6091_s27 + $0xc0] sm:$0xff]  ;;  %v77_v32 = vld [vmem:[%s6090_s26 + $0x38] sm:$0xff] }
  0x17   :  { %270 = vmatpush.msra.mxu3 %v2933_v18  ;;  %247 = vmatpush.msra.mxu2 %v2951_v22  ;;  %v2974_v27 = vld [vmem:[%s6091_s27 + $0x190] sm:$0xff]  ;;  %v78_v29 = vld [vmem:[%s6090_s26 + $0x40] sm:$0xff]  ;;  %v75_v38 = vld [vmem:[%s6090_s26 + $0x28] sm:$0xff] }
  0x18   :  { %123 = vmatpush.msra.mxu0 %v88_v10  ;;  %143 = vmatpush.msra.mxu1 %v89_v11  ;;  %v76_v31 = vld [vmem:[%s6090_s26 + $0x30] sm:$0xff]  ;;  %v2998_v33 = vld [vmem:[%s6091_s27 + $0x180] sm:$0xff] }
  0x19   :  { %271 = vmatpush.msra.mxu3 %v2956_v23  ;;  %248 = vmatpush.msra.mxu2 %v2961_v24  ;;  %v204_v34 = vld [vmem:[%s6091_s27 + $0xb0] sm:$0xff]  ;;  %v202_v36 = vld [vmem:[%s6091_s27 + $0xa0] sm:$0xff] }
  0x1a   :  { %124 = vmatpush.msra.mxu0 %v86_v12  ;;  %144 = vmatpush.msra.mxu1 %v87_v13  ;;  %v3007_v35 = vld [vmem:[%s6091_s27 + $0x170] sm:$0xff]  ;;  %v74_v37 = vld [vmem:[%s6090_s26 + $0x20] sm:$0xff] }
  0x1b   :  { %272 = vmatpush.msra.mxu3 %v2974_v27  ;;  %249 = vmatpush.msra.mxu2 %v2979_v28 }
  0x1c   :  { %125 = vmatpush.msra.mxu0 %v84_v16  ;;  %145 = vmatpush.msra.mxu1 %v85_v17 }
  0x1d   :  { %273 = vmatpush.msra.mxu3 %v2998_v33  ;;  %250 = vmatpush.msra.mxu2 %v204_v34 }
  0x1e   :  { %126 = vmatpush.msra.mxu0 %v82_v20  ;;  %146 = vmatpush.msra.mxu1 %v83_v21 }
  0x20   :  { %127 = vmatpush.msra.mxu0 %v80_v25  ;;  %147 = vmatpush.msra.mxu1 %v81_v26 }
  0x22   :  { %128 = vmatpush.msra.mxu0 %v78_v29  ;;  %148 = vmatpush.msra.mxu1 %v79_v30 }
  0x23   :  { %28 = vsyncpa [#allocation5], 0  ;;  %v3023_v39 = vld [vmem:[%s6091_s27 + $0x160] sm:$0xff]  ;;  %v200_v40 = vld [vmem:[%s6091_s27 + $0x90] sm:$0xff]  ;;  %274 = vmatpush.msra.mxu3 %v3007_v35  ;;  %251 = vmatpush.msra.mxu2 %v202_v36  ;;  %s6092_s25 = sld [smem:[#allocation8_spill]]  ;;  %vm106_vm1 = vcmask 924672  }
  0x24   :  { %129 = vmatpush.msra.mxu0 %v76_v31  ;;  %149 = vmatpush.msra.mxu1 %v77_v32  ;;  %v72_v41 = vld [vmem:[%s6090_s26 + $0x10] sm:$0xff]  ;;  %v73_v42 = vld [vmem:[%s6090_s26 + $0x18] sm:$0xff]  ;;  %v70_v44 = vld [vmem:[%s6090_s26] sm:$0xff]  ;;  %v2758_v30 = vmov 2.0   ;;  %s6093_s30 = sld [smem:[#allocation10_spill]]  ;;  %vm157_vm2 = vcmask 1041408  }
  0x25   :  { %v3038_v43 = vld [vmem:[%s6091_s27 + $0x150] sm:$0xff]  ;;  %v71_v45 = vld [vmem:[%s6090_s26 + $0x8] sm:$0xff]  ;;  %275 = vmatpush.msra.mxu3 %v3023_v39  ;;  %252 = vmatpush.msra.mxu2 %v200_v40  ;;  %v3054_v47 = vld [vmem:[%s6091_s27 + $0x140] sm:$0xff]  ;;  %2694 = vrcp.f32 %v2758_v30  ;;  %vm165_vm3 = vcmask 910336   ;;  %vm242_vm5 = vcmask 916480   ;;  %s6094_s22 = sld [smem:[#allocation12_spill]] }
  0x26   :  { %130 = vmatpush.msra.mxu0 %v74_v37  ;;  %150 = vmatpush.msra.mxu1 %v75_v38  ;;  %v3059_v48 = vld [vmem:[%s6091_s27 + $0x1d8] sm:$0xff]  ;;  %v3064_v49 = vld [vmem:[%s6091_s27 + $0x130] sm:$0xff]  ;;  %v3069_v50 = vld [vmem:[%s6091_s27 + $0x1c8] sm:$0xff]  ;;  %s6095_s1 = sld [smem:[#allocation13_spill]]  ;;  %vm550_vm12 = vcmask 58368   ;;  %vm560_vm13 = vcmask 64512  }
  0x27   :  { %276 = vmatpush.msra.mxu3 %v3038_v43  ;;  %v3076_v51 = vld [vmem:[%s6091_s27 + $0x120] sm:$0xff]  ;;  %v3081_v52 = vld [vmem:[%s6091_s27 + $0x1b8] sm:$0xff]  ;;  %v3089_v53 = vld [vmem:[%s6091_s27 + $0x110] sm:$0xff]  ;;  %s2629_s23 = sshll.u32 %s6080_s20, 4  ;;  %s2640_s3 = sshll.u32 %s6081_s21, 4  ;;  %s2630_s23 = int_to_ptr.hbm [resolvable:$true] %s2629_s23  ;;  %s2641_s3 = int_to_ptr.hbm [resolvable:$true] %s2640_s3 }
  0x28   :  { %131 = vmatpush.msra.mxu0 %v72_v41  ;;  %151 = vmatpush.msra.mxu1 %v73_v42  ;;  %v3094_v54 = vld [vmem:[%s6091_s27 + $0x1a8] sm:$0xff]  ;;  %v3102_v55 = vld [vmem:[%s6091_s27 + $0x100] sm:$0xff]  ;;  %v3107_v56 = vld [vmem:[%s6091_s27 + $0x198] sm:$0xff] }
  0x29   :  { %v69_v46 = vld [vmem:[%s6092_s25] sm:$0x3]  ;;  %277 = vmatpush.msra.mxu3 %v3054_v47  ;;  %v3114_v57 = vld [vmem:[%s6091_s27 + $0xf8] sm:$0xff]  ;;  %v3122_v58 = vld [vmem:[%s6091_s27 + $0xe8] sm:$0xff] }
  0x2a   :  { %132 = vmatpush.msra.mxu0 %v70_v44  ;;  %152 = vmatpush.msra.mxu1 %v71_v45  ;;  %v3129_v59 = vld [vmem:[%s6091_s27 + $0xd8] sm:$0xff]  ;;  %v198_v60 = vld [vmem:[%s6091_s27 + $0x80] sm:$0xff]  ;;  %v3139_v61 = vld [vmem:[%s6091_s27 + $0xc8] sm:$0xff] }
  0x2b   :  { %2655 = vmatmul.msk.f32.vlgmr.msra.gmra.mxu0 %vm106_vm1, %v69_v46  ;;  %2657 = vmatmul.msk.f32.vlgmr.msra.gmra.mxu1 %vm106_vm1, %v69_v46  ;;  %v3144_v62 = vld [vmem:[%s6091_s27 + $0x188] sm:$0xff]  ;;  %v196_v63 = vld [vmem:[%s6091_s27 + $0x70] sm:$0xff]  ;;  %v3154_v0 = vld [vmem:[%s6091_s27 + $0xb8] sm:$0xff] }
  0x2c   :  { %308 = vmatpush.msrb.mxu0 %v3059_v48  ;;  %351 = vmatpush.msrb.mxu1 %v2938_v19  ;;  %v3159_v1 = vld [vmem:[%s6091_s27 + $0x178] sm:$0xff]  ;;  %v194_v2 = vld [vmem:[%s6091_s27 + $0x60] sm:$0xff]  ;;  %v3169_v3 = vld [vmem:[%s6091_s27 + $0xa8] sm:$0xff] }
  0x2d   :  { %278 = vmatpush.msra.mxu3 %v3064_v49  ;;  %253 = vmatpush.msra.mxu2 %v198_v60  ;;  %v3174_v4 = vld [vmem:[%s6091_s27 + $0x168] sm:$0xff]  ;;  %v192_v5 = vld [vmem:[%s6091_s27 + $0x50] sm:$0xff]  ;;  %v3184_v6 = vld [vmem:[%s6091_s27 + $0x98] sm:$0xff] }
  0x2e   :  { %309 = vmatpush.msrb.mxu0 %v3069_v50  ;;  %352 = vmatpush.msrb.mxu1 %v2951_v22  ;;  %v3189_v7 = vld [vmem:[%s6091_s27 + $0x158] sm:$0xff]  ;;  %v190_v8 = vld [vmem:[%s6091_s27 + $0x40] sm:$0xff]  ;;  %v3199_v9 = vld [vmem:[%s6091_s27 + $0x88] sm:$0xff] }
  0x2f   :  { %279 = vmatpush.msra.mxu3 %v3076_v51  ;;  %254 = vmatpush.msra.mxu2 %v196_v63  ;;  %v3204_v10 = vld [vmem:[%s6091_s27 + $0x148] sm:$0xff]  ;;  %v188_v11 = vld [vmem:[%s6091_s27 + $0x30] sm:$0xff]  ;;  %v3214_v12 = vld [vmem:[%s6091_s27 + $0x78] sm:$0xff] }
  0x30   :  { %310 = vmatpush.msrb.mxu0 %v3081_v52  ;;  %353 = vmatpush.msrb.mxu1 %v2961_v24  ;;  %v3219_v13 = vld [vmem:[%s6091_s27 + $0x138] sm:$0xff]  ;;  %v186_v16 = vld [vmem:[%s6091_s27 + $0x20] sm:$0xff]  ;;  %v3229_v17 = vld [vmem:[%s6091_s27 + $0x68] sm:$0xff] }
  0x31   :  { %280 = vmatpush.msra.mxu3 %v3089_v53  ;;  %255 = vmatpush.msra.mxu2 %v194_v2  ;;  %v3234_v19 = vld [vmem:[%s6091_s27 + $0x128] sm:$0xff]  ;;  %v184_v20 = vld [vmem:[%s6091_s27 + $0x10] sm:$0xff]  ;;  %v3243_v21 = vld [vmem:[%s6091_s27 + $0x58] sm:$0xff] }
  0x32   :  { %311 = vmatpush.msrb.mxu0 %v3094_v54  ;;  %354 = vmatpush.msrb.mxu1 %v2979_v28  ;;  %v3248_v22 = vld [vmem:[%s6091_s27 + $0x118] sm:$0xff]  ;;  %v182_v24 = vld [vmem:[%s6091_s27] sm:$0xff]  ;;  %v3257_v25 = vld [vmem:[%s6091_s27 + $0x48] sm:$0xff] }
  0x33   :  { %281 = vmatpush.msra.mxu3 %v3102_v55  ;;  %256 = vmatpush.msra.mxu2 %v192_v5  ;;  %v3263_v26 = vld [vmem:[%s6091_s27 + $0x108] sm:$0xff]  ;;  %v189_v28 = vld [vmem:[%s6091_s27 + $0x38] sm:$0xff]  ;;  %v100_v32 = vld [vmem:[%s6093_s30] sm:$0x3] }
  0x34   :  { %312 = vmatpush.msrb.mxu0 %v3107_v56  ;;  %355 = vmatpush.msrb.mxu1 %v204_v34  ;;  %v3275_v29 = vld [vmem:[%s6091_s27 + $0x28] sm:$0xff]  ;;  %v103_v34 = vperm.slane %v100_v32, 1  ;;  %v484_v30 = vld [vmem:[%s6066_s6 + $0x58] sm:$0xff] }
  0x35   :  { %286 = vmatpush.msrb.mxu3 %v3114_v57  ;;  %257 = vmatpush.msra.mxu2 %v190_v8  ;;  %v183_v31 = vld [vmem:[%s6091_s27 + $0x8] sm:$0xff] }
  0x36   :  { %356 = vmatpush.msrb.mxu1 %v202_v36  ;;  %313 = vmatpush.msrb.mxu0 %v3144_v62 }
  0x37   :  { %287 = vmatpush.msrb.mxu3 %v3122_v58  ;;  %258 = vmatpush.msra.mxu2 %v188_v11 }
  0x38   :  { %357 = vmatpush.msrb.mxu1 %v200_v40  ;;  %314 = vmatpush.msrb.mxu0 %v3159_v1 }
  0x39   :  { %288 = vmatpush.msrb.mxu3 %v3129_v59  ;;  %259 = vmatpush.msra.mxu2 %v186_v16 }
  0x3a   :  { %358 = vmatpush.msrb.mxu1 %v198_v60  ;;  %315 = vmatpush.msrb.mxu0 %v3174_v4 }
  0x3b   :  { %289 = vmatpush.msrb.mxu3 %v3139_v61  ;;  %260 = vmatpush.msra.mxu2 %v184_v20 }
  0x3c   :  { %359 = vmatpush.msrb.mxu1 %v196_v63  ;;  %316 = vmatpush.msrb.mxu0 %v3189_v7 }
  0x3d   :  { %290 = vmatpush.msrb.mxu3 %v3154_v0  ;;  %261 = vmatpush.msra.mxu2 %v182_v24 }
  0x3e   :  { %360 = vmatpush.msrb.mxu1 %v194_v2  ;;  %317 = vmatpush.msrb.mxu0 %v3204_v10 }
  0x3f   :  { %291 = vmatpush.msrb.mxu3 %v3169_v3  ;;  %373 = vmatpush.msrb.mxu2 %v2916_v14  ;;  %v185_v14 = vld [vmem:[%s6091_s27 + $0x18] sm:$0xff] }
  0x40   :  { %361 = vmatpush.msrb.mxu1 %v192_v5  ;;  %318 = vmatpush.msrb.mxu0 %v3219_v13 }
  0x41   :  { %292 = vmatpush.msrb.mxu3 %v3184_v6  ;;  %374 = vmatpush.msrb.mxu2 %v2921_v15  ;;  %v2695_v15 = vpop.eup %2694 }
  0x42   :  { %362 = vmatpush.msrb.mxu1 %v190_v8  ;;  %319 = vmatpush.msrb.mxu0 %v3234_v19  ;;  %v174_v36 = vmul.f32 2.0, %v2695_v15  ;;  %vm178_vm4 = vweird.f32 %v2695_v15 }
  0x43   :  { %293 = vmatpush.msrb.mxu3 %v3199_v9  ;;  %375 = vmatpush.msrb.mxu2 %v2933_v18  ;;  %v102_v18 = vperm.slane %v100_v32, 0  ;;  %v481_v32 = vld [vmem:[%s6066_s6 + $0x40] sm:$0xff] }
  0x44   :  { %363 = vmatpush.msrb.mxu1 %v188_v11  ;;  %320 = vmatpush.msrb.mxu0 %v3248_v22  ;;  %v175_v40 = vsub.f32 1.0, %v174_v36  ;;  %v500_v36 = vld [vmem:[%s6066_s6 + $0xd8] sm:$0xff] }
  0x45   :  { %294 = vmatpush.msrb.mxu3 %v3214_v12  ;;  %376 = vmatpush.msrb.mxu2 %v2956_v23 }
  0x46   :  { %364 = vmatpush.msrb.mxu1 %v186_v16  ;;  %321 = vmatpush.msrb.mxu0 %v3263_v26 }
  0x47   :  { %295 = vmatpush.msrb.mxu3 %v3229_v17  ;;  %377 = vmatpush.msrb.mxu2 %v2974_v27 }
  0x48   :  { %365 = vmatpush.msrb.mxu1 %v184_v20  ;;  %391 = vmatpush.msra.mxu0 %v3114_v57 }
  0x49   :  { %296 = vmatpush.msrb.mxu3 %v3243_v21  ;;  %378 = vmatpush.msrb.mxu2 %v2998_v33 }
  0x4a   :  { %366 = vmatpush.msrb.mxu1 %v182_v24  ;;  %392 = vmatpush.msra.mxu0 %v3122_v58 }
  0x4b   :  { %297 = vmatpush.msrb.mxu3 %v3257_v25  ;;  %379 = vmatpush.msrb.mxu2 %v3007_v35 }
  0x4c   :  { %393 = vmatpush.msra.mxu0 %v3129_v59 }
  0x4d   :  { %298 = vmatpush.msrb.mxu3 %v189_v28  ;;  %380 = vmatpush.msrb.mxu2 %v3023_v39  ;;  %v176_v39 = vmul.f32 %v2695_v15, %v175_v40  ;;  %v477_v40 = vld [vmem:[%s6066_s6 + $0x20] sm:$0xff] }
  0x4e   :  { %394 = vmatpush.msra.mxu0 %v3139_v61 }
  0x4f   :  { %299 = vmatpush.msrb.mxu3 %v3275_v29  ;;  %381 = vmatpush.msrb.mxu2 %v3038_v43  ;;  %v177_v57 = vadd.f32 %v2695_v15, %v176_v39  ;;  %v495_v39 = vld [vmem:[%s6066_s6 + $0xb0] sm:$0xff] }
  0x50   :  { %395 = vmatpush.msra.mxu0 %v3154_v0 }
  0x51   :  { %300 = vmatpush.msrb.mxu3 %v185_v14  ;;  %382 = vmatpush.msrb.mxu2 %v3054_v47 }
  0x52   :  { %396 = vmatpush.msra.mxu0 %v3169_v3 }
  0x53   :  { %301 = vmatpush.msrb.mxu3 %v183_v31  ;;  %383 = vmatpush.msrb.mxu2 %v3064_v49  ;;  %v3317_v49 = vsel %vm178_vm4, %v2695_v15, %v177_v57  ;;  %v502_v15 = vld [vmem:[%s6066_s6 + $0xe8] sm:$0xff]  ;;  %v493_v57 = vld [vmem:[%s6066_s6 + $0xa0] sm:$0xff] }
  0x54   :  { %397 = vmatpush.msra.mxu0 %v3184_v6  ;;  %532 = vmatpush.msra.mxu1 %v502_v15  ;;  %v2690_v15 = vld [vmem:[%s6067_s7] ss:$0 sm:$0xff] }
  0x55   :  { %384 = vmatpush.msrb.mxu2 %v3076_v51 }
  0x56   :  { %398 = vmatpush.msra.mxu0 %v3199_v9 }
  0x57   :  { %385 = vmatpush.msrb.mxu2 %v3089_v53 }
  0x58   :  { %399 = vmatpush.msra.mxu0 %v3214_v12 }
  0x59   :  { %386 = vmatpush.msrb.mxu2 %v3102_v55 }
  0x5a   :  { %400 = vmatpush.msra.mxu0 %v3229_v17 }
  0x5c   :  { %401 = vmatpush.msra.mxu0 %v3243_v21 }
  0x5e   :  { %402 = vmatpush.msra.mxu0 %v3257_v25  ;;  %v488_v25 = vld [vmem:[%s6066_s6 + $0x78] sm:$0xff] }
  0x60   :  { %403 = vmatpush.msra.mxu0 %v189_v28  ;;  %v486_v28 = vld [vmem:[%s6066_s6 + $0x68] sm:$0xff] }
  0x62   :  { %404 = vmatpush.msra.mxu0 %v3275_v29  ;;  %v485_v29 = vld [vmem:[%s6066_s6 + $0x60] sm:$0xff] }
  0x64   :  { %405 = vmatpush.msra.mxu0 %v185_v14  ;;  %v483_v14 = vld [vmem:[%s6066_s6 + $0x50] sm:$0xff] }
  0x66   :  { %406 = vmatpush.msra.mxu0 %v183_v31  ;;  %v482_v31 = vld [vmem:[%s6066_s6 + $0x48] sm:$0xff] }
  0xa8   :  { %v134_v23 = vpop.f32.mrf.mxu0  ;;  %v154_v37 = vpop.f32.mrf.mxu1 }
  0xa9   :  { %v135_v27 = vadd.f32 %v134_v23, %v102_v18  ;;  %v3301_v38 = vadd.f32 %v154_v37, %v103_v34  ;;  %v501_v18 = vld [vmem:[%s6066_s6 + $0xe0] sm:$0xff]  ;;  %v480_v34 = vld [vmem:[%s6066_s6 + $0x38] sm:$0xff]  ;;  %v479_v23 = vld [vmem:[%s6066_s6 + $0x30] sm:$0xff] }
  0xaa   :  { %533 = vmatpush.msra.mxu1 %v501_v18  ;;  %v499_v37 = vld [vmem:[%s6066_s6 + $0xd0] sm:$0xff] }
  0xab   :  { %v158_v33 = vsel %vm157_vm2, %v135_v27, 0.0  ;;  %v166_v35 = vsel %vm165_vm3, %v3301_v38, 0.0 }
  0xac   :  { %v159_v41 = vrot.slane %v158_v33, 4  ;;  %v167_v42 = vrot.slane %v166_v35, 4  ;;  %534 = vmatpush.msra.mxu1 %v500_v36 }
  0xae   :  { %v160_v44 = vadd.f32 %v159_v41, %v158_v33  ;;  %v168_v45 = vadd.f32 %v167_v42, %v166_v35  ;;  %535 = vmatpush.msra.mxu1 %v499_v37  ;;  %v497_v33 = vld [vmem:[%s6066_s6 + $0xc0] sm:$0xff]  ;;  %v476_v35 = vld [vmem:[%s6066_s6 + $0x18] sm:$0xff]  ;;  %v475_v42 = vld [vmem:[%s6066_s6 + $0x10] sm:$0xff] }
  0xaf   :  { %v496_v41 = vld [vmem:[%s6066_s6 + $0xb8] sm:$0xff] }
  0xb0   :  { %v161_v43 = vrot.slane %v160_v44, 2  ;;  %v169_v46 = vrot.slane %v168_v45, 2 }
  0xb2   :  { %v170_v58 = vadd.f32 %v169_v46, %v168_v45  ;;  %v162_v59 = vadd.f32 %v161_v43, %v160_v44  ;;  %v474_v45 = vld [vmem:[%s6066_s6 + $0x8] sm:$0xff]  ;;  %v473_v46 = vld [vmem:[%s6066_s6] sm:$0xff] }
  0xb3   :  { %v494_v43 = vld [vmem:[%s6066_s6 + $0xa8] sm:$0xff] }
  0xb4   :  { %v171_v47 = vrot.slane %v170_v58, 1  ;;  %v163_v60 = vrot.slane %v162_v59, 1 }
  0xb6   :  { %v164_v61 = vadd.f32 %v163_v60, %v162_v59  ;;  %v172_v63 = vadd.f32 %v171_v47, %v170_v58  ;;  %v492_v47 = vld [vmem:[%s6066_s6 + $0x98] sm:$0xff] }
  0xb8   :  { %v180_v51 = vmul.f32 %v3317_v49, %v164_v61  ;;  %v181_v0 = vmul.f32 %v3317_v49, %v172_v63  ;;  %v491_v61 = vld [vmem:[%s6066_s6 + $0x90] sm:$0xff]  ;;  %v490_v63 = vld [vmem:[%s6066_s6 + $0x88] sm:$0xff] }
  0xba   :  { %262 = vmatmul.f32.vlgmr.msra.gmra.mxu2 %v180_v51  ;;  %2658 = vmatmul.msk.f32.vlgmr.msra.gmra.mxu3 %vm242_vm5, %v181_v0 }
  0xbb   :  { %2659 = vmatmul.msk.f32.vlgmr.msrb.gmra.mxu0 %vm242_vm5, %v181_v0  ;;  %413 = vmatpush.msra.mxu2 %v3059_v48  ;;  %v489_v0 = vld [vmem:[%s6066_s6 + $0x80] sm:$0xff] }
  0xbc   :  { %510 = vmatpush.msra.mxu3 %v488_v25 }
  0xbd   :  { %414 = vmatpush.msra.mxu2 %v3069_v50 }
  0xbf   :  { %415 = vmatpush.msra.mxu2 %v3081_v52 }
  0xc1   :  { %416 = vmatpush.msra.mxu2 %v3094_v54 }
  0xc2   :  { %302 = vmatmul.f32.vlgmr.msrb.gmra.mxu3 %v180_v51 }
  0xc3   :  { %417 = vmatpush.msra.mxu2 %v3107_v56 }
  0xc5   :  { %418 = vmatpush.msra.mxu2 %v3144_v62 }
  0xc7   :  { %419 = vmatpush.msra.mxu2 %v3159_v1 }
  0xc9   :  { %420 = vmatpush.msra.mxu2 %v3174_v4 }
  0xcb   :  { %421 = vmatpush.msra.mxu2 %v3189_v7 }
  0xcd   :  { %422 = vmatpush.msra.mxu2 %v3204_v10 }
  0xcf   :  { %423 = vmatpush.msra.mxu2 %v3219_v13 }
  0xd1   :  { %424 = vmatpush.msra.mxu2 %v3234_v19 }
  0xd3   :  { %425 = vmatpush.msra.mxu2 %v3248_v22 }
  0xd5   :  { %426 = vmatpush.msra.mxu2 %v3263_v26  ;;  %v487_v26 = vld [vmem:[%s6066_s6 + $0x70] sm:$0xff] }
  0xd6   :  { %511 = vmatpush.msra.mxu3 %v487_v26 }
  0xd8   :  { %512 = vmatpush.msra.mxu3 %v486_v28 }
  0xda   :  { %513 = vmatpush.msra.mxu3 %v485_v29 }
  0xdc   :  { %514 = vmatpush.msra.mxu3 %v484_v30 }
  0xde   :  { %515 = vmatpush.msra.mxu3 %v483_v14 }
  0xe0   :  { %516 = vmatpush.msra.mxu3 %v482_v31 }
  0xe2   :  { %517 = vmatpush.msra.mxu3 %v481_v32 }
  0xe4   :  { %518 = vmatpush.msra.mxu3 %v480_v34 }
  0xe6   :  { %519 = vmatpush.msra.mxu3 %v479_v23 }
 0x138   :  { %v323_v56 = vpop.f32.mrf.mxu0 }
 0x13d   :  { %v263_v48 = vpop.f32.mrf.mxu2  ;;  %v283_v50 = vpop.f32.mrf.mxu3 }
 0x13e   :  { %v284_v52 = vadd.f32 %v283_v50, %v263_v48 }
 0x140   :  { %v326_v53 = vperm.slane %v284_v52, 0 }
 0x142   :  { %v3338_v54 = vsub.f32 %v135_v27, %v326_v53  ;;  %v478_v27 = vld [vmem:[%s6066_s6 + $0x28] sm:$0xff] }
 0x143   :  { %520 = vmatpush.msra.mxu3 %v478_v27 }
 0x144   :  { %v330_v55 = vmul.f32 %v3338_v54, %v3338_v54 }
 0x145   :  { %v303_v62 = vpop.f32.mrf.mxu3  ;;  %521 = vmatpush.msra.mxu3 %v477_v40 }
 0x146   :  { %v332_v1 = vsel %vm157_vm2, %v330_v55, 0.0  ;;  %v324_v2 = vadd.f32 %v323_v56, %v303_v62 }
 0x147   :  { %v333_v3 = vrot.slane %v332_v1, 4  ;;  %522 = vmatpush.msra.mxu3 %v476_v35 }
 0x148   :  { %v327_v4 = vperm.slane %v324_v2, 0 }
 0x149   :  { %v334_v5 = vadd.f32 %v333_v3, %v332_v1  ;;  %523 = vmatpush.msra.mxu3 %v475_v42 }
 0x14a   :  { %v3344_v6 = vsub.f32 %v3301_v38, %v327_v4  ;;  %v498_v38 = vld [vmem:[%s6066_s6 + $0xc8] sm:$0xff] }
 0x14b   :  { %v335_v7 = vrot.slane %v334_v5, 2  ;;  %536 = vmatpush.msra.mxu1 %v498_v38  ;;  %524 = vmatpush.msra.mxu3 %v474_v45 }
 0x14c   :  { %v331_v8 = vmul.f32 %v3344_v6, %v3344_v6 }
 0x14d   :  { %v336_v9 = vadd.f32 %v335_v7, %v334_v5  ;;  %537 = vmatpush.msra.mxu1 %v497_v33  ;;  %525 = vmatpush.msra.mxu3 %v473_v46  ;;  %v455_v5 = vld [vmem:[%s6094_s22] sm:$0x3] }
 0x14e   :  { %v339_v10 = vsel %vm165_vm3, %v331_v8, 0.0  ;;  %v458_v25 = vperm.slane %v455_v5, 1 }
 0x14f   :  { %v340_v11 = vrot.slane %v339_v10, 4  ;;  %v337_v12 = vrot.slane %v336_v9, 1  ;;  %538 = vmatpush.msra.mxu1 %v496_v41 }
 0x151   :  { %v341_v13 = vadd.f32 %v340_v11, %v339_v10  ;;  %v338_v16 = vadd.f32 %v337_v12, %v336_v9  ;;  %539 = vmatpush.msra.mxu1 %v495_v39  ;;  %v463_v9 = vld [vmem:[%s6095_s1] sm:$0x3]  ;;  %v457_v11 = vperm.slane %v455_v5, 0  ;;  %v3539_v5 = vld [vmem:[%s6073_s13 + $0x1c8] sm:$0xff]  ;;  %s2759_s1 = smov [#allocation2]  }
 0x152   :  { %v466_v29 = vperm.slane %v463_v9, 1  ;;  %s2627_s24 = sshll.u32 %s2759_s1, 4  ;;  %s2628_s24 = int_to_ptr.vmem [resolvable:$true] %s2627_s24 }
 0x153   :  { %v342_v17 = vrot.slane %v341_v13, 2  ;;  %v346_v19 = vmul.f32 %v338_v16, %v3317_v49  ;;  %540 = vmatpush.msra.mxu1 %v494_v43  ;;  %v465_v16 = vperm.slane %v463_v9, 0  ;;  %v3558_v9 = vld [vmem:[%s6073_s13 + $0xa0] sm:$0xff] }
 0x155   :  { %v343_v20 = vadd.f32 %v342_v17, %v341_v13  ;;  %367 = vmatmul.f32.vlgmr.msrb.gmra.mxu1 %v346_v19  ;;  %407 = vmatmul.f32.vlgmr.msra.gmra.mxu0 %v346_v19 }
 0x156   :  { %541 = vmatpush.msra.mxu1 %v493_v57 }
 0x157   :  { %v344_v21 = vrot.slane %v343_v20, 1 }
 0x158   :  { %542 = vmatpush.msra.mxu1 %v492_v47 }
 0x159   :  { %v345_v22 = vadd.f32 %v344_v21, %v343_v20 }
 0x15a   :  { %543 = vmatpush.msra.mxu1 %v491_v61  ;;  %v642_v61 = vld [vmem:[%s6071_s11] sm:$0xff] }
 0x15b   :  { %v347_v24 = vmul.f32 %v345_v22, %v3317_v49 }
 0x15c   :  { %544 = vmatpush.msra.mxu1 %v490_v63  ;;  %v643_v63 = vld [vmem:[%s6071_s11 + $0x8] sm:$0xff] }
 0x15d   :  { %2660 = vmatmul.msk.f32.vlgmr.msrb.gmra.mxu2 %vm242_vm5, %v347_v24  ;;  %688 = vmatpush.msrb.mxu3 %v643_v63  ;;  %v3763_v63 = vld [vmem:[%s6073_s13 + $0x10] sm:$0xff] }
 0x15e   :  { %545 = vmatpush.msra.mxu1 %v489_v0  ;;  %v3482_v0 = vld [vmem:[%s6073_s13 + $0xf8] sm:$0xff] }
 0x160   :  { %668 = vmatpush.msrb.mxu1 %v642_v61  ;;  %v3756_v61 = vld [vmem:[%s6073_s13 + $0x158] sm:$0xff] }
 0x165   :  { %2661 = vmatmul.msk.f32.vlgmr.msra.gmra.mxu2 %vm242_vm5, %v347_v24 }
 0x1d2   :  { %v368_v44 = vpop.f32.mrf.mxu1  ;;  %v408_v51 = vpop.f32.mrf.mxu0 }
 0x1d3   :  { %v369_v58 = vadd.f32 1e-05, %v368_v44  ;;  %v409_v48 = vadd.f32 1e-05, %v408_v51  ;;  %v3477_v51 = vld [vmem:[%s6073_s13 + $0xf0] sm:$0xff] }
 0x1e0   :  { %v388_v59 = vpop.f32.mrf.mxu2 }
 0x1e1   :  { %v389_v60 = vadd.f32 %v388_v59, %v369_v58 }
 0x1e3   :  { %2696 = vrsqrt.f32 %v389_v60  ;;  %vm437_vm7 = vweird.f32 %v389_v60 }
 0x1e8   :  { %v428_v50 = vpop.f32.mrf.mxu2 }
 0x1e9   :  { %v2697_v52 = vpop.eup %2696  ;;  %v429_v53 = vadd.f32 %v428_v50, %v409_v48  ;;  %v3487_v48 = vld [vmem:[%s6073_s13 + $0xe0] sm:$0xff] }
 0x1ea   :  { %v432_v55 = vmul.f32 %v2697_v52, %v389_v60  ;;  %vm438_vm6 = vweird.f32 %v2697_v52 }
 0x1eb   :  { %2698 = vrsqrt.f32 %v429_v53  ;;  %vm439_vm8 = vmor %vm437_vm7, %vm438_vm6  ;;  %vm447_vm10 = vweird.f32 %v429_v53 }
 0x1ec   :  { %v433_v56 = vmul.f32 %v2697_v52, %v432_v55  ;;  %v3499_v55 = vld [vmem:[%s6073_s13 + $0xd0] sm:$0xff] }
 0x1ee   :  { %v434_v62 = vmul.f32 0.5, %v433_v56  ;;  %v3504_v56 = vld [vmem:[%s6073_s13 + $0xd8] sm:$0xff] }
 0x1f0   :  { %v435_v1 = vsub.f32 1.5, %v434_v62  ;;  %v3511_v62 = vld [vmem:[%s6073_s13 + $0x1d0] sm:$0xff] }
 0x1f1   :  { %v2699_v2 = vpop.eup %2698 }
 0x1f2   :  { %v436_v3 = vmul.f32 %v2697_v52, %v435_v1  ;;  %v442_v4 = vmul.f32 %v2699_v2, %v429_v53  ;;  %vm448_vm9 = vweird.f32 %v2699_v2  ;;  %v3516_v1 = vld [vmem:[%s6073_s13 + $0xc0] sm:$0xff] }
 0x1f3   :  { %vm449_vm11 = vmor %vm447_vm10, %vm448_vm9 }
 0x1f4   :  { %v440_v7 = vsel %vm439_vm8, %v2697_v52, %v436_v3  ;;  %v443_v8 = vmul.f32 %v2699_v2, %v442_v4  ;;  %v3494_v52 = vld [vmem:[%s6073_s13 + $0xe8] sm:$0xff]  ;;  %v3527_v3 = vld [vmem:[%s6073_s13 + $0x1d8] sm:$0xff]  ;;  %v3534_v4 = vld [vmem:[%s6073_s13 + $0x1c0] sm:$0xff]  ;;  %vm2620_vm8 = vcmask 918528  }
 0x1f5   :  { %v451_v10 = vperm.slane %v440_v7, 0  ;;  %v3544_v7 = vld [vmem:[%s6073_s13 + $0xb0] sm:$0xff] }
 0x1f6   :  { %v444_v12 = vmul.f32 0.5, %v443_v8  ;;  %v3549_v8 = vld [vmem:[%s6073_s13 + $0xb8] sm:$0xff] }
 0x1f7   :  { %v453_v13 = vmul.f32 %v451_v10, %v3338_v54  ;;  %v559_v54 = vld [vmem:[%s6068_s8] sm:$0xff]  ;;  %v3563_v10 = vld [vmem:[%s6073_s13 + $0xa8] sm:$0xff] }
 0x1f8   :  { %v445_v17 = vsub.f32 1.5, %v444_v12  ;;  %579 = vmatpush.msrb.mxu2 %v559_v54  ;;  %613 = vmatpush.msrb.mxu0 %v559_v54  ;;  %v3571_v12 = vld [vmem:[%s6073_s13 + $0x90] sm:$0xff] }
 0x1f9   :  { %v461_v19 = vmul.f32 %v457_v11, %v453_v13  ;;  %v3576_v13 = vld [vmem:[%s6073_s13 + $0x98] sm:$0xff]  ;;  %v3600_v54 = vld [vmem:[%s6073_s13 + $0x1b0] sm:$0xff] }
 0x1fa   :  { %v446_v20 = vmul.f32 %v2699_v2, %v445_v17  ;;  %772 = vmatpush.msra.mxu2 %v3477_v51  ;;  %794 = vmatpush.msra.mxu0 %v3511_v62 }
 0x1fb   :  { %v469_v21 = vadd.f32 %v465_v16, %v461_v19 }
 0x1fc   :  { %v450_v22 = vsel %vm449_vm11, %v2699_v2, %v446_v20  ;;  %773 = vmatpush.msra.mxu2 %v3487_v48  ;;  %v3521_v2 = vld [vmem:[%s6073_s13 + $0xc8] sm:$0xff]  ;;  %795 = vmatpush.msra.mxu0 %v3534_v4 }
 0x1fd   :  { %v452_v24 = vperm.slane %v450_v22, 0  ;;  %v471_v26 = vmax.f32 %v469_v21, 0.0 }
 0x1fe   :  { %774 = vmatpush.msra.mxu2 %v3499_v55  ;;  %796 = vmatpush.msra.mxu0 %v3600_v54 }
 0x1ff   :  { %v454_v28 = vmul.f32 %v452_v24, %v3344_v6  ;;  %526 = vmatmul.f32.vlgmr.msra.gmra.mxu3 %v471_v26 }
 0x200   :  { %834 = vmatpush.msra.mxu3 %v3527_v3  ;;  %775 = vmatpush.msra.mxu2 %v3516_v1 }
 0x201   :  { %v462_v30 = vmul.f32 %v458_v25, %v454_v28  ;;  %v2691_v25 = vld [vmem:[%s6069_s9] ss:$0 sm:$0xff] }
 0x202   :  { %835 = vmatpush.msra.mxu3 %v3539_v5  ;;  %776 = vmatpush.msra.mxu2 %v3544_v7  ;;  %v2692_v28 = vld [vmem:[%s6070_s10] ss:$0 sm:$0xff] }
 0x203   :  { %v470_v14 = vadd.f32 %v466_v29, %v462_v30 }
 0x204   :  { %777 = vmatpush.msra.mxu2 %v3558_v9 }
 0x205   :  { %v472_v31 = vmax.f32 %v470_v14, 0.0 }
 0x206   :  { %778 = vmatpush.msra.mxu2 %v3571_v12 }
 0x207   :  { %2662 = vmatmul.msk.f32.vlgmr.msra.gmra.mxu1 %vm242_vm5, %v472_v31  ;;  %v3595_v31 = vld [vmem:[%s6073_s13 + $0x80] sm:$0xff] }
 0x208   :  { %812 = vmatpush.msra.mxu1 %v3482_v0  ;;  %779 = vmatpush.msra.mxu2 %v3595_v31 }
 0x20a   :  { %813 = vmatpush.msra.mxu1 %v3494_v52 }
 0x20c   :  { %814 = vmatpush.msra.mxu1 %v3504_v56 }
 0x20e   :  { %815 = vmatpush.msra.mxu1 %v3521_v2 }
 0x210   :  { %816 = vmatpush.msra.mxu1 %v3549_v8 }
 0x212   :  { %817 = vmatpush.msra.mxu1 %v3563_v10 }
 0x214   :  { %818 = vmatpush.msra.mxu1 %v3576_v13 }
 0x282   :  { %v527_v32 = vpop.f32.mrf.mxu3 }
 0x283   :  { %v528_v18 = vadd.f32 %v2690_v15, %v527_v32  ;;  %v3605_v15 = vld [vmem:[%s6073_s13 + $0x88] sm:$0xff]  ;;  %v3612_v32 = vld [vmem:[%s6073_s13 + $0x1b8] sm:$0xff] }
 0x284   :  { %v547_v6 = vpop.f32.mrf.mxu1  ;;  %819 = vmatpush.msra.mxu1 %v3605_v15  ;;  %836 = vmatpush.msra.mxu3 %v3612_v32 }
 0x285   :  { %v548_v34 = vadd.f32 %v547_v6, %v528_v18  ;;  %v3619_v18 = vld [vmem:[%s6073_s13 + $0x70] sm:$0xff]  ;;  %v3624_v6 = vld [vmem:[%s6073_s13 + $0x1a0] sm:$0xff] }
 0x286   :  { %780 = vmatpush.msra.mxu2 %v3619_v18  ;;  %797 = vmatpush.msra.mxu0 %v3624_v6 }
 0x287   :  { %v551_v36 = vsel %vm550_vm12, %v548_v34, 0.0 }
 0x288   :  { %v552_v23 = vrot.slane %v551_v36, 4 }
 0x28a   :  { %v553_v37 = vadd.f32 %v552_v23, %v551_v36  ;;  %v3636_v36 = vld [vmem:[%s6073_s13 + $0x1a8] sm:$0xff]  ;;  %v3643_v23 = vld [vmem:[%s6073_s13 + $0x60] sm:$0xff] }
 0x28b   :  { %837 = vmatpush.msra.mxu3 %v3636_v36  ;;  %781 = vmatpush.msra.mxu2 %v3643_v23 }
 0x28c   :  { %v554_v27 = vrot.slane %v553_v37, 2 }
 0x28e   :  { %v555_v38 = vadd.f32 %v554_v27, %v553_v37  ;;  %v3648_v37 = vld [vmem:[%s6073_s13 + $0x190] sm:$0xff]  ;;  %v3653_v27 = vld [vmem:[%s6073_s13 + $0x68] sm:$0xff] }
 0x28f   :  { %798 = vmatpush.msra.mxu0 %v3648_v37 }
 0x290   :  { %v556_v40 = vrot.slane %v555_v38, 1 }
 0x292   :  { %v557_v33 = vadd.f32 %v556_v40, %v555_v38  ;;  %v3660_v38 = vld [vmem:[%s6073_s13 + $0x198] sm:$0xff]  ;;  %v3667_v40 = vld [vmem:[%s6073_s13 + $0x50] sm:$0xff] }
 0x293   :  { %838 = vmatpush.msra.mxu3 %v3660_v38  ;;  %782 = vmatpush.msra.mxu2 %v3667_v40 }
 0x294   :  { %v558_v35 = vmul.f32 %v557_v33, %v3317_v49  ;;  %v3672_v33 = vld [vmem:[%s6073_s13 + $0x180] sm:$0xff] }
 0x295   :  { %799 = vmatpush.msra.mxu0 %v3672_v33 }
 0x296   :  { %2663 = vmatmul.msk.f32.vlgmr.msrb.gmra.mxu2 %vm560_vm13, %v558_v35  ;;  %v3677_v35 = vld [vmem:[%s6073_s13 + $0x58] sm:$0xff] }
 0x319   :  { %v581_v41 = vpop.f32.mrf.mxu2 }
 0x31a   :  { %v584_v42 = vperm.slane %v581_v41, 0  ;;  %v3684_v41 = vld [vmem:[%s6073_s13 + $0x188] sm:$0xff] }
 0x31b   :  { %839 = vmatpush.msra.mxu3 %v3684_v41 }
 0x31c   :  { %v3461_v39 = vsub.f32 %v548_v34, %v584_v42  ;;  %v3629_v34 = vld [vmem:[%s6073_s13 + $0x78] sm:$0xff]  ;;  %v3691_v42 = vld [vmem:[%s6073_s13 + $0x40] sm:$0xff] }
 0x31d   :  { %820 = vmatpush.msra.mxu1 %v3629_v34  ;;  %783 = vmatpush.msra.mxu2 %v3691_v42 }
 0x31e   :  { %v586_v44 = vmul.f32 %v3461_v39, %v3461_v39 }
 0x31f   :  { %821 = vmatpush.msra.mxu1 %v3653_v27 }
 0x320   :  { %v587_v45 = vsel %vm550_vm12, %v586_v44, 0.0  ;;  %v3701_v44 = vld [vmem:[%s6073_s13 + $0x48] sm:$0xff] }
 0x321   :  { %v588_v43 = vrot.slane %v587_v45, 4  ;;  %822 = vmatpush.msra.mxu1 %v3677_v35 }
 0x323   :  { %v589_v46 = vadd.f32 %v588_v43, %v587_v45  ;;  %v3708_v45 = vld [vmem:[%s6073_s13 + $0x178] sm:$0xff]  ;;  %823 = vmatpush.msra.mxu1 %v3701_v44  ;;  %v3715_v43 = vld [vmem:[%s6073_s13 + $0x30] sm:$0xff] }
 0x324   :  { %840 = vmatpush.msra.mxu3 %v3708_v45  ;;  %784 = vmatpush.msra.mxu2 %v3715_v43 }
 0x325   :  { %v590_v57 = vrot.slane %v589_v46, 2 }
 0x327   :  { %v591_v58 = vadd.f32 %v590_v57, %v589_v46  ;;  %v3720_v46 = vld [vmem:[%s6073_s13 + $0x160] sm:$0xff]  ;;  %v3725_v57 = vld [vmem:[%s6073_s13 + $0x38] sm:$0xff] }
 0x328   :  { %824 = vmatpush.msra.mxu1 %v3725_v57 }
 0x329   :  { %v592_v59 = vrot.slane %v591_v58, 1 }
 0x32b   :  { %v593_v47 = vadd.f32 %v592_v59, %v591_v58  ;;  %v3732_v58 = vld [vmem:[%s6073_s13 + $0x168] sm:$0xff]  ;;  %v3739_v59 = vld [vmem:[%s6073_s13 + $0x20] sm:$0xff] }
 0x32c   :  { %841 = vmatpush.msra.mxu3 %v3732_v58  ;;  %785 = vmatpush.msra.mxu2 %v3739_v59 }
 0x32d   :  { %v594_v60 = vmul.f32 %v593_v47, %v3317_v49  ;;  %v3744_v47 = vld [vmem:[%s6073_s13 + $0x150] sm:$0xff] }
 0x32e   :  { %842 = vmatpush.msra.mxu3 %v3756_v61  ;;  %786 = vmatpush.msra.mxu2 %v3763_v63 }
 0x32f   :  { %2664 = vmatmul.msk.f32.vlgmr.msrb.gmra.mxu0 %vm560_vm13, %v594_v60  ;;  %v3749_v60 = vld [vmem:[%s6073_s13 + $0x28] sm:$0xff] }
 0x330   :  { %825 = vmatpush.msra.mxu1 %v3749_v60 }
 0x3ac   :  { %v615_v50 = vpop.f32.mrf.mxu0 }
 0x3ad   :  { %v616_v53 = vadd.f32 1e-05, %v615_v50  ;;  %v3768_v50 = vld [vmem:[%s6073_s13 + $0x140] sm:$0xff] }
 0x3af   :  { %2700 = vrsqrt.f32 %v616_v53  ;;  %vm624_vm15 = vweird.f32 %v616_v53 }
 0x3b5   :  { %v2701_v11 = vpop.eup %2700 }
 0x3b6   :  { %v619_v16 = vmul.f32 %v2701_v11, %v616_v53  ;;  %vm625_vm14 = vweird.f32 %v2701_v11  ;;  %v3773_v53 = vld [vmem:[%s6073_s13 + $0x18] sm:$0xff] }
 0x3b7   :  { %vm626_vm0 = vmor %vm624_vm15, %vm625_vm14  ;;  %826 = vmatpush.msra.mxu1 %v3773_v53 }
 0x3b8   :  { %v620_v17 = vmul.f32 %v2701_v11, %v619_v16  ;;  %v3787_v16 = vld [vmem:[%s6073_s13] sm:$0xff] }
 0x3b9   :  { %787 = vmatpush.msra.mxu2 %v3787_v16 }
 0x3ba   :  { %v621_v19 = vmul.f32 0.5, %v620_v17  ;;  %v3792_v17 = vld [vmem:[%s6073_s13 + $0x130] sm:$0xff] }
 0x3bb   :  { %899 = vmatpush.msrb.mxu2 %v3511_v62  ;;  %v3836_v62 = vld [vmem:[%s6073_s13 + $0x100] sm:$0xff] }
 0x3bc   :  { %v622_v20 = vsub.f32 1.5, %v621_v19  ;;  %v3797_v19 = vld [vmem:[%s6073_s13 + $0x8] sm:$0xff] }
 0x3bd   :  { %827 = vmatpush.msra.mxu1 %v3797_v19  ;;  %900 = vmatpush.msrb.mxu2 %v3534_v4 }
 0x3be   :  { %v623_v21 = vmul.f32 %v2701_v11, %v622_v20  ;;  %v3804_v20 = vld [vmem:[%s6073_s13 + $0x138] sm:$0xff] }
 0x3bf   :  { %901 = vmatpush.msrb.mxu2 %v3600_v54 }
 0x3c0   :  { %v627_v22 = vsel %vm626_vm0, %v2701_v11, %v623_v21  ;;  %v3780_v11 = vld [vmem:[%s6073_s13 + $0x148] sm:$0xff]  ;;  %v3811_v21 = vld [vmem:[%s6073_s13 + $0x120] sm:$0xff] }
 0x3c1   :  { %v628_v24 = vperm.slane %v627_v22, 0  ;;  %843 = vmatpush.msra.mxu3 %v3780_v11  ;;  %v3816_v22 = vld [vmem:[%s6073_s13 + $0x128] sm:$0xff]  ;;  %902 = vmatpush.msrb.mxu2 %v3624_v6 }
 0x3c2   :  { %v1420_v6 = vld [vmem:[%s6076_s16 + $0xd28] sm:$0xff] }
 0x3c3   :  { %v629_v26 = vmul.f32 %v628_v24, %v3461_v39  ;;  %v3696_v39 = vld [vmem:[%s6073_s13 + $0x170] sm:$0xff]  ;;  %844 = vmatpush.msra.mxu3 %v3804_v20  ;;  %903 = vmatpush.msrb.mxu2 %v3648_v37 }
 0x3c4   :  { %800 = vmatpush.msra.mxu0 %v3696_v39  ;;  %v3824_v24 = vld [vmem:[%s6073_s13 + $0x110] sm:$0xff] }
 0x3c5   :  { %v634_v29 = vmul.f32 %v2691_v25, %v629_v26  ;;  %845 = vmatpush.msra.mxu3 %v3816_v22  ;;  %v3829_v25 = vld [vmem:[%s6073_s13 + $0x118] sm:$0xff]  ;;  %v3841_v26 = vld [vmem:[%s6073_s13 + $0x108] sm:$0xff]  ;;  %904 = vmatpush.msrb.mxu2 %v3672_v33 }
 0x3c6   :  { %801 = vmatpush.msra.mxu0 %v3720_v46 }
 0x3c7   :  { %v639_v30 = vadd.f32 %v2692_v28, %v634_v29  ;;  %846 = vmatpush.msra.mxu3 %v3829_v25  ;;  %905 = vmatpush.msrb.mxu2 %v3696_v39  ;;  %v1194_v39 = vld [vmem:[%s6076_s16 + $0x618] sm:$0xff] }
 0x3c8   :  { %802 = vmatpush.msra.mxu0 %v3744_v47 }
 0x3c9   :  { %v640_v14 = vmax.f32 %v639_v30, 0.0  ;;  %847 = vmatpush.msra.mxu3 %v3841_v26  ;;  %906 = vmatpush.msrb.mxu2 %v3720_v46  ;;  %v1374_v46 = vld [vmem:[%s6076_s16 + $0xbb8] sm:$0xff] }
 0x3ca   :  { %803 = vmatpush.msra.mxu0 %v3768_v50 }
 0x3cb   :  { %2665 = vmatmul.msk.f32.vlgmr.msrb.gmra.mxu1 %vm560_vm13, %v640_v14  ;;  %641 = vst.msk [vmem:[#allocation2] sm:$0x3] %vm550_vm12, %v640_v14  ;;  %2666 = vmatmul.msk.f32.vlgmr.msrb.gmra.mxu3 %vm560_vm13, %v640_v14 }
 0x3cc   :  { %804 = vmatpush.msra.mxu0 %v3792_v17  ;;  %939 = vmatpush.msrb.mxu1 %v3527_v3  ;;  %v644_v3 = vld [vmem:[%s6072_s12] sm:$0x3]  ;;  %2632 = dma.vmem_to_hbm [thread:$0]  %s2628_s24, 32, %s2630_s23, [#allocation3]  }
 0x3cd   :  { %917 = vmatpush.msrb.mxu3 %v3482_v0  ;;  %v646_v4 = vperm.slane %v644_v3, 0  ;;  %907 = vmatpush.msrb.mxu2 %v3744_v47  ;;  %v1164_v47 = vld [vmem:[%s6076_s16 + $0x528] sm:$0xff] }
 0x3ce   :  { %805 = vmatpush.msra.mxu0 %v3811_v21  ;;  %940 = vmatpush.msrb.mxu1 %v3539_v5 }
 0x3cf   :  { %918 = vmatpush.msrb.mxu3 %v3494_v52  ;;  %v647_v52 = vperm.slane %v644_v3, 1  ;;  %908 = vmatpush.msrb.mxu2 %v3768_v50  ;;  %v1360_v50 = vld [vmem:[%s6076_s16 + $0xb48] sm:$0xff]  ;;  %v1330_v3 = vld [vmem:[%s6076_s16 + $0xa58] sm:$0xff] }
 0x3d0   :  { %806 = vmatpush.msra.mxu0 %v3824_v24  ;;  %941 = vmatpush.msrb.mxu1 %v3612_v32  ;;  %v1435_v32 = vld [vmem:[%s6076_s16 + $0xda0] sm:$0xff] }
 0x3d1   :  { %919 = vmatpush.msrb.mxu3 %v3504_v56  ;;  %909 = vmatpush.msrb.mxu2 %v3792_v17  ;;  %v1149_v17 = vld [vmem:[%s6076_s16 + $0x4b0] sm:$0xff] }
 0x3d2   :  { %807 = vmatpush.msra.mxu0 %v3836_v62  ;;  %942 = vmatpush.msrb.mxu1 %v3636_v36  ;;  %v1404_v36 = vld [vmem:[%s6076_s16 + $0xca8] sm:$0xff] }
 0x3d3   :  { %920 = vmatpush.msrb.mxu3 %v3521_v2  ;;  %910 = vmatpush.msrb.mxu2 %v3811_v21 }
 0x3d4   :  { %877 = vmatpush.msrb.mxu0 %v3477_v51  ;;  %943 = vmatpush.msrb.mxu1 %v3660_v38  ;;  %v1405_v38 = vld [vmem:[%s6076_s16 + $0xcb0] sm:$0xff] }
 0x3d5   :  { %921 = vmatpush.msrb.mxu3 %v3549_v8  ;;  %911 = vmatpush.msrb.mxu2 %v3824_v24  ;;  %v1150_v24 = vld [vmem:[%s6076_s16 + $0x4b8] sm:$0xff] }
 0x3d6   :  { %878 = vmatpush.msrb.mxu0 %v3487_v48  ;;  %944 = vmatpush.msrb.mxu1 %v3684_v41  ;;  %v1389_v41 = vld [vmem:[%s6076_s16 + $0xc30] sm:$0xff] }
 0x3d7   :  { %922 = vmatpush.msrb.mxu3 %v3563_v10  ;;  %912 = vmatpush.msrb.mxu2 %v3836_v62 }
 0x3d8   :  { %879 = vmatpush.msrb.mxu0 %v3499_v55  ;;  %945 = vmatpush.msrb.mxu1 %v3708_v45  ;;  %v1195_v45 = vld [vmem:[%s6076_s16 + $0x620] sm:$0xff] }
 0x3d9   :  { %923 = vmatpush.msrb.mxu3 %v3576_v13 }
 0x3da   :  { %880 = vmatpush.msrb.mxu0 %v3516_v1  ;;  %946 = vmatpush.msrb.mxu1 %v3732_v58 }
 0x3db   :  { %924 = vmatpush.msrb.mxu3 %v3605_v15  ;;  %v1434_v15 = vld [vmem:[%s6076_s16 + $0xd98] sm:$0xff] }
 0x3dc   :  { %881 = vmatpush.msrb.mxu0 %v3544_v7  ;;  %947 = vmatpush.msrb.mxu1 %v3756_v61 }
 0x3dd   :  { %925 = vmatpush.msrb.mxu3 %v3629_v34  ;;  %v1224_v34 = vld [vmem:[%s6076_s16 + $0x708] sm:$0xff] }
 0x3de   :  { %882 = vmatpush.msrb.mxu0 %v3558_v9  ;;  %948 = vmatpush.msrb.mxu1 %v3780_v11 }
 0x3df   :  { %926 = vmatpush.msrb.mxu3 %v3653_v27  ;;  %v1225_v27 = vld [vmem:[%s6076_s16 + $0x710] sm:$0xff] }
 0x3e0   :  { %883 = vmatpush.msrb.mxu0 %v3571_v12  ;;  %949 = vmatpush.msrb.mxu1 %v3804_v20  ;;  %v1345_v20 = vld [vmem:[%s6076_s16 + $0xad0] sm:$0xff] }
 0x3e1   :  { %927 = vmatpush.msrb.mxu3 %v3677_v35  ;;  %v1210_v35 = vld [vmem:[%s6076_s16 + $0x698] sm:$0xff] }
 0x3e2   :  { %884 = vmatpush.msrb.mxu0 %v3595_v31  ;;  %950 = vmatpush.msrb.mxu1 %v3816_v22 }
 0x3e3   :  { %928 = vmatpush.msrb.mxu3 %v3701_v44 }
 0x3e4   :  { %885 = vmatpush.msrb.mxu0 %v3619_v18  ;;  %951 = vmatpush.msrb.mxu1 %v3829_v25  ;;  %v1419_v18 = vld [vmem:[%s6076_s16 + $0xd20] sm:$0xff]  ;;  %v1134_v25 = vld [vmem:[%s6076_s16 + $0x438] sm:$0xff] }
 0x3e5   :  { %929 = vmatpush.msrb.mxu3 %v3725_v57  ;;  %v1375_v57 = vld [vmem:[%s6076_s16 + $0xbc0] sm:$0xff] }
 0x3e6   :  { %886 = vmatpush.msrb.mxu0 %v3643_v23  ;;  %952 = vmatpush.msrb.mxu1 %v3841_v26  ;;  %v1329_v26 = vld [vmem:[%s6076_s16 + $0xa50] sm:$0xff] }
 0x3e7   :  { %930 = vmatpush.msrb.mxu3 %v3749_v60 }
 0x3e8   :  { %887 = vmatpush.msrb.mxu0 %v3667_v40  ;;  %v1209_v40 = vld [vmem:[%s6076_s16 + $0x690] sm:$0xff] }
 0x3e9   :  { %931 = vmatpush.msrb.mxu3 %v3773_v53 }
 0x3ea   :  { %888 = vmatpush.msrb.mxu0 %v3691_v42  ;;  %v1390_v42 = vld [vmem:[%s6076_s16 + $0xc38] sm:$0xff] }
 0x3eb   :  { %932 = vmatpush.msrb.mxu3 %v3797_v19  ;;  %v1344_v19 = vld [vmem:[%s6076_s16 + $0xac8] sm:$0xff] }
 0x3ec   :  { %889 = vmatpush.msrb.mxu0 %v3715_v43  ;;  %v1179_v43 = vld [vmem:[%s6076_s16 + $0x5a0] sm:$0xff] }
 0x3ee   :  { %890 = vmatpush.msrb.mxu0 %v3739_v59  ;;  %v1180_v59 = vld [vmem:[%s6076_s16 + $0x5a8] sm:$0xff] }
 0x3f0   :  { %891 = vmatpush.msrb.mxu0 %v3763_v63  ;;  %v1359_v63 = vld [vmem:[%s6076_s16 + $0xb40] sm:$0xff] }
 0x3f2   :  { %892 = vmatpush.msrb.mxu0 %v3787_v16  ;;  %v1165_v16 = vld [vmem:[%s6076_s16 + $0x530] sm:$0xff] }
 0x448   :  { %v670_v51 = vpop.f32.mrf.mxu1 }
 0x449   :  { %v3867_v0 = vadd.f32 %v670_v51, %v646_v4  ;;  %v1135_v51 = vld [vmem:[%s6076_s16 + $0x440] sm:$0xff] }
 0x44b   :  { %v693_v48 = vsel %vm157_vm2, %v3867_v0, 0.0 }
 0x44c   :  { %v694_v55 = vrot.slane %v693_v48, 4 }
 0x44e   :  { %v695_v56 = vadd.f32 %v694_v55, %v693_v48  ;;  %v690_v1 = vpop.f32.mrf.mxu3  ;;  %v1315_v55 = vld [vmem:[%s6076_s16 + $0x9e0] sm:$0xff] }
 0x44f   :  { %v3883_v2 = vadd.f32 %v690_v1, %v647_v52  ;;  %v1314_v52 = vld [vmem:[%s6076_s16 + $0x9d8] sm:$0xff]  ;;  %v1120_v1 = vld [vmem:[%s6076_s16 + $0x3c8] sm:$0xff] }
 0x450   :  { %v696_v5 = vrot.slane %v695_v56, 2 }
 0x451   :  { %v700_v7 = vsel %vm165_vm3, %v3883_v2, 0.0 }
 0x452   :  { %v697_v8 = vadd.f32 %v696_v5, %v695_v56  ;;  %v701_v9 = vrot.slane %v700_v7, 4  ;;  %v1299_v5 = vld [vmem:[%s6076_s16 + $0x960] sm:$0xff] }
 0x454   :  { %v698_v10 = vrot.slane %v697_v8, 1  ;;  %v702_v12 = vadd.f32 %v701_v9, %v700_v7  ;;  %v1300_v7 = vld [vmem:[%s6076_s16 + $0x968] sm:$0xff] }
 0x456   :  { %v699_v13 = vadd.f32 %v698_v10, %v697_v8  ;;  %v703_v28 = vrot.slane %v702_v12, 2 }
 0x458   :  { %v704_v29 = vadd.f32 %v703_v28, %v702_v12  ;;  %v707_v30 = vmul.f32 %v699_v13, %v3317_v49 }
 0x45a   :  { %v705_v14 = vrot.slane %v704_v29, 1  ;;  %788 = vmatmul.f32.vlgmr.msra.gmra.mxu2 %v707_v30  ;;  %828 = vmatmul.f32.vlgmr.msra.gmra.mxu1 %v707_v30 }
 0x45b   :  { %1486 = vmatpush.msra.mxu2 %v1224_v34  ;;  %1526 = vmatpush.msra.mxu1 %v1225_v27  ;;  %v1089_v34 = vld [vmem:[%s6076_s16 + $0x2d0] sm:$0xff]  ;;  %v1074_v27 = vld [vmem:[%s6076_s16 + $0x258] sm:$0xff] }
 0x45c   :  { %v706_v31 = vadd.f32 %v705_v14, %v704_v29 }
 0x45d   :  { %1487 = vmatpush.msra.mxu2 %v1209_v40  ;;  %1527 = vmatpush.msra.mxu1 %v1210_v35  ;;  %v1075_v40 = vld [vmem:[%s6076_s16 + $0x260] sm:$0xff] }
 0x45e   :  { %v708_v54 = vmul.f32 %v706_v31, %v3317_v49  ;;  %v1059_v35 = vld [vmem:[%s6076_s16 + $0x1e0] sm:$0xff] }
 0x45f   :  { %1488 = vmatpush.msra.mxu2 %v1194_v39  ;;  %1528 = vmatpush.msra.mxu1 %v1195_v45  ;;  %v1240_v39 = vld [vmem:[%s6076_s16 + $0x788] sm:$0xff]  ;;  %v1227_v45 = vld [vmem:[%s6076_s16 + $0x720] sm:$0xff] }
 0x460   :  { %2667 = vmatmul.msk.f32.vlgmr.msra.gmra.mxu0 %vm242_vm5, %v708_v54  ;;  %2668 = vmatmul.msk.f32.vlgmr.msra.gmra.mxu3 %vm242_vm5, %v708_v54 }
 0x461   :  { %1508 = vmatpush.msra.mxu0 %v1434_v15  ;;  %1548 = vmatpush.msra.mxu3 %v1435_v32  ;;  %v1104_v32 = vld [vmem:[%s6076_s16 + $0x348] sm:$0xff] }
 0x462   :  { %1489 = vmatpush.msra.mxu2 %v1179_v43  ;;  %1529 = vmatpush.msra.mxu1 %v1180_v59  ;;  %v1044_v43 = vld [vmem:[%s6076_s16 + $0x168] sm:$0xff] }
 0x463   :  { %1509 = vmatpush.msra.mxu0 %v1419_v18  ;;  %1549 = vmatpush.msra.mxu3 %v1420_v6  ;;  %v1284_v18 = vld [vmem:[%s6076_s16 + $0x8e8] sm:$0xff]  ;;  %v1105_v6 = vld [vmem:[%s6076_s16 + $0x350] sm:$0xff] }
 0x464   :  { %1490 = vmatpush.msra.mxu2 %v1164_v47  ;;  %1530 = vmatpush.msra.mxu1 %v1165_v16  ;;  %v1212_v59 = vld [vmem:[%s6076_s16 + $0x6a8] sm:$0xff]  ;;  %v1029_v47 = vld [vmem:[%s6076_s16 + $0xf0] sm:$0xff]  ;;  %v1182_v16 = vld [vmem:[%s6076_s16 + $0x5b8] sm:$0xff] }
 0x465   :  { %1510 = vmatpush.msra.mxu0 %v1404_v36  ;;  %1550 = vmatpush.msra.mxu3 %v1405_v38  ;;  %v1269_v36 = vld [vmem:[%s6076_s16 + $0x870] sm:$0xff]  ;;  %v1254_v38 = vld [vmem:[%s6076_s16 + $0x7f8] sm:$0xff] }
 0x466   :  { %1491 = vmatpush.msra.mxu2 %v1149_v17  ;;  %1531 = vmatpush.msra.mxu1 %v1150_v24  ;;  %v999_v17 = vld [vmem:[%s6076_s16] sm:$0xff]  ;;  %v1437_v24 = vld [vmem:[%s6076_s16 + $0xdb0] sm:$0xff] }
 0x467   :  { %1511 = vmatpush.msra.mxu0 %v1389_v41  ;;  %1551 = vmatpush.msra.mxu3 %v1390_v42  ;;  %v1239_v41 = vld [vmem:[%s6076_s16 + $0x780] sm:$0xff]  ;;  %v1060_v42 = vld [vmem:[%s6076_s16 + $0x1e8] sm:$0xff] }
 0x468   :  { %1492 = vmatpush.msra.mxu2 %v1134_v25  ;;  %1532 = vmatpush.msra.mxu1 %v1135_v51  ;;  %v1151_v25 = vld [vmem:[%s6076_s16 + $0x4c0] sm:$0xff]  ;;  %v1136_v51 = vld [vmem:[%s6076_s16 + $0x448] sm:$0xff] }
 0x469   :  { %1512 = vmatpush.msra.mxu0 %v1374_v46  ;;  %1552 = vmatpush.msra.mxu3 %v1375_v57  ;;  %v1045_v46 = vld [vmem:[%s6076_s16 + $0x170] sm:$0xff]  ;;  %v1211_v57 = vld [vmem:[%s6076_s16 + $0x6a0] sm:$0xff] }
 0x46a   :  { %1533 = vmatpush.msra.mxu1 %v1120_v1  ;;  %v1122_v1 = vld [vmem:[%s6076_s16 + $0x3d8] sm:$0xff] }
 0x46b   :  { %1513 = vmatpush.msra.mxu0 %v1359_v63  ;;  %1553 = vmatpush.msra.mxu3 %v1360_v50  ;;  %v1197_v63 = vld [vmem:[%s6076_s16 + $0x630] sm:$0xff]  ;;  %v1014_v50 = vld [vmem:[%s6076_s16 + $0x78] sm:$0xff] }
 0x46c   :  { %1534 = vmatpush.msra.mxu1 %v1105_v6  ;;  %v1046_v6 = vld [vmem:[%s6076_s16 + $0x178] sm:$0xff] }
 0x46d   :  { %1514 = vmatpush.msra.mxu0 %v1344_v19  ;;  %1554 = vmatpush.msra.mxu3 %v1345_v20  ;;  %v1000_v19 = vld [vmem:[%s6076_s16 + $0x8] sm:$0xff]  ;;  %v1166_v20 = vld [vmem:[%s6076_s16 + $0x538] sm:$0xff] }
 0x46f   :  { %1515 = vmatpush.msra.mxu0 %v1329_v26  ;;  %1555 = vmatpush.msra.mxu3 %v1330_v3  ;;  %v1152_v26 = vld [vmem:[%s6076_s16 + $0x4c8] sm:$0xff]  ;;  %v1422_v3 = vld [vmem:[%s6076_s16 + $0xd38] sm:$0xff] }
 0x471   :  { %1516 = vmatpush.msra.mxu0 %v1314_v52  ;;  %1556 = vmatpush.msra.mxu3 %v1315_v55  ;;  %v1407_v52 = vld [vmem:[%s6076_s16 + $0xcc0] sm:$0xff]  ;;  %v1121_v55 = vld [vmem:[%s6076_s16 + $0x3d0] sm:$0xff] }
 0x473   :  { %1517 = vmatpush.msra.mxu0 %v1299_v5  ;;  %1557 = vmatpush.msra.mxu3 %v1300_v7  ;;  %v1106_v5 = vld [vmem:[%s6076_s16 + $0x358] sm:$0xff]  ;;  %v1376_v7 = vld [vmem:[%s6076_s16 + $0xbc8] sm:$0xff] }
 0x475   :  { %1518 = vmatpush.msra.mxu0 %v1284_v18  ;;  %v1332_v18 = vld [vmem:[%s6076_s16 + $0xa68] sm:$0xff] }
 0x477   :  { %1519 = vmatpush.msra.mxu0 %v1269_v36  ;;  %v1317_v36 = vld [vmem:[%s6076_s16 + $0x9f0] sm:$0xff] }
 0x479   :  { %1520 = vmatpush.msra.mxu0 %v1254_v38  ;;  %v1302_v38 = vld [vmem:[%s6076_s16 + $0x978] sm:$0xff] }
 0x47b   :  { %1521 = vmatpush.msra.mxu0 %v1239_v41  ;;  %v1287_v41 = vld [vmem:[%s6076_s16 + $0x900] sm:$0xff] }
 0x4d7   :  { %v829_v60 = vpop.f32.mrf.mxu1 }
 0x4dd   :  { %v789_v23 = vpop.f32.mrf.mxu2  ;;  %v809_v37 = vpop.f32.mrf.mxu0 }
 0x4de   :  { %v810_v33 = vadd.f32 %v809_v37, %v789_v23  ;;  %v1090_v23 = vld [vmem:[%s6076_s16 + $0x2d8] sm:$0xff] }
 0x4df   :  { %v1270_v37 = vld [vmem:[%s6076_s16 + $0x878] sm:$0xff]  ;;  %1535 = vmatpush.msra.mxu1 %v1090_v23  ;;  %v1031_v23 = vld [vmem:[%s6076_s16 + $0x100] sm:$0xff] }
 0x4e0   :  { %v852_v44 = vperm.slane %v810_v33, 0  ;;  %v1255_v33 = vld [vmem:[%s6076_s16 + $0x800] sm:$0xff] }
 0x4e1   :  { %1536 = vmatpush.msra.mxu1 %v1075_v40  ;;  %v1016_v40 = vld [vmem:[%s6076_s16 + $0x88] sm:$0xff] }
 0x4e2   :  { %v3971_v58 = vsub.f32 %v3867_v0, %v852_v44  ;;  %v1119_v0 = vld [vmem:[%s6076_s16 + $0x3c0] sm:$0xff]  ;;  %v1226_v44 = vld [vmem:[%s6076_s16 + $0x718] sm:$0xff] }
 0x4e3   :  { %v849_v61 = vpop.f32.mrf.mxu3  ;;  %1493 = vmatpush.msra.mxu2 %v1119_v0  ;;  %1537 = vmatpush.msra.mxu1 %v1060_v42  ;;  %v1406_v0 = vld [vmem:[%s6076_s16 + $0xcb8] sm:$0xff] }
 0x4e4   :  { %v856_v53 = vmul.f32 %v3971_v58, %v3971_v58  ;;  %v850_v11 = vadd.f32 %v849_v61, %v829_v60  ;;  %v1030_v60 = vld [vmem:[%s6076_s16 + $0xf8] sm:$0xff]  ;;  %v1196_v61 = vld [vmem:[%s6076_s16 + $0x628] sm:$0xff] }
 0x4e5   :  { %1494 = vmatpush.msra.mxu2 %v1104_v32  ;;  %1538 = vmatpush.msra.mxu1 %v1045_v46  ;;  %v1062_v32 = vld [vmem:[%s6076_s16 + $0x1f8] sm:$0xff]  ;;  %v1272_v46 = vld [vmem:[%s6076_s16 + $0x888] sm:$0xff] }
 0x4e6   :  { %v858_v21 = vsel %vm157_vm2, %v856_v53, 0.0  ;;  %v853_v22 = vperm.slane %v850_v11, 0  ;;  %v1015_v53 = vld [vmem:[%s6076_s16 + $0x80] sm:$0xff]  ;;  %v1181_v11 = vld [vmem:[%s6076_s16 + $0x5b0] sm:$0xff] }
 0x4e7   :  { %v859_v62 = vrot.slane %v858_v21, 4  ;;  %1495 = vmatpush.msra.mxu2 %v1089_v34  ;;  %1539 = vmatpush.msra.mxu1 %v1030_v60  ;;  %v1047_v34 = vld [vmem:[%s6076_s16 + $0x180] sm:$0xff]  ;;  %v1257_v60 = vld [vmem:[%s6076_s16 + $0x810] sm:$0xff] }
 0x4e8   :  { %v4013_v4 = vsub.f32 %v3883_v2, %v853_v22  ;;  %v1167_v22 = vld [vmem:[%s6076_s16 + $0x540] sm:$0xff] }
 0x4e9   :  { %v860_v48 = vadd.f32 %v859_v62, %v858_v21  ;;  %1496 = vmatpush.msra.mxu2 %v1074_v27  ;;  %1540 = vmatpush.msra.mxu1 %v1015_v53  ;;  %v1436_v21 = vld [vmem:[%s6076_s16 + $0xda8] sm:$0xff]  ;;  %v1421_v62 = vld [vmem:[%s6076_s16 + $0xd30] sm:$0xff] }
 0x4ea   :  { %v857_v56 = vmul.f32 %v4013_v4, %v4013_v4  ;;  %v1032_v27 = vld [vmem:[%s6076_s16 + $0x108] sm:$0xff] }
 0x4eb   :  { %v861_v2 = vrot.slane %v860_v48, 2  ;;  %1497 = vmatpush.msra.mxu2 %v1059_v35  ;;  %1541 = vmatpush.msra.mxu1 %v1000_v19  ;;  %v1017_v35 = vld [vmem:[%s6076_s16 + $0x90] sm:$0xff] }
 0x4ec   :  { %v865_v8 = vsel %vm165_vm3, %v857_v56, 0.0  ;;  %v1391_v56 = vld [vmem:[%s6076_s16 + $0xc40] sm:$0xff] }
 0x4ed   :  { %v862_v9 = vadd.f32 %v861_v2, %v860_v48  ;;  %v866_v10 = vrot.slane %v865_v8, 4  ;;  %1498 = vmatpush.msra.mxu2 %v1044_v43  ;;  %v1137_v48 = vld [vmem:[%s6076_s16 + $0x450] sm:$0xff]  ;;  %v1392_v2 = vld [vmem:[%s6076_s16 + $0xc48] sm:$0xff] }
 0x4ef   :  { %v867_v12 = vadd.f32 %v866_v10, %v865_v8  ;;  %v863_v13 = vrot.slane %v862_v9, 1  ;;  %1499 = vmatpush.msra.mxu2 %v1029_v47  ;;  %v1107_v8 = vld [vmem:[%s6076_s16 + $0x360] sm:$0xff]  ;;  %v1256_v47 = vld [vmem:[%s6076_s16 + $0x808] sm:$0xff] }
 0x4f0   :  { %v1091_v10 = vld [vmem:[%s6076_s16 + $0x2e0] sm:$0xff] }
 0x4f1   :  { %v868_v28 = vrot.slane %v867_v12, 2  ;;  %v864_v29 = vadd.f32 %v863_v13, %v862_v9  ;;  %1500 = vmatpush.msra.mxu2 %v1014_v50  ;;  %v1377_v9 = vld [vmem:[%s6076_s16 + $0xbd0] sm:$0xff]  ;;  %v1092_v13 = vld [vmem:[%s6076_s16 + $0x2e8] sm:$0xff]  ;;  %v1242_v50 = vld [vmem:[%s6076_s16 + $0x798] sm:$0xff] }
 0x4f3   :  { %v869_v30 = vadd.f32 %v868_v28, %v867_v12  ;;  %v872_v14 = vmul.f32 %v864_v29, %v3317_v49  ;;  %1501 = vmatpush.msra.mxu2 %v999_v17  ;;  %v1361_v12 = vld [vmem:[%s6076_s16 + $0xb50] sm:$0xff]  ;;  %v1362_v28 = vld [vmem:[%s6076_s16 + $0xb58] sm:$0xff]  ;;  %v1076_v29 = vld [vmem:[%s6076_s16 + $0x268] sm:$0xff] }
 0x4f5   :  { %v870_v31 = vrot.slane %v869_v30, 1  ;;  %893 = vmatmul.f32.vlgmr.msrb.gmra.mxu0 %v872_v14  ;;  %933 = vmatmul.f32.vlgmr.msrb.gmra.mxu3 %v872_v14  ;;  %v1077_v14 = vld [vmem:[%s6076_s16 + $0x270] sm:$0xff] }
 0x4f6   :  { %1566 = vmatpush.msrb.mxu0 %v1226_v44  ;;  %v1271_v44 = vld [vmem:[%s6076_s16 + $0x880] sm:$0xff] }
 0x4f7   :  { %v871_v54 = vadd.f32 %v870_v31, %v869_v30  ;;  %v1346_v30 = vld [vmem:[%s6076_s16 + $0xad8] sm:$0xff]  ;;  %v1347_v31 = vld [vmem:[%s6076_s16 + $0xae0] sm:$0xff] }
 0x4f8   :  { %1567 = vmatpush.msrb.mxu0 %v1211_v57 }
 0x4f9   :  { %v873_v15 = vmul.f32 %v871_v54, %v3317_v49  ;;  %v1285_v49 = vld [vmem:[%s6076_s16 + $0x8f0] sm:$0xff] }
 0x4fa   :  { %1558 = vmatpush.msra.mxu3 %v1285_v49  ;;  %1568 = vmatpush.msrb.mxu0 %v1196_v61  ;;  %v1061_v54 = vld [vmem:[%s6076_s16 + $0x1f0] sm:$0xff]  ;;  %v1316_v49 = vld [vmem:[%s6076_s16 + $0x9e8] sm:$0xff] }
 0x4fb   :  { %2669 = vmatmul.msk.f32.vlgmr.msrb.gmra.mxu2 %vm242_vm5, %v873_v15  ;;  %2670 = vmatmul.msk.f32.vlgmr.msrb.gmra.mxu1 %vm242_vm5, %v873_v15  ;;  %v1331_v15 = vld [vmem:[%s6076_s16 + $0xa60] sm:$0xff] }
 0x4fc   :  { %1559 = vmatpush.msra.mxu3 %v1270_v37  ;;  %1569 = vmatpush.msrb.mxu0 %v1181_v11  ;;  %v1301_v37 = vld [vmem:[%s6076_s16 + $0x970] sm:$0xff] }
 0x4fd   :  { %1588 = vmatpush.msrb.mxu2 %v1436_v21  ;;  %1628 = vmatpush.msrb.mxu1 %v1437_v24 }
 0x4fe   :  { %1560 = vmatpush.msra.mxu3 %v1255_v33  ;;  %1570 = vmatpush.msrb.mxu0 %v1166_v20  ;;  %v1286_v33 = vld [vmem:[%s6076_s16 + $0x8f8] sm:$0xff] }
 0x4ff   :  { %1589 = vmatpush.msrb.mxu2 %v1421_v62  ;;  %1629 = vmatpush.msrb.mxu1 %v1422_v3  ;;  %v981_v3 = vld [vmem:[%s6074_s14] sm:$0x3] }
 0x500   :  { %1561 = vmatpush.msra.mxu3 %v1240_v39  ;;  %1571 = vmatpush.msrb.mxu0 %v1151_v25  ;;  %v1001_v39 = vld [vmem:[%s6076_s16 + $0x10] sm:$0xff] }
 0x501   :  { %1590 = vmatpush.msrb.mxu2 %v1406_v0  ;;  %1630 = vmatpush.msrb.mxu1 %v1407_v52 }
 0x502   :  { %1606 = vmatpush.msrb.mxu3 %v1227_v45  ;;  %1572 = vmatpush.msrb.mxu0 %v1136_v51  ;;  %v1002_v45 = vld [vmem:[%s6076_s16 + $0x18] sm:$0xff] }
 0x503   :  { %1591 = vmatpush.msrb.mxu2 %v1391_v56  ;;  %1631 = vmatpush.msrb.mxu1 %v1392_v2  ;;  %v984_v56 = vperm.slane %v981_v3, 1 }
 0x504   :  { %1607 = vmatpush.msrb.mxu3 %v1212_v59  ;;  %1573 = vmatpush.msrb.mxu0 %v1121_v55 }
 0x505   :  { %1592 = vmatpush.msrb.mxu2 %v1376_v7  ;;  %1632 = vmatpush.msrb.mxu1 %v1377_v9 }
 0x506   :  { %1608 = vmatpush.msrb.mxu3 %v1197_v63  ;;  %1574 = vmatpush.msrb.mxu0 %v1106_v5  ;;  %v1241_v63 = vld [vmem:[%s6076_s16 + $0x790] sm:$0xff] }
 0x507   :  { %1593 = vmatpush.msrb.mxu2 %v1361_v12  ;;  %1633 = vmatpush.msrb.mxu1 %v1362_v28 }
 0x508   :  { %1609 = vmatpush.msrb.mxu3 %v1182_v16  ;;  %1575 = vmatpush.msrb.mxu0 %v1091_v10  ;;  %v983_v10 = vperm.slane %v981_v3, 0  ;;  %v1274_v3 = vld [vmem:[%s6076_s16 + $0x898] sm:$0xff] }
 0x509   :  { %1594 = vmatpush.msrb.mxu2 %v1346_v30  ;;  %1634 = vmatpush.msrb.mxu1 %v1347_v31 }
 0x50a   :  { %1610 = vmatpush.msrb.mxu3 %v1167_v22  ;;  %1576 = vmatpush.msrb.mxu0 %v1076_v29 }
 0x50b   :  { %1595 = vmatpush.msrb.mxu2 %v1331_v15  ;;  %1635 = vmatpush.msrb.mxu1 %v1332_v18  ;;  %v1408_v18 = vld [vmem:[%s6076_s16 + $0xcc8] sm:$0xff] }
 0x50c   :  { %1611 = vmatpush.msrb.mxu3 %v1152_v26  ;;  %1577 = vmatpush.msrb.mxu0 %v1061_v54  ;;  %v1424_v54 = vld [vmem:[%s6076_s16 + $0xd48] sm:$0xff] }
 0x50d   :  { %1596 = vmatpush.msrb.mxu2 %v1316_v49  ;;  %1636 = vmatpush.msrb.mxu1 %v1317_v36  ;;  %v1409_v49 = vld [vmem:[%s6076_s16 + $0xcd0] sm:$0xff] }
 0x50e   :  { %1612 = vmatpush.msrb.mxu3 %v1137_v48  ;;  %1578 = vmatpush.msrb.mxu0 %v1046_v6  ;;  %v989_v48 = vld [vmem:[%s6075_s15] sm:$0x3]  ;;  %v1229_v6 = vld [vmem:[%s6076_s16 + $0x730] sm:$0xff] }
 0x50f   :  { %1597 = vmatpush.msrb.mxu2 %v1301_v37  ;;  %1637 = vmatpush.msrb.mxu1 %v1302_v38  ;;  %v992_v5 = vperm.slane %v989_v48, 1  ;;  %v991_v28 = vperm.slane %v989_v48, 0  ;;  %v1393_v36 = vld [vmem:[%s6076_s16 + $0xc50] sm:$0xff]  ;;  %v1394_v37 = vld [vmem:[%s6076_s16 + $0xc58] sm:$0xff]  ;;  %v1079_v48 = vld [vmem:[%s6076_s16 + $0x280] sm:$0xff] }
 0x510   :  { %1613 = vmatpush.msrb.mxu3 %v1122_v1  ;;  %1579 = vmatpush.msrb.mxu0 %v1031_v23  ;;  %v1214_v23 = vld [vmem:[%s6076_s16 + $0x6b8] sm:$0xff] }
 0x511   :  { %1598 = vmatpush.msrb.mxu2 %v1286_v33  ;;  %1638 = vmatpush.msrb.mxu1 %v1287_v41  ;;  %v1378_v38 = vld [vmem:[%s6076_s16 + $0xbd8] sm:$0xff]  ;;  %v1379_v33 = vld [vmem:[%s6076_s16 + $0xbe0] sm:$0xff] }
 0x512   :  { %1614 = vmatpush.msrb.mxu3 %v1107_v8  ;;  %1580 = vmatpush.msrb.mxu0 %v1016_v40  ;;  %v1199_v40 = vld [vmem:[%s6076_s16 + $0x640] sm:$0xff] }
 0x513   :  { %1599 = vmatpush.msrb.mxu2 %v1271_v44  ;;  %1639 = vmatpush.msrb.mxu1 %v1272_v46  ;;  %v1363_v41 = vld [vmem:[%s6076_s16 + $0xb60] sm:$0xff]  ;;  %v1168_v44 = vld [vmem:[%s6076_s16 + $0x548] sm:$0xff]  ;;  %v1349_v46 = vld [vmem:[%s6076_s16 + $0xaf0] sm:$0xff] }
 0x514   :  { %1615 = vmatpush.msrb.mxu3 %v1092_v13  ;;  %1581 = vmatpush.msrb.mxu0 %v1001_v39  ;;  %v1364_v39 = vld [vmem:[%s6076_s16 + $0xb68] sm:$0xff] }
 0x515   :  { %1600 = vmatpush.msrb.mxu2 %v1256_v47  ;;  %1640 = vmatpush.msrb.mxu1 %v1257_v60  ;;  %v1154_v47 = vld [vmem:[%s6076_s16 + $0x4d8] sm:$0xff] }
 0x516   :  { %1616 = vmatpush.msrb.mxu3 %v1077_v14  ;;  %v1438_v14 = vld [vmem:[%s6076_s16 + $0xdb8] sm:$0xff] }
 0x517   :  { %1601 = vmatpush.msrb.mxu2 %v1241_v63  ;;  %1641 = vmatpush.msrb.mxu1 %v1242_v50  ;;  %v1334_v60 = vld [vmem:[%s6076_s16 + $0xa78] sm:$0xff]  ;;  %v1139_v50 = vld [vmem:[%s6076_s16 + $0x460] sm:$0xff] }
 0x518   :  { %1617 = vmatpush.msrb.mxu3 %v1062_v32  ;;  %v1228_v32 = vld [vmem:[%s6076_s16 + $0x728] sm:$0xff]  ;;  %v1318_v63 = vld [vmem:[%s6076_s16 + $0x9f8] sm:$0xff] }
 0x51a   :  { %1618 = vmatpush.msrb.mxu3 %v1047_v34  ;;  %v1213_v34 = vld [vmem:[%s6076_s16 + $0x6b0] sm:$0xff] }
 0x51c   :  { %1619 = vmatpush.msrb.mxu3 %v1032_v27  ;;  %v1198_v27 = vld [vmem:[%s6076_s16 + $0x638] sm:$0xff] }
 0x51e   :  { %1620 = vmatpush.msrb.mxu3 %v1017_v35  ;;  %v1183_v35 = vld [vmem:[%s6076_s16 + $0x5c0] sm:$0xff] }
 0x520   :  { %1621 = vmatpush.msrb.mxu3 %v1002_v45  ;;  %v1348_v45 = vld [vmem:[%s6076_s16 + $0xae8] sm:$0xff] }
 0x572   :  { %v894_v57 = vpop.f32.mrf.mxu0 }
 0x573   :  { %v895_v53 = vadd.f32 1e-05, %v894_v57  ;;  %v1153_v57 = vld [vmem:[%s6076_s16 + $0x4d0] sm:$0xff] }
 0x578   :  { %v934_v42 = vpop.f32.mrf.mxu3  ;;  %v954_v59 = vpop.f32.mrf.mxu1 }
 0x579   :  { %v935_v43 = vadd.f32 1e-05, %v934_v42  ;;  %v1184_v42 = vld [vmem:[%s6076_s16 + $0x5c8] sm:$0xff] }
 0x57b   :  { %v955_v61 = vadd.f32 %v954_v59, %v935_v43  ;;  %v1169_v43 = vld [vmem:[%s6076_s16 + $0x550] sm:$0xff] }
 0x57c   :  { %v1333_v59 = vld [vmem:[%s6076_s16 + $0xa70] sm:$0xff] }
 0x57d   :  { %2702 = vrsqrt.f32 %v955_v61  ;;  %vm973_vm2 = vweird.f32 %v955_v61 }
 0x57e   :  { %v914_v11 = vpop.f32.mrf.mxu2 }
 0x57f   :  { %v915_v16 = vadd.f32 %v914_v11, %v895_v53  ;;  %v1319_v53 = vld [vmem:[%s6076_s16 + $0xa00] sm:$0xff] }
 0x580   :  { %v1123_v11 = vld [vmem:[%s6076_s16 + $0x3e0] sm:$0xff] }
 0x581   :  { %2704 = vrsqrt.f32 %v915_v16  ;;  %vm963_vm6 = vweird.f32 %v915_v16 }
 0x583   :  { %v2703_v17 = vpop.eup %2702 }
 0x584   :  { %v968_v19 = vmul.f32 %v2703_v17, %v955_v61  ;;  %vm974_vm1 = vweird.f32 %v2703_v17  ;;  %v1138_v61 = vld [vmem:[%s6076_s16 + $0x458] sm:$0xff] }
 0x585   :  { %vm975_vm3 = vmor %vm973_vm2, %vm974_vm1 }
 0x586   :  { %v969_v20 = vmul.f32 %v2703_v17, %v968_v19  ;;  %v1304_v19 = vld [vmem:[%s6076_s16 + $0x988] sm:$0xff] }
 0x587   :  { %v2705_v21 = vpop.eup %2704 }
 0x588   :  { %v970_v22 = vmul.f32 0.5, %v969_v20  ;;  %v958_v24 = vmul.f32 %v2705_v21, %v915_v16  ;;  %vm964_vm4 = vweird.f32 %v2705_v21  ;;  %v1303_v16 = vld [vmem:[%s6076_s16 + $0x980] sm:$0xff]  ;;  %v1108_v20 = vld [vmem:[%s6076_s16 + $0x368] sm:$0xff] }
 0x589   :  { %vm965_vm7 = vmor %vm963_vm6, %vm964_vm4 }
 0x58a   :  { %v971_v25 = vsub.f32 1.5, %v970_v22  ;;  %v959_v62 = vmul.f32 %v2705_v21, %v958_v24  ;;  %v1109_v22 = vld [vmem:[%s6076_s16 + $0x370] sm:$0xff] }
 0x58b   :  { %v1289_v24 = vld [vmem:[%s6076_s16 + $0x910] sm:$0xff] }
 0x58c   :  { %v972_v26 = vmul.f32 %v2703_v17, %v971_v25  ;;  %v960_v51 = vmul.f32 0.5, %v959_v62  ;;  %v1093_v25 = vld [vmem:[%s6076_s16 + $0x2f0] sm:$0xff] }
 0x58d   :  { %v1273_v62 = vld [vmem:[%s6076_s16 + $0x890] sm:$0xff] }
 0x58e   :  { %v976_v0 = vsel %vm975_vm3, %v2703_v17, %v972_v26  ;;  %v961_v52 = vsub.f32 1.5, %v960_v51  ;;  %v1124_v17 = vld [vmem:[%s6076_s16 + $0x3e8] sm:$0xff]  ;;  %v1094_v26 = vld [vmem:[%s6076_s16 + $0x2f8] sm:$0xff] }
 0x58f   :  { %v978_v55 = vperm.slane %v976_v0, 0  ;;  %v1078_v51 = vld [vmem:[%s6076_s16 + $0x278] sm:$0xff] }
 0x590   :  { %v962_v1 = vmul.f32 %v2705_v21, %v961_v52  ;;  %v1258_v0 = vld [vmem:[%s6076_s16 + $0x818] sm:$0xff]  ;;  %v1259_v52 = vld [vmem:[%s6076_s16 + $0x820] sm:$0xff] }
 0x591   :  { %v980_v2 = vmul.f32 %v978_v55, %v4013_v4  ;;  %v1439_v4 = vld [vmem:[%s6076_s16 + $0xdc0] sm:$0xff] }
 0x592   :  { %v966_v7 = vsel %vm965_vm7, %v2705_v21, %v962_v1  ;;  %v1288_v21 = vld [vmem:[%s6076_s16 + $0x908] sm:$0xff]  ;;  %v1063_v55 = vld [vmem:[%s6076_s16 + $0x200] sm:$0xff] }
 0x593   :  { %v988_v8 = vmul.f32 %v984_v56, %v980_v2  ;;  %v977_v9 = vperm.slane %v966_v7, 0  ;;  %v1243_v56 = vld [vmem:[%s6076_s16 + $0x7a0] sm:$0xff]  ;;  %v1064_v1 = vld [vmem:[%s6076_s16 + $0x208] sm:$0xff] }
 0x594   :  { %v1244_v2 = vld [vmem:[%s6076_s16 + $0x7a8] sm:$0xff]  ;;  %v1231_v7 = vld [vmem:[%s6076_s16 + $0x740] sm:$0xff] }
 0x595   :  { %v996_v12 = vadd.f32 %v992_v5, %v988_v8  ;;  %v979_v13 = vmul.f32 %v977_v9, %v3971_v58  ;;  %v1423_v58 = vld [vmem:[%s6076_s16 + $0xd40] sm:$0xff]  ;;  %v1230_v5 = vld [vmem:[%s6076_s16 + $0x738] sm:$0xff]  ;;  %v1048_v8 = vld [vmem:[%s6076_s16 + $0x188] sm:$0xff] }
 0x596   :  { %v1049_v9 = vld [vmem:[%s6076_s16 + $0x190] sm:$0xff] }
 0x597   :  { %v4303_v29 = vmax.f32 %v996_v12, 0.0  ;;  %v987_v30 = vmul.f32 %v983_v10, %v979_v13  ;;  %v1215_v10 = vld [vmem:[%s6076_s16 + $0x6c0] sm:$0xff]  ;;  %v1216_v12 = vld [vmem:[%s6076_s16 + $0x6c8] sm:$0xff]  ;;  %v1033_v13 = vld [vmem:[%s6076_s16 + $0x110] sm:$0xff] }
 0x599   :  { %v995_v31 = vadd.f32 %v991_v28, %v987_v30  ;;  %2671 = vmatmul.msk.f32.vlgmr.msra.gmra.mxu0 %vm242_vm5, %v4303_v29  ;;  %2672 = vmatmul.msk.f32.vlgmr.msra.gmra.mxu3 %vm242_vm5, %v4303_v29  ;;  %v1034_v28 = vld [vmem:[%s6076_s16 + $0x118] sm:$0xff]  ;;  %v1200_v30 = vld [vmem:[%s6076_s16 + $0x648] sm:$0xff] }
 0x59a   :  { %1668 = vmatpush.msra.mxu0 %v1438_v14  ;;  %1708 = vmatpush.msra.mxu3 %v1439_v4  ;;  %v1201_v14 = vld [vmem:[%s6076_s16 + $0x650] sm:$0xff]  ;;  %v1018_v4 = vld [vmem:[%s6076_s16 + $0x98] sm:$0xff] }
 0x59b   :  { %v4321_v15 = vmax.f32 %v995_v31, 0.0  ;;  %v1019_v31 = vld [vmem:[%s6076_s16 + $0xa0] sm:$0xff] }
 0x59c   :  { %1669 = vmatpush.msra.mxu0 %v1423_v58  ;;  %1709 = vmatpush.msra.mxu3 %v1424_v54  ;;  %v1185_v58 = vld [vmem:[%s6076_s16 + $0x5d0] sm:$0xff]  ;;  %v1186_v54 = vld [vmem:[%s6076_s16 + $0x5d8] sm:$0xff] }
 0x59d   :  { %1502 = vmatmul.f32.vlgmr.msra.gmra.mxu2 %v4321_v15  ;;  %1542 = vmatmul.f32.vlgmr.msra.gmra.mxu1 %v4321_v15 }
 0x59e   :  { %1646 = vmatpush.msra.mxu2 %v1228_v32  ;;  %1670 = vmatpush.msra.mxu0 %v1408_v18  ;;  %v1003_v32 = vld [vmem:[%s6076_s16 + $0x20] sm:$0xff]  ;;  %v1004_v18 = vld [vmem:[%s6076_s16 + $0x28] sm:$0xff] }
 0x59f   :  { %1686 = vmatpush.msra.mxu1 %v1229_v6  ;;  %1710 = vmatpush.msra.mxu3 %v1409_v49  ;;  %v1170_v6 = vld [vmem:[%s6076_s16 + $0x558] sm:$0xff]  ;;  %v1440_v49 = vld [vmem:[%s6076_s16 + $0xdc8] sm:$0xff] }
 0x5a0   :  { %1647 = vmatpush.msra.mxu2 %v1213_v34  ;;  %1671 = vmatpush.msra.mxu0 %v1393_v36  ;;  %v1171_v34 = vld [vmem:[%s6076_s16 + $0x560] sm:$0xff]  ;;  %v1441_v36 = vld [vmem:[%s6076_s16 + $0xdd0] sm:$0xff] }
 0x5a1   :  { %1687 = vmatpush.msra.mxu1 %v1214_v23  ;;  %1711 = vmatpush.msra.mxu3 %v1394_v37  ;;  %v1155_v23 = vld [vmem:[%s6076_s16 + $0x4e0] sm:$0xff]  ;;  %v1425_v37 = vld [vmem:[%s6076_s16 + $0xd50] sm:$0xff] }
 0x5a2   :  { %1582 = vmatmul.f32.vlgmr.msrb.gmra.mxu0 %v4321_v15  ;;  %1622 = vmatmul.f32.vlgmr.msrb.gmra.mxu3 %v4321_v15 }
 0x5a3   :  { %1648 = vmatpush.msra.mxu2 %v1198_v27  ;;  %1672 = vmatpush.msra.mxu0 %v1378_v38  ;;  %v1156_v27 = vld [vmem:[%s6076_s16 + $0x4e8] sm:$0xff]  ;;  %v1426_v38 = vld [vmem:[%s6076_s16 + $0xd58] sm:$0xff] }
 0x5a4   :  { %1688 = vmatpush.msra.mxu1 %v1199_v40  ;;  %1712 = vmatpush.msra.mxu3 %v1379_v33  ;;  %v1140_v40 = vld [vmem:[%s6076_s16 + $0x468] sm:$0xff]  ;;  %v1410_v33 = vld [vmem:[%s6076_s16 + $0xcd8] sm:$0xff] }
 0x5a5   :  { %1649 = vmatpush.msra.mxu2 %v1183_v35  ;;  %1673 = vmatpush.msra.mxu0 %v1363_v41  ;;  %v1141_v35 = vld [vmem:[%s6076_s16 + $0x470] sm:$0xff]  ;;  %v1411_v41 = vld [vmem:[%s6076_s16 + $0xce0] sm:$0xff] }
 0x5a6   :  { %1689 = vmatpush.msra.mxu1 %v1184_v42  ;;  %1713 = vmatpush.msra.mxu3 %v1364_v39  ;;  %v1125_v42 = vld [vmem:[%s6076_s16 + $0x3f0] sm:$0xff]  ;;  %v1395_v39 = vld [vmem:[%s6076_s16 + $0xc60] sm:$0xff] }
 0x5a7   :  { %2673 = vmatmul.msk.f32.vlgmr.msrb.gmra.mxu2 %vm242_vm5, %v4303_v29  ;;  %2674 = vmatmul.msk.f32.vlgmr.msrb.gmra.mxu1 %vm242_vm5, %v4303_v29 }
 0x5a8   :  { %1650 = vmatpush.msra.mxu2 %v1168_v44  ;;  %1674 = vmatpush.msra.mxu0 %v1348_v45  ;;  %v1126_v44 = vld [vmem:[%s6076_s16 + $0x3f8] sm:$0xff]  ;;  %v1396_v45 = vld [vmem:[%s6076_s16 + $0xc68] sm:$0xff] }
 0x5a9   :  { %1690 = vmatpush.msra.mxu1 %v1169_v43  ;;  %1714 = vmatpush.msra.mxu3 %v1349_v46  ;;  %v1110_v43 = vld [vmem:[%s6076_s16 + $0x378] sm:$0xff]  ;;  %v1380_v46 = vld [vmem:[%s6076_s16 + $0xbe8] sm:$0xff] }
 0x5aa   :  { %1651 = vmatpush.msra.mxu2 %v1153_v57  ;;  %1675 = vmatpush.msra.mxu0 %v1333_v59  ;;  %v1111_v57 = vld [vmem:[%s6076_s16 + $0x380] sm:$0xff]  ;;  %v1381_v59 = vld [vmem:[%s6076_s16 + $0xbf0] sm:$0xff] }
 0x5ab   :  { %1691 = vmatpush.msra.mxu1 %v1154_v47  ;;  %1715 = vmatpush.msra.mxu3 %v1334_v60  ;;  %v1095_v47 = vld [vmem:[%s6076_s16 + $0x300] sm:$0xff]  ;;  %v1365_v60 = vld [vmem:[%s6076_s16 + $0xb70] sm:$0xff] }
 0x5ac   :  { %1652 = vmatpush.msra.mxu2 %v1138_v61  ;;  %1676 = vmatpush.msra.mxu0 %v1318_v63  ;;  %v1096_v61 = vld [vmem:[%s6076_s16 + $0x308] sm:$0xff]  ;;  %v1366_v63 = vld [vmem:[%s6076_s16 + $0xb78] sm:$0xff] }
 0x5ad   :  { %1692 = vmatpush.msra.mxu1 %v1139_v50  ;;  %1716 = vmatpush.msra.mxu3 %v1319_v53  ;;  %v1080_v50 = vld [vmem:[%s6076_s16 + $0x288] sm:$0xff]  ;;  %v1350_v53 = vld [vmem:[%s6076_s16 + $0xaf8] sm:$0xff] }
 0x5ae   :  { %1653 = vmatpush.msra.mxu2 %v1123_v11  ;;  %1677 = vmatpush.msra.mxu0 %v1303_v16  ;;  %v1081_v11 = vld [vmem:[%s6076_s16 + $0x290] sm:$0xff]  ;;  %v1351_v16 = vld [vmem:[%s6076_s16 + $0xb00] sm:$0xff] }
 0x5af   :  { %1693 = vmatpush.msra.mxu1 %v1124_v17  ;;  %1717 = vmatpush.msra.mxu3 %v1304_v19  ;;  %v1065_v17 = vld [vmem:[%s6076_s16 + $0x210] sm:$0xff]  ;;  %v1335_v19 = vld [vmem:[%s6076_s16 + $0xa80] sm:$0xff] }
 0x5b0   :  { %1654 = vmatpush.msra.mxu2 %v1108_v20  ;;  %1678 = vmatpush.msra.mxu0 %v1288_v21  ;;  %v1066_v20 = vld [vmem:[%s6076_s16 + $0x218] sm:$0xff]  ;;  %v1336_v21 = vld [vmem:[%s6076_s16 + $0xa88] sm:$0xff] }
 0x5b1   :  { %1694 = vmatpush.msra.mxu1 %v1109_v22  ;;  %1718 = vmatpush.msra.mxu3 %v1289_v24  ;;  %v1050_v22 = vld [vmem:[%s6076_s16 + $0x198] sm:$0xff]  ;;  %v1320_v24 = vld [vmem:[%s6076_s16 + $0xa08] sm:$0xff] }
 0x5b2   :  { %1655 = vmatpush.msra.mxu2 %v1093_v25  ;;  %1679 = vmatpush.msra.mxu0 %v1273_v62  ;;  %v1051_v25 = vld [vmem:[%s6076_s16 + $0x1a0] sm:$0xff]  ;;  %v1321_v62 = vld [vmem:[%s6076_s16 + $0xa10] sm:$0xff] }
 0x5b3   :  { %1695 = vmatpush.msra.mxu1 %v1094_v26  ;;  %1719 = vmatpush.msra.mxu3 %v1274_v3  ;;  %v1035_v26 = vld [vmem:[%s6076_s16 + $0x120] sm:$0xff]  ;;  %v1305_v3 = vld [vmem:[%s6076_s16 + $0x990] sm:$0xff] }
 0x5b4   :  { %1656 = vmatpush.msra.mxu2 %v1078_v51  ;;  %1680 = vmatpush.msra.mxu0 %v1258_v0  ;;  %v1036_v51 = vld [vmem:[%s6076_s16 + $0x128] sm:$0xff]  ;;  %v1306_v0 = vld [vmem:[%s6076_s16 + $0x998] sm:$0xff] }
 0x5b5   :  { %1696 = vmatpush.msra.mxu1 %v1079_v48  ;;  %1720 = vmatpush.msra.mxu3 %v1259_v52  ;;  %v1020_v48 = vld [vmem:[%s6076_s16 + $0xa8] sm:$0xff]  ;;  %v1290_v52 = vld [vmem:[%s6076_s16 + $0x918] sm:$0xff] }
 0x5b6   :  { %1657 = vmatpush.msra.mxu2 %v1063_v55  ;;  %1681 = vmatpush.msra.mxu0 %v1243_v56  ;;  %v1021_v55 = vld [vmem:[%s6076_s16 + $0xb0] sm:$0xff]  ;;  %v1291_v56 = vld [vmem:[%s6076_s16 + $0x920] sm:$0xff] }
 0x5b7   :  { %1697 = vmatpush.msra.mxu1 %v1064_v1  ;;  %1721 = vmatpush.msra.mxu3 %v1244_v2  ;;  %v1005_v1 = vld [vmem:[%s6076_s16 + $0x30] sm:$0xff]  ;;  %v1275_v2 = vld [vmem:[%s6076_s16 + $0x8a0] sm:$0xff] }
 0x5b8   :  { %2675 = vmatmul.msk.f32.vlgmr.msra.gmra.mxu0 %vm242_vm5, %v4303_v29  ;;  %2676 = vmatmul.msk.f32.vlgmr.msra.gmra.mxu3 %vm242_vm5, %v4303_v29 }
 0x5b9   :  { %1726 = vmatpush.msrb.mxu0 %v1230_v5  ;;  %1766 = vmatpush.msrb.mxu3 %v1231_v7  ;;  %v1006_v5 = vld [vmem:[%s6076_s16 + $0x38] sm:$0xff]  ;;  %v1276_v7 = vld [vmem:[%s6076_s16 + $0x8a8] sm:$0xff] }
 0x5ba   :  { %1658 = vmatpush.msra.mxu2 %v1048_v8  ;;  %1698 = vmatpush.msra.mxu1 %v1049_v9  ;;  %v1442_v8 = vld [vmem:[%s6076_s16 + $0xdd8] sm:$0xff]  ;;  %v1443_v9 = vld [vmem:[%s6076_s16 + $0xde0] sm:$0xff] }
 0x5bb   :  { %1727 = vmatpush.msrb.mxu0 %v1215_v10  ;;  %1767 = vmatpush.msrb.mxu3 %v1216_v12  ;;  %v1260_v10 = vld [vmem:[%s6076_s16 + $0x828] sm:$0xff]  ;;  %v1261_v12 = vld [vmem:[%s6076_s16 + $0x830] sm:$0xff] }
 0x5bc   :  { %1659 = vmatpush.msra.mxu2 %v1033_v13  ;;  %1699 = vmatpush.msra.mxu1 %v1034_v28  ;;  %v1427_v13 = vld [vmem:[%s6076_s16 + $0xd60] sm:$0xff]  ;;  %v1428_v28 = vld [vmem:[%s6076_s16 + $0xd68] sm:$0xff] }
 0x5bd   :  { %1728 = vmatpush.msrb.mxu0 %v1200_v30  ;;  %1768 = vmatpush.msrb.mxu3 %v1201_v14  ;;  %v1245_v30 = vld [vmem:[%s6076_s16 + $0x7b0] sm:$0xff]  ;;  %v1246_v14 = vld [vmem:[%s6076_s16 + $0x7b8] sm:$0xff] }
 0x5be   :  { %1660 = vmatpush.msra.mxu2 %v1018_v4  ;;  %1700 = vmatpush.msra.mxu1 %v1019_v31  ;;  %v1232_v4 = vld [vmem:[%s6076_s16 + $0x748] sm:$0xff] }
 0x5bf   :  { %1729 = vmatpush.msrb.mxu0 %v1185_v58  ;;  %1769 = vmatpush.msrb.mxu3 %v1186_v54  ;;  %v1412_v31 = vld [vmem:[%s6076_s16 + $0xce8] sm:$0xff]  ;;  %v1233_v58 = vld [vmem:[%s6076_s16 + $0x750] sm:$0xff] }
 0x5c0   :  { %1661 = vmatpush.msra.mxu2 %v1003_v32  ;;  %1701 = vmatpush.msra.mxu1 %v1004_v18  ;;  %v1413_v54 = vld [vmem:[%s6076_s16 + $0xcf0] sm:$0xff] }
 0x5c1   :  { %1662 = vmatmul.f32.vlgmr.msra.gmra.mxu2 %v4321_v15  ;;  %1702 = vmatmul.f32.vlgmr.msra.gmra.mxu1 %v4321_v15  ;;  %v1217_v32 = vld [vmem:[%s6076_s16 + $0x6d0] sm:$0xff] }
 0x5c2   :  { %1730 = vmatpush.msrb.mxu0 %v1170_v6  ;;  %1748 = vmatpush.msrb.mxu2 %v1440_v49  ;;  %v1397_v18 = vld [vmem:[%s6076_s16 + $0xc70] sm:$0xff]  ;;  %v1218_v6 = vld [vmem:[%s6076_s16 + $0x6d8] sm:$0xff] }
 0x5c3   :  { %1770 = vmatpush.msrb.mxu3 %v1171_v34  ;;  %1788 = vmatpush.msrb.mxu1 %v1441_v36  ;;  %v1398_v49 = vld [vmem:[%s6076_s16 + $0xc78] sm:$0xff] }
 0x5c4   :  { %1731 = vmatpush.msrb.mxu0 %v1155_v23  ;;  %1749 = vmatpush.msrb.mxu2 %v1425_v37  ;;  %v1202_v34 = vld [vmem:[%s6076_s16 + $0x658] sm:$0xff]  ;;  %v1203_v23 = vld [vmem:[%s6076_s16 + $0x660] sm:$0xff] }
 0x5c5   :  { %1771 = vmatpush.msrb.mxu3 %v1156_v27  ;;  %1789 = vmatpush.msrb.mxu1 %v1426_v38  ;;  %v1382_v36 = vld [vmem:[%s6076_s16 + $0xbf8] sm:$0xff]  ;;  %v1383_v37 = vld [vmem:[%s6076_s16 + $0xc00] sm:$0xff] }
 0x5c6   :  { %1732 = vmatpush.msrb.mxu0 %v1140_v40  ;;  %1750 = vmatpush.msrb.mxu2 %v1410_v33  ;;  %v1187_v27 = vld [vmem:[%s6076_s16 + $0x5e0] sm:$0xff]  ;;  %v1188_v40 = vld [vmem:[%s6076_s16 + $0x5e8] sm:$0xff] }
 0x5c7   :  { %1772 = vmatpush.msrb.mxu3 %v1141_v35  ;;  %1790 = vmatpush.msrb.mxu1 %v1411_v41  ;;  %v1367_v38 = vld [vmem:[%s6076_s16 + $0xb80] sm:$0xff]  ;;  %v1368_v33 = vld [vmem:[%s6076_s16 + $0xb88] sm:$0xff] }
 0x5c8   :  { %1733 = vmatpush.msrb.mxu0 %v1125_v42  ;;  %1751 = vmatpush.msrb.mxu2 %v1395_v39  ;;  %v1172_v35 = vld [vmem:[%s6076_s16 + $0x568] sm:$0xff]  ;;  %v1173_v42 = vld [vmem:[%s6076_s16 + $0x570] sm:$0xff] }
 0x5c9   :  { %1773 = vmatpush.msrb.mxu3 %v1126_v44  ;;  %1791 = vmatpush.msrb.mxu1 %v1396_v45  ;;  %v1352_v41 = vld [vmem:[%s6076_s16 + $0xb08] sm:$0xff]  ;;  %v1353_v39 = vld [vmem:[%s6076_s16 + $0xb10] sm:$0xff] }
 0x5ca   :  { %1734 = vmatpush.msrb.mxu0 %v1110_v43  ;;  %1752 = vmatpush.msrb.mxu2 %v1380_v46  ;;  %v1157_v44 = vld [vmem:[%s6076_s16 + $0x4f0] sm:$0xff]  ;;  %v1158_v43 = vld [vmem:[%s6076_s16 + $0x4f8] sm:$0xff] }
 0x5cb   :  { %1774 = vmatpush.msrb.mxu3 %v1111_v57  ;;  %1792 = vmatpush.msrb.mxu1 %v1381_v59  ;;  %v1337_v45 = vld [vmem:[%s6076_s16 + $0xa90] sm:$0xff]  ;;  %v1338_v46 = vld [vmem:[%s6076_s16 + $0xa98] sm:$0xff] }
 0x5cc   :  { %1735 = vmatpush.msrb.mxu0 %v1095_v47  ;;  %1753 = vmatpush.msrb.mxu2 %v1365_v60  ;;  %v1142_v57 = vld [vmem:[%s6076_s16 + $0x478] sm:$0xff]  ;;  %v1143_v47 = vld [vmem:[%s6076_s16 + $0x480] sm:$0xff] }
 0x5cd   :  { %1775 = vmatpush.msrb.mxu3 %v1096_v61  ;;  %1793 = vmatpush.msrb.mxu1 %v1366_v63  ;;  %v1322_v59 = vld [vmem:[%s6076_s16 + $0xa18] sm:$0xff]  ;;  %v1323_v60 = vld [vmem:[%s6076_s16 + $0xa20] sm:$0xff] }
 0x5ce   :  { %1736 = vmatpush.msrb.mxu0 %v1080_v50  ;;  %1754 = vmatpush.msrb.mxu2 %v1350_v53  ;;  %v1127_v61 = vld [vmem:[%s6076_s16 + $0x400] sm:$0xff]  ;;  %v1128_v50 = vld [vmem:[%s6076_s16 + $0x408] sm:$0xff] }
 0x5cf   :  { %1776 = vmatpush.msrb.mxu3 %v1081_v11  ;;  %1794 = vmatpush.msrb.mxu1 %v1351_v16  ;;  %v1307_v63 = vld [vmem:[%s6076_s16 + $0x9a0] sm:$0xff]  ;;  %v1308_v53 = vld [vmem:[%s6076_s16 + $0x9a8] sm:$0xff] }
 0x5d0   :  { %1737 = vmatpush.msrb.mxu0 %v1065_v17  ;;  %1755 = vmatpush.msrb.mxu2 %v1335_v19  ;;  %v1112_v11 = vld [vmem:[%s6076_s16 + $0x388] sm:$0xff]  ;;  %v1113_v17 = vld [vmem:[%s6076_s16 + $0x390] sm:$0xff] }
 0x5d1   :  { %1777 = vmatpush.msrb.mxu3 %v1066_v20  ;;  %1795 = vmatpush.msrb.mxu1 %v1336_v21  ;;  %v1292_v16 = vld [vmem:[%s6076_s16 + $0x928] sm:$0xff]  ;;  %v1293_v19 = vld [vmem:[%s6076_s16 + $0x930] sm:$0xff] }
 0x5d2   :  { %1738 = vmatpush.msrb.mxu0 %v1050_v22  ;;  %1756 = vmatpush.msrb.mxu2 %v1320_v24  ;;  %v1097_v20 = vld [vmem:[%s6076_s16 + $0x310] sm:$0xff]  ;;  %v1098_v22 = vld [vmem:[%s6076_s16 + $0x318] sm:$0xff] }
 0x5d3   :  { %1778 = vmatpush.msrb.mxu3 %v1051_v25  ;;  %1796 = vmatpush.msrb.mxu1 %v1321_v62  ;;  %v1277_v21 = vld [vmem:[%s6076_s16 + $0x8b0] sm:$0xff]  ;;  %v1278_v24 = vld [vmem:[%s6076_s16 + $0x8b8] sm:$0xff] }
 0x5d4   :  { %1739 = vmatpush.msrb.mxu0 %v1035_v26  ;;  %1757 = vmatpush.msrb.mxu2 %v1305_v3  ;;  %v1082_v25 = vld [vmem:[%s6076_s16 + $0x298] sm:$0xff]  ;;  %v1083_v26 = vld [vmem:[%s6076_s16 + $0x2a0] sm:$0xff] }
 0x5d5   :  { %1779 = vmatpush.msrb.mxu3 %v1036_v51  ;;  %1797 = vmatpush.msrb.mxu1 %v1306_v0  ;;  %v1262_v62 = vld [vmem:[%s6076_s16 + $0x838] sm:$0xff]  ;;  %v1263_v3 = vld [vmem:[%s6076_s16 + $0x840] sm:$0xff] }
 0x5d6   :  { %1740 = vmatpush.msrb.mxu0 %v1020_v48  ;;  %1758 = vmatpush.msrb.mxu2 %v1290_v52  ;;  %v1067_v51 = vld [vmem:[%s6076_s16 + $0x220] sm:$0xff]  ;;  %v1068_v48 = vld [vmem:[%s6076_s16 + $0x228] sm:$0xff] }
 0x5d7   :  { %1780 = vmatpush.msrb.mxu3 %v1021_v55  ;;  %1798 = vmatpush.msrb.mxu1 %v1291_v56  ;;  %v1247_v0 = vld [vmem:[%s6076_s16 + $0x7c0] sm:$0xff]  ;;  %v1248_v52 = vld [vmem:[%s6076_s16 + $0x7c8] sm:$0xff]  ;;  %v1234_v55 = vld [vmem:[%s6076_s16 + $0x758] sm:$0xff] }
 0x5d8   :  { %1741 = vmatpush.msrb.mxu0 %v1005_v1  ;;  %1759 = vmatpush.msrb.mxu2 %v1275_v2  ;;  %v1235_v56 = vld [vmem:[%s6076_s16 + $0x760] sm:$0xff]  ;;  %v1052_v1 = vld [vmem:[%s6076_s16 + $0x1a8] sm:$0xff]  ;;  %v1053_v2 = vld [vmem:[%s6076_s16 + $0x1b0] sm:$0xff] }
 0x5d9   :  { %1781 = vmatpush.msrb.mxu3 %v1006_v5  ;;  %1799 = vmatpush.msrb.mxu1 %v1276_v7  ;;  %v1219_v5 = vld [vmem:[%s6076_s16 + $0x6e0] sm:$0xff]  ;;  %v1220_v7 = vld [vmem:[%s6076_s16 + $0x6e8] sm:$0xff] }
 0x5da   :  { %1742 = vmatmul.f32.vlgmr.msrb.gmra.mxu0 %v4321_v15  ;;  %1782 = vmatmul.f32.vlgmr.msrb.gmra.mxu3 %v4321_v15 }
 0x5db   :  { %1828 = vmatpush.msra.mxu0 %v1442_v8  ;;  %1868 = vmatpush.msra.mxu3 %v1443_v9  ;;  %v1037_v8 = vld [vmem:[%s6076_s16 + $0x130] sm:$0xff]  ;;  %v1038_v9 = vld [vmem:[%s6076_s16 + $0x138] sm:$0xff] }
 0x5dc   :  { %1760 = vmatpush.msrb.mxu2 %v1260_v10  ;;  %1800 = vmatpush.msrb.mxu1 %v1261_v12  ;;  %v1204_v10 = vld [vmem:[%s6076_s16 + $0x668] sm:$0xff]  ;;  %v1205_v12 = vld [vmem:[%s6076_s16 + $0x670] sm:$0xff] }
 0x5dd   :  { %1829 = vmatpush.msra.mxu0 %v1427_v13  ;;  %1869 = vmatpush.msra.mxu3 %v1428_v28  ;;  %v1022_v13 = vld [vmem:[%s6076_s16 + $0xb8] sm:$0xff]  ;;  %v1023_v28 = vld [vmem:[%s6076_s16 + $0xc0] sm:$0xff] }
 0x5de   :  { %1761 = vmatpush.msrb.mxu2 %v1245_v30  ;;  %1801 = vmatpush.msrb.mxu1 %v1246_v14  ;;  %v1189_v30 = vld [vmem:[%s6076_s16 + $0x5f0] sm:$0xff]  ;;  %v1190_v14 = vld [vmem:[%s6076_s16 + $0x5f8] sm:$0xff] }
 0x5df   :  { %2677 = vmatmul.msk.f32.vlgmr.msrb.gmra.mxu2 %vm242_vm5, %v4303_v29  ;;  %2678 = vmatmul.msk.f32.vlgmr.msrb.gmra.mxu1 %vm242_vm5, %v4303_v29 }
 0x5e0   :  { %1806 = vmatpush.msra.mxu2 %v1232_v4  ;;  %1830 = vmatpush.msra.mxu0 %v1412_v31  ;;  %v1007_v4 = vld [vmem:[%s6076_s16 + $0x40] sm:$0xff]  ;;  %v1008_v31 = vld [vmem:[%s6076_s16 + $0x48] sm:$0xff] }
 0x5e1   :  { %1846 = vmatpush.msra.mxu1 %v1233_v58  ;;  %1870 = vmatpush.msra.mxu3 %v1413_v54  ;;  %v1174_v58 = vld [vmem:[%s6076_s16 + $0x578] sm:$0xff]  ;;  %v1444_v54 = vld [vmem:[%s6076_s16 + $0xde8] sm:$0xff] }
 0x5e2   :  { %1807 = vmatpush.msra.mxu2 %v1217_v32  ;;  %1831 = vmatpush.msra.mxu0 %v1397_v18  ;;  %v1175_v32 = vld [vmem:[%s6076_s16 + $0x580] sm:$0xff]  ;;  %v1445_v18 = vld [vmem:[%s6076_s16 + $0xdf0] sm:$0xff] }
 0x5e3   :  { %1847 = vmatpush.msra.mxu1 %v1218_v6  ;;  %1871 = vmatpush.msra.mxu3 %v1398_v49  ;;  %v1159_v6 = vld [vmem:[%s6076_s16 + $0x500] sm:$0xff]  ;;  %v1429_v49 = vld [vmem:[%s6076_s16 + $0xd70] sm:$0xff] }
 0x5e4   :  { %1808 = vmatpush.msra.mxu2 %v1202_v34  ;;  %1832 = vmatpush.msra.mxu0 %v1382_v36  ;;  %v1160_v34 = vld [vmem:[%s6076_s16 + $0x508] sm:$0xff]  ;;  %v1430_v36 = vld [vmem:[%s6076_s16 + $0xd78] sm:$0xff] }
 0x5e5   :  { %1848 = vmatpush.msra.mxu1 %v1203_v23  ;;  %1872 = vmatpush.msra.mxu3 %v1383_v37  ;;  %v1144_v23 = vld [vmem:[%s6076_s16 + $0x488] sm:$0xff]  ;;  %v1414_v37 = vld [vmem:[%s6076_s16 + $0xcf8] sm:$0xff] }
 0x5e6   :  { %1809 = vmatpush.msra.mxu2 %v1187_v27  ;;  %1833 = vmatpush.msra.mxu0 %v1367_v38  ;;  %v1145_v27 = vld [vmem:[%s6076_s16 + $0x490] sm:$0xff]  ;;  %v1415_v38 = vld [vmem:[%s6076_s16 + $0xd00] sm:$0xff] }
 0x5e7   :  { %1849 = vmatpush.msra.mxu1 %v1188_v40  ;;  %1873 = vmatpush.msra.mxu3 %v1368_v33  ;;  %v1129_v40 = vld [vmem:[%s6076_s16 + $0x410] sm:$0xff]  ;;  %v1399_v33 = vld [vmem:[%s6076_s16 + $0xc80] sm:$0xff] }
 0x5e8   :  { %1810 = vmatpush.msra.mxu2 %v1172_v35  ;;  %1834 = vmatpush.msra.mxu0 %v1352_v41  ;;  %v1130_v35 = vld [vmem:[%s6076_s16 + $0x418] sm:$0xff]  ;;  %v1400_v41 = vld [vmem:[%s6076_s16 + $0xc88] sm:$0xff] }
 0x5e9   :  { %1850 = vmatpush.msra.mxu1 %v1173_v42  ;;  %1874 = vmatpush.msra.mxu3 %v1353_v39  ;;  %v1114_v42 = vld [vmem:[%s6076_s16 + $0x398] sm:$0xff]  ;;  %v1384_v39 = vld [vmem:[%s6076_s16 + $0xc08] sm:$0xff] }
 0x5ea   :  { %1811 = vmatpush.msra.mxu2 %v1157_v44  ;;  %1835 = vmatpush.msra.mxu0 %v1337_v45  ;;  %v1115_v44 = vld [vmem:[%s6076_s16 + $0x3a0] sm:$0xff]  ;;  %v1385_v45 = vld [vmem:[%s6076_s16 + $0xc10] sm:$0xff] }
 0x5eb   :  { %1851 = vmatpush.msra.mxu1 %v1158_v43  ;;  %1875 = vmatpush.msra.mxu3 %v1338_v46  ;;  %v1099_v43 = vld [vmem:[%s6076_s16 + $0x320] sm:$0xff]  ;;  %v1369_v46 = vld [vmem:[%s6076_s16 + $0xb90] sm:$0xff] }
 0x5ec   :  { %1812 = vmatpush.msra.mxu2 %v1142_v57  ;;  %1836 = vmatpush.msra.mxu0 %v1322_v59  ;;  %v1100_v57 = vld [vmem:[%s6076_s16 + $0x328] sm:$0xff]  ;;  %v1370_v59 = vld [vmem:[%s6076_s16 + $0xb98] sm:$0xff] }
 0x5ed   :  { %1852 = vmatpush.msra.mxu1 %v1143_v47  ;;  %1876 = vmatpush.msra.mxu3 %v1323_v60  ;;  %v1084_v47 = vld [vmem:[%s6076_s16 + $0x2a8] sm:$0xff]  ;;  %v1354_v60 = vld [vmem:[%s6076_s16 + $0xb18] sm:$0xff] }
 0x5ee   :  { %1813 = vmatpush.msra.mxu2 %v1127_v61  ;;  %1837 = vmatpush.msra.mxu0 %v1307_v63  ;;  %v1085_v61 = vld [vmem:[%s6076_s16 + $0x2b0] sm:$0xff]  ;;  %v1355_v63 = vld [vmem:[%s6076_s16 + $0xb20] sm:$0xff] }
 0x5ef   :  { %1853 = vmatpush.msra.mxu1 %v1128_v50  ;;  %1877 = vmatpush.msra.mxu3 %v1308_v53  ;;  %v1069_v50 = vld [vmem:[%s6076_s16 + $0x230] sm:$0xff]  ;;  %v1339_v53 = vld [vmem:[%s6076_s16 + $0xaa0] sm:$0xff] }
 0x5f0   :  { %1814 = vmatpush.msra.mxu2 %v1112_v11  ;;  %1838 = vmatpush.msra.mxu0 %v1292_v16  ;;  %v1070_v11 = vld [vmem:[%s6076_s16 + $0x238] sm:$0xff]  ;;  %v1340_v16 = vld [vmem:[%s6076_s16 + $0xaa8] sm:$0xff] }
 0x5f1   :  { %1854 = vmatpush.msra.mxu1 %v1113_v17  ;;  %1878 = vmatpush.msra.mxu3 %v1293_v19  ;;  %v1054_v17 = vld [vmem:[%s6076_s16 + $0x1b8] sm:$0xff]  ;;  %v1324_v19 = vld [vmem:[%s6076_s16 + $0xa28] sm:$0xff] }
 0x5f2   :  { %1815 = vmatpush.msra.mxu2 %v1097_v20  ;;  %1839 = vmatpush.msra.mxu0 %v1277_v21  ;;  %v1055_v20 = vld [vmem:[%s6076_s16 + $0x1c0] sm:$0xff]  ;;  %v1325_v21 = vld [vmem:[%s6076_s16 + $0xa30] sm:$0xff] }
 0x5f3   :  { %1855 = vmatpush.msra.mxu1 %v1098_v22  ;;  %1879 = vmatpush.msra.mxu3 %v1278_v24  ;;  %v1039_v22 = vld [vmem:[%s6076_s16 + $0x140] sm:$0xff]  ;;  %v1309_v24 = vld [vmem:[%s6076_s16 + $0x9b0] sm:$0xff] }
 0x5f4   :  { %1816 = vmatpush.msra.mxu2 %v1082_v25  ;;  %1840 = vmatpush.msra.mxu0 %v1262_v62  ;;  %v1040_v25 = vld [vmem:[%s6076_s16 + $0x148] sm:$0xff]  ;;  %v1310_v62 = vld [vmem:[%s6076_s16 + $0x9b8] sm:$0xff] }
 0x5f5   :  { %1856 = vmatpush.msra.mxu1 %v1083_v26  ;;  %1880 = vmatpush.msra.mxu3 %v1263_v3  ;;  %v1024_v26 = vld [vmem:[%s6076_s16 + $0xc8] sm:$0xff]  ;;  %v1294_v3 = vld [vmem:[%s6076_s16 + $0x938] sm:$0xff] }
 0x5f6   :  { %1817 = vmatpush.msra.mxu2 %v1067_v51  ;;  %1841 = vmatpush.msra.mxu0 %v1247_v0  ;;  %v1025_v51 = vld [vmem:[%s6076_s16 + $0xd0] sm:$0xff]  ;;  %v1295_v0 = vld [vmem:[%s6076_s16 + $0x940] sm:$0xff] }
 0x5f7   :  { %1857 = vmatpush.msra.mxu1 %v1068_v48  ;;  %1881 = vmatpush.msra.mxu3 %v1248_v52  ;;  %v1009_v48 = vld [vmem:[%s6076_s16 + $0x50] sm:$0xff]  ;;  %v1279_v52 = vld [vmem:[%s6076_s16 + $0x8c0] sm:$0xff] }
 0x5f8   :  { %2679 = vmatmul.msk.f32.vlgmr.msra.gmra.mxu0 %vm242_vm5, %v4303_v29  ;;  %2680 = vmatmul.msk.f32.vlgmr.msra.gmra.mxu3 %vm242_vm5, %v4303_v29 }
 0x5f9   :  { %1886 = vmatpush.msrb.mxu0 %v1234_v55  ;;  %1926 = vmatpush.msrb.mxu3 %v1235_v56  ;;  %v1010_v55 = vld [vmem:[%s6076_s16 + $0x58] sm:$0xff]  ;;  %v1280_v56 = vld [vmem:[%s6076_s16 + $0x8c8] sm:$0xff] }
 0x5fa   :  { %1818 = vmatpush.msra.mxu2 %v1052_v1  ;;  %1858 = vmatpush.msra.mxu1 %v1053_v2  ;;  %v1446_v1 = vld [vmem:[%s6076_s16 + $0xdf8] sm:$0xff]  ;;  %v1447_v2 = vld [vmem:[%s6076_s16 + $0xe00] sm:$0xff] }
 0x5fb   :  { %1887 = vmatpush.msrb.mxu0 %v1219_v5  ;;  %1927 = vmatpush.msrb.mxu3 %v1220_v7  ;;  %v1264_v5 = vld [vmem:[%s6076_s16 + $0x848] sm:$0xff]  ;;  %v1265_v7 = vld [vmem:[%s6076_s16 + $0x850] sm:$0xff] }
 0x5fc   :  { %1819 = vmatpush.msra.mxu2 %v1037_v8  ;;  %1859 = vmatpush.msra.mxu1 %v1038_v9  ;;  %v1431_v8 = vld [vmem:[%s6076_s16 + $0xd80] sm:$0xff]  ;;  %v1432_v9 = vld [vmem:[%s6076_s16 + $0xd88] sm:$0xff] }
 0x5fd   :  { %1888 = vmatpush.msrb.mxu0 %v1204_v10  ;;  %1928 = vmatpush.msrb.mxu3 %v1205_v12  ;;  %v1249_v10 = vld [vmem:[%s6076_s16 + $0x7d0] sm:$0xff]  ;;  %v1250_v12 = vld [vmem:[%s6076_s16 + $0x7d8] sm:$0xff] }
 0x5fe   :  { %1820 = vmatpush.msra.mxu2 %v1022_v13  ;;  %1860 = vmatpush.msra.mxu1 %v1023_v28  ;;  %v1236_v13 = vld [vmem:[%s6076_s16 + $0x768] sm:$0xff] }
 0x5ff   :  { %1889 = vmatpush.msrb.mxu0 %v1189_v30  ;;  %1929 = vmatpush.msrb.mxu3 %v1190_v14  ;;  %v1416_v28 = vld [vmem:[%s6076_s16 + $0xd08] sm:$0xff]  ;;  %v1237_v30 = vld [vmem:[%s6076_s16 + $0x770] sm:$0xff] }
 0x600   :  { %1821 = vmatpush.msra.mxu2 %v1007_v4  ;;  %1861 = vmatpush.msra.mxu1 %v1008_v31  ;;  %v1417_v14 = vld [vmem:[%s6076_s16 + $0xd10] sm:$0xff] }
 0x601   :  { %1822 = vmatmul.f32.vlgmr.msra.gmra.mxu2 %v4321_v15  ;;  %1862 = vmatmul.f32.vlgmr.msra.gmra.mxu1 %v4321_v15  ;;  %v1221_v4 = vld [vmem:[%s6076_s16 + $0x6f0] sm:$0xff] }
 0x602   :  { %1890 = vmatpush.msrb.mxu0 %v1174_v58  ;;  %1908 = vmatpush.msrb.mxu2 %v1444_v54  ;;  %v1401_v31 = vld [vmem:[%s6076_s16 + $0xc90] sm:$0xff]  ;;  %v1222_v58 = vld [vmem:[%s6076_s16 + $0x6f8] sm:$0xff] }
 0x603   :  { %1930 = vmatpush.msrb.mxu3 %v1175_v32  ;;  %1948 = vmatpush.msrb.mxu1 %v1445_v18  ;;  %v1402_v54 = vld [vmem:[%s6076_s16 + $0xc98] sm:$0xff] }
 0x604   :  { %1891 = vmatpush.msrb.mxu0 %v1159_v6  ;;  %1909 = vmatpush.msrb.mxu2 %v1429_v49  ;;  %v1206_v32 = vld [vmem:[%s6076_s16 + $0x678] sm:$0xff]  ;;  %v1207_v6 = vld [vmem:[%s6076_s16 + $0x680] sm:$0xff] }
 0x605   :  { %1931 = vmatpush.msrb.mxu3 %v1160_v34  ;;  %1949 = vmatpush.msrb.mxu1 %v1430_v36  ;;  %v1386_v18 = vld [vmem:[%s6076_s16 + $0xc18] sm:$0xff]  ;;  %v1387_v49 = vld [vmem:[%s6076_s16 + $0xc20] sm:$0xff] }
 0x606   :  { %1892 = vmatpush.msrb.mxu0 %v1144_v23  ;;  %1910 = vmatpush.msrb.mxu2 %v1414_v37  ;;  %v1191_v34 = vld [vmem:[%s6076_s16 + $0x600] sm:$0xff]  ;;  %v1192_v23 = vld [vmem:[%s6076_s16 + $0x608] sm:$0xff] }
 0x607   :  { %1932 = vmatpush.msrb.mxu3 %v1145_v27  ;;  %1950 = vmatpush.msrb.mxu1 %v1415_v38  ;;  %v1371_v36 = vld [vmem:[%s6076_s16 + $0xba0] sm:$0xff]  ;;  %v1372_v37 = vld [vmem:[%s6076_s16 + $0xba8] sm:$0xff] }
 0x608   :  { %1893 = vmatpush.msrb.mxu0 %v1129_v40  ;;  %1911 = vmatpush.msrb.mxu2 %v1399_v33  ;;  %v1176_v27 = vld [vmem:[%s6076_s16 + $0x588] sm:$0xff]  ;;  %v1177_v40 = vld [vmem:[%s6076_s16 + $0x590] sm:$0xff] }
 0x609   :  { %1933 = vmatpush.msrb.mxu3 %v1130_v35  ;;  %1951 = vmatpush.msrb.mxu1 %v1400_v41  ;;  %v1356_v38 = vld [vmem:[%s6076_s16 + $0xb28] sm:$0xff]  ;;  %v1357_v33 = vld [vmem:[%s6076_s16 + $0xb30] sm:$0xff] }
 0x60a   :  { %1894 = vmatpush.msrb.mxu0 %v1114_v42  ;;  %1912 = vmatpush.msrb.mxu2 %v1384_v39  ;;  %v1161_v35 = vld [vmem:[%s6076_s16 + $0x510] sm:$0xff]  ;;  %v1162_v42 = vld [vmem:[%s6076_s16 + $0x518] sm:$0xff] }
 0x60b   :  { %1934 = vmatpush.msrb.mxu3 %v1115_v44  ;;  %1952 = vmatpush.msrb.mxu1 %v1385_v45  ;;  %v1341_v41 = vld [vmem:[%s6076_s16 + $0xab0] sm:$0xff]  ;;  %v1342_v39 = vld [vmem:[%s6076_s16 + $0xab8] sm:$0xff] }
 0x60c   :  { %1895 = vmatpush.msrb.mxu0 %v1099_v43  ;;  %1913 = vmatpush.msrb.mxu2 %v1369_v46  ;;  %v1146_v44 = vld [vmem:[%s6076_s16 + $0x498] sm:$0xff]  ;;  %v1147_v43 = vld [vmem:[%s6076_s16 + $0x4a0] sm:$0xff] }
 0x60d   :  { %1935 = vmatpush.msrb.mxu3 %v1100_v57  ;;  %1953 = vmatpush.msrb.mxu1 %v1370_v59  ;;  %v1326_v45 = vld [vmem:[%s6076_s16 + $0xa38] sm:$0xff]  ;;  %v1327_v46 = vld [vmem:[%s6076_s16 + $0xa40] sm:$0xff] }
 0x60e   :  { %1896 = vmatpush.msrb.mxu0 %v1084_v47  ;;  %1914 = vmatpush.msrb.mxu2 %v1354_v60  ;;  %v1131_v57 = vld [vmem:[%s6076_s16 + $0x420] sm:$0xff]  ;;  %v1132_v47 = vld [vmem:[%s6076_s16 + $0x428] sm:$0xff] }
 0x60f   :  { %1936 = vmatpush.msrb.mxu3 %v1085_v61  ;;  %1954 = vmatpush.msrb.mxu1 %v1355_v63  ;;  %v1311_v59 = vld [vmem:[%s6076_s16 + $0x9c0] sm:$0xff]  ;;  %v1312_v60 = vld [vmem:[%s6076_s16 + $0x9c8] sm:$0xff] }
 0x610   :  { %1897 = vmatpush.msrb.mxu0 %v1069_v50  ;;  %1915 = vmatpush.msrb.mxu2 %v1339_v53  ;;  %v1116_v61 = vld [vmem:[%s6076_s16 + $0x3a8] sm:$0xff]  ;;  %v1117_v50 = vld [vmem:[%s6076_s16 + $0x3b0] sm:$0xff] }
 0x611   :  { %1937 = vmatpush.msrb.mxu3 %v1070_v11  ;;  %1955 = vmatpush.msrb.mxu1 %v1340_v16  ;;  %v1296_v63 = vld [vmem:[%s6076_s16 + $0x948] sm:$0xff]  ;;  %v1297_v53 = vld [vmem:[%s6076_s16 + $0x950] sm:$0xff] }
 0x612   :  { %1898 = vmatpush.msrb.mxu0 %v1054_v17  ;;  %1916 = vmatpush.msrb.mxu2 %v1324_v19  ;;  %v1101_v11 = vld [vmem:[%s6076_s16 + $0x330] sm:$0xff]  ;;  %v1102_v17 = vld [vmem:[%s6076_s16 + $0x338] sm:$0xff] }
 0x613   :  { %1938 = vmatpush.msrb.mxu3 %v1055_v20  ;;  %1956 = vmatpush.msrb.mxu1 %v1325_v21  ;;  %v1281_v16 = vld [vmem:[%s6076_s16 + $0x8d0] sm:$0xff]  ;;  %v1282_v19 = vld [vmem:[%s6076_s16 + $0x8d8] sm:$0xff] }
 0x614   :  { %1899 = vmatpush.msrb.mxu0 %v1039_v22  ;;  %1917 = vmatpush.msrb.mxu2 %v1309_v24  ;;  %v1086_v20 = vld [vmem:[%s6076_s16 + $0x2b8] sm:$0xff]  ;;  %v1087_v22 = vld [vmem:[%s6076_s16 + $0x2c0] sm:$0xff] }
 0x615   :  { %1939 = vmatpush.msrb.mxu3 %v1040_v25  ;;  %1957 = vmatpush.msrb.mxu1 %v1310_v62  ;;  %v1266_v21 = vld [vmem:[%s6076_s16 + $0x858] sm:$0xff]  ;;  %v1267_v24 = vld [vmem:[%s6076_s16 + $0x860] sm:$0xff] }
 0x616   :  { %1900 = vmatpush.msrb.mxu0 %v1024_v26  ;;  %1918 = vmatpush.msrb.mxu2 %v1294_v3  ;;  %v1071_v25 = vld [vmem:[%s6076_s16 + $0x240] sm:$0xff]  ;;  %v1072_v26 = vld [vmem:[%s6076_s16 + $0x248] sm:$0xff] }
 0x617   :  { %1940 = vmatpush.msrb.mxu3 %v1025_v51  ;;  %1958 = vmatpush.msrb.mxu1 %v1295_v0  ;;  %v1251_v62 = vld [vmem:[%s6076_s16 + $0x7e0] sm:$0xff]  ;;  %v1252_v3 = vld [vmem:[%s6076_s16 + $0x7e8] sm:$0xff]  ;;  %v1238_v51 = vld [vmem:[%s6076_s16 + $0x778] sm:$0xff] }
 0x618   :  { %1901 = vmatpush.msrb.mxu0 %v1009_v48  ;;  %1919 = vmatpush.msrb.mxu2 %v1279_v52  ;;  %v2101_v0 = vld [vmem:[%s6078_s18 + $0x78] sm:$0xff]  ;;  %v1056_v48 = vld [vmem:[%s6076_s16 + $0x1c8] sm:$0xff]  ;;  %v1057_v52 = vld [vmem:[%s6076_s16 + $0x1d0] sm:$0xff] }
 0x619   :  { %1941 = vmatpush.msrb.mxu3 %v1010_v55  ;;  %1959 = vmatpush.msrb.mxu1 %v1280_v56  ;;  %v1223_v55 = vld [vmem:[%s6076_s16 + $0x700] sm:$0xff]  ;;  %v2100_v56 = vld [vmem:[%s6078_s18 + $0x70] sm:$0xff] }
 0x61a   :  { %1902 = vmatmul.f32.vlgmr.msrb.gmra.mxu0 %v4321_v15  ;;  %1942 = vmatmul.f32.vlgmr.msrb.gmra.mxu3 %v4321_v15 }
 0x61b   :  { %1988 = vmatpush.msra.mxu0 %v1446_v1  ;;  %2028 = vmatpush.msra.mxu3 %v1447_v2  ;;  %v1041_v1 = vld [vmem:[%s6076_s16 + $0x150] sm:$0xff]  ;;  %v1042_v2 = vld [vmem:[%s6076_s16 + $0x158] sm:$0xff] }
 0x61c   :  { %1920 = vmatpush.msrb.mxu2 %v1264_v5  ;;  %1960 = vmatpush.msrb.mxu1 %v1265_v7  ;;  %v1208_v5 = vld [vmem:[%s6076_s16 + $0x688] sm:$0xff] }
 0x61d   :  { %1989 = vmatpush.msra.mxu0 %v1431_v8  ;;  %2029 = vmatpush.msra.mxu3 %v1432_v9  ;;  %v2099_v7 = vld [vmem:[%s6078_s18 + $0x68] sm:$0xff]  ;;  %v1026_v8 = vld [vmem:[%s6076_s16 + $0xd8] sm:$0xff]  ;;  %v1027_v9 = vld [vmem:[%s6076_s16 + $0xe0] sm:$0xff] }
 0x61e   :  { %1921 = vmatpush.msrb.mxu2 %v1249_v10  ;;  %1961 = vmatpush.msrb.mxu1 %v1250_v12  ;;  %v1193_v10 = vld [vmem:[%s6076_s16 + $0x610] sm:$0xff]  ;;  %v2098_v12 = vld [vmem:[%s6078_s18 + $0x60] sm:$0xff] }
 0x61f   :  { %2681 = vmatmul.msk.f32.vlgmr.msrb.gmra.mxu2 %vm242_vm5, %v4303_v29  ;;  %2682 = vmatmul.msk.f32.vlgmr.msrb.gmra.mxu1 %vm242_vm5, %v4303_v29 }
 0x620   :  { %1966 = vmatpush.msra.mxu2 %v1236_v13  ;;  %1990 = vmatpush.msra.mxu0 %v1416_v28  ;;  %v1011_v13 = vld [vmem:[%s6076_s16 + $0x60] sm:$0xff]  ;;  %v1012_v28 = vld [vmem:[%s6076_s16 + $0x68] sm:$0xff] }
 0x621   :  { %2006 = vmatpush.msra.mxu1 %v1237_v30  ;;  %2030 = vmatpush.msra.mxu3 %v1417_v14  ;;  %v1178_v30 = vld [vmem:[%s6076_s16 + $0x598] sm:$0xff]  ;;  %v1448_v14 = vld [vmem:[%s6076_s16 + $0xe08] sm:$0xff] }
 0x622   :  { %1967 = vmatpush.msra.mxu2 %v1221_v4  ;;  %1991 = vmatpush.msra.mxu0 %v1401_v31  ;;  %v2097_v4 = vld [vmem:[%s6078_s18 + $0x58] sm:$0xff] }
 0x623   :  { %2007 = vmatpush.msra.mxu1 %v1222_v58  ;;  %2031 = vmatpush.msra.mxu3 %v1402_v54  ;;  %v2117_v31 = vld [vmem:[%s6078_s18 + $0xf8] sm:$0xff]  ;;  %v1163_v58 = vld [vmem:[%s6076_s16 + $0x520] sm:$0xff]  ;;  %v1433_v54 = vld [vmem:[%s6076_s16 + $0xd90] sm:$0xff] }
 0x624   :  { %1968 = vmatpush.msra.mxu2 %v1206_v32  ;;  %1992 = vmatpush.msra.mxu0 %v1386_v18  ;;  %v2096_v32 = vld [vmem:[%s6078_s18 + $0x50] sm:$0xff] }
 0x625   :  { %2008 = vmatpush.msra.mxu1 %v1207_v6  ;;  %2032 = vmatpush.msra.mxu3 %v1387_v49  ;;  %v2116_v18 = vld [vmem:[%s6078_s18 + $0xf0] sm:$0xff]  ;;  %v1148_v6 = vld [vmem:[%s6076_s16 + $0x4a8] sm:$0xff]  ;;  %v1418_v49 = vld [vmem:[%s6076_s16 + $0xd18] sm:$0xff] }
 0x626   :  { %1969 = vmatpush.msra.mxu2 %v1191_v34  ;;  %1993 = vmatpush.msra.mxu0 %v1371_v36  ;;  %v2095_v34 = vld [vmem:[%s6078_s18 + $0x48] sm:$0xff] }
 0x627   :  { %2009 = vmatpush.msra.mxu1 %v1192_v23  ;;  %2033 = vmatpush.msra.mxu3 %v1372_v37  ;;  %v2115_v36 = vld [vmem:[%s6078_s18 + $0xe8] sm:$0xff]  ;;  %v1133_v23 = vld [vmem:[%s6076_s16 + $0x430] sm:$0xff]  ;;  %v1403_v37 = vld [vmem:[%s6076_s16 + $0xca0] sm:$0xff] }
 0x628   :  { %1970 = vmatpush.msra.mxu2 %v1176_v27  ;;  %1994 = vmatpush.msra.mxu0 %v1356_v38  ;;  %v2094_v27 = vld [vmem:[%s6078_s18 + $0x40] sm:$0xff] }
 0x629   :  { %2010 = vmatpush.msra.mxu1 %v1177_v40  ;;  %2034 = vmatpush.msra.mxu3 %v1357_v33  ;;  %v2114_v38 = vld [vmem:[%s6078_s18 + $0xe0] sm:$0xff]  ;;  %v1118_v40 = vld [vmem:[%s6076_s16 + $0x3b8] sm:$0xff]  ;;  %v1388_v33 = vld [vmem:[%s6076_s16 + $0xc28] sm:$0xff] }
 0x62a   :  { %1971 = vmatpush.msra.mxu2 %v1161_v35  ;;  %1995 = vmatpush.msra.mxu0 %v1341_v41  ;;  %v2093_v35 = vld [vmem:[%s6078_s18 + $0x38] sm:$0xff] }
 0x62b   :  { %2011 = vmatpush.msra.mxu1 %v1162_v42  ;;  %2035 = vmatpush.msra.mxu3 %v1342_v39  ;;  %v2113_v41 = vld [vmem:[%s6078_s18 + $0xd8] sm:$0xff]  ;;  %v1103_v42 = vld [vmem:[%s6076_s16 + $0x340] sm:$0xff]  ;;  %v1373_v39 = vld [vmem:[%s6076_s16 + $0xbb0] sm:$0xff] }
 0x62c   :  { %1972 = vmatpush.msra.mxu2 %v1146_v44  ;;  %1996 = vmatpush.msra.mxu0 %v1326_v45  ;;  %v2092_v44 = vld [vmem:[%s6078_s18 + $0x30] sm:$0xff] }
 0x62d   :  { %2012 = vmatpush.msra.mxu1 %v1147_v43  ;;  %2036 = vmatpush.msra.mxu3 %v1327_v46  ;;  %v2112_v45 = vld [vmem:[%s6078_s18 + $0xd0] sm:$0xff]  ;;  %v1088_v43 = vld [vmem:[%s6076_s16 + $0x2c8] sm:$0xff]  ;;  %v1358_v46 = vld [vmem:[%s6076_s16 + $0xb38] sm:$0xff] }
 0x62e   :  { %1973 = vmatpush.msra.mxu2 %v1131_v57  ;;  %1997 = vmatpush.msra.mxu0 %v1311_v59  ;;  %v2091_v57 = vld [vmem:[%s6078_s18 + $0x28] sm:$0xff] }
 0x62f   :  { %2013 = vmatpush.msra.mxu1 %v1132_v47  ;;  %2037 = vmatpush.msra.mxu3 %v1312_v60  ;;  %v2111_v59 = vld [vmem:[%s6078_s18 + $0xc8] sm:$0xff]  ;;  %v1073_v47 = vld [vmem:[%s6076_s16 + $0x250] sm:$0xff]  ;;  %v1343_v60 = vld [vmem:[%s6076_s16 + $0xac0] sm:$0xff] }
 0x630   :  { %1974 = vmatpush.msra.mxu2 %v1116_v61  ;;  %1998 = vmatpush.msra.mxu0 %v1296_v63  ;;  %v2090_v61 = vld [vmem:[%s6078_s18 + $0x20] sm:$0xff] }
 0x631   :  { %2014 = vmatpush.msra.mxu1 %v1117_v50  ;;  %2038 = vmatpush.msra.mxu3 %v1297_v53  ;;  %v2110_v63 = vld [vmem:[%s6078_s18 + $0xc0] sm:$0xff]  ;;  %v1058_v53 = vld [vmem:[%s6076_s16 + $0x1d8] sm:$0xff] }
 0x632   :  { %1975 = vmatpush.msra.mxu2 %v1101_v11  ;;  %1999 = vmatpush.msra.mxu0 %v1281_v16  ;;  %v5372_v50 = vld [vmem:[%s6077_s17] sm:$0xff]  ;;  %v1328_v11 = vld [vmem:[%s6076_s16 + $0xa48] sm:$0xff] }
 0x633   :  { %2015 = vmatpush.msra.mxu1 %v1102_v17  ;;  %2039 = vmatpush.msra.mxu3 %v1282_v19  ;;  %v1453_v16 = vperm.slane %v5372_v50, 0  ;;  %v2089_v17 = vld [vmem:[%s6078_s18 + $0x18] sm:$0xff] }
 0x634   :  { %1976 = vmatpush.msra.mxu2 %v1086_v20  ;;  %2000 = vmatpush.msra.mxu0 %v1266_v21  ;;  %v2109_v19 = vld [vmem:[%s6078_s18 + $0xb8] sm:$0xff]  ;;  %v1503_v20 = vpop.f32.mrf.mxu2  ;;  %v1043_v21 = vld [vmem:[%s6076_s16 + $0x160] sm:$0xff] }
 0x635   :  { %2016 = vmatpush.msra.mxu1 %v1087_v22  ;;  %2040 = vmatpush.msra.mxu3 %v1267_v24  ;;  %v1313_v22 = vld [vmem:[%s6076_s16 + $0x9d0] sm:$0xff] }
 0x636   :  { %1977 = vmatpush.msra.mxu2 %v1071_v25  ;;  %2001 = vmatpush.msra.mxu0 %v1251_v62  ;;  %v2088_v24 = vld [vmem:[%s6078_s18 + $0x10] sm:$0xff]  ;;  %v1028_v62 = vld [vmem:[%s6076_s16 + $0xe8] sm:$0xff] }
 0x637   :  { %2017 = vmatpush.msra.mxu1 %v1072_v26  ;;  %2041 = vmatpush.msra.mxu3 %v1252_v3  ;;  %v2108_v25 = vld [vmem:[%s6078_s18 + $0xb0] sm:$0xff]  ;;  %v1298_v26 = vld [vmem:[%s6076_s16 + $0x958] sm:$0xff]  ;;  %v1504_v3 = vadd.f32 %v1503_v20, %v1453_v16  ;;  %v2139_v20 = vld [vmem:[%s6078_s18 + $0x1a8] sm:$0xff] }
 0x638   :  { %2683 = vmatmul.msk.f32.vlgmr.msra.gmra.mxu0 %vm242_vm5, %v4303_v29  ;;  %2684 = vmatmul.msk.f32.vlgmr.msra.gmra.mxu3 %vm242_vm5, %v4303_v29  ;;  %v2156_v16 = vld [vmem:[%s6078_s18 + $0x230] sm:$0xff] }
 0x639   :  { %2046 = vmatpush.msrb.mxu0 %v1238_v51  ;;  %2320 = vmatpush.msrb.mxu3 %v2101_v0  ;;  %v2087_v51 = vld [vmem:[%s6078_s18 + $0x8] sm:$0xff] }
 0x63a   :  { %1978 = vmatpush.msra.mxu2 %v1056_v48  ;;  %2018 = vmatpush.msra.mxu1 %v1057_v52  ;;  %v2107_v0 = vld [vmem:[%s6078_s18 + $0xa8] sm:$0xff]  ;;  %v1013_v48 = vld [vmem:[%s6076_s16 + $0x70] sm:$0xff]  ;;  %v1283_v52 = vld [vmem:[%s6076_s16 + $0x8e0] sm:$0xff] }
 0x63b   :  { %2047 = vmatpush.msrb.mxu0 %v1223_v55  ;;  %2321 = vmatpush.msrb.mxu3 %v2100_v56  ;;  %v2086_v55 = vld [vmem:[%s6078_s18] sm:$0xff] }
 0x63c   :  { %1979 = vmatpush.msra.mxu2 %v1041_v1  ;;  %2019 = vmatpush.msra.mxu1 %v1042_v2  ;;  %v2106_v56 = vld [vmem:[%s6078_s18 + $0xa0] sm:$0xff]  ;;  %v1523_v1 = vpop.f32.mrf.mxu0 }
 0x63d   :  { %2048 = vmatpush.msrb.mxu0 %v1208_v5  ;;  %2322 = vmatpush.msrb.mxu3 %v2099_v7  ;;  %v1524_v2 = vadd.f32 %v1523_v1, %v1504_v3  ;;  %v2149_v5 = vld [vmem:[%s6078_s18 + $0x1f8] sm:$0xff] }
 0x63e   :  { %1980 = vmatpush.msra.mxu2 %v1026_v8  ;;  %2020 = vmatpush.msra.mxu1 %v1027_v9  ;;  %v2165_v7 = vld [vmem:[%s6078_s18 + $0x278] sm:$0xff]  ;;  %v1268_v8 = vld [vmem:[%s6076_s16 + $0x868] sm:$0xff] }
 0x63f   :  { %2049 = vmatpush.msrb.mxu0 %v1193_v10  ;;  %2323 = vmatpush.msrb.mxu3 %v2098_v12  ;;  %v2105_v9 = vld [vmem:[%s6078_s18 + $0x98] sm:$0xff]  ;;  %v1454_v10 = vperm.slane %v5372_v50, 1  ;;  %v2148_v12 = vld [vmem:[%s6078_s18 + $0x1f0] sm:$0xff] }
 0x640   :  { %1981 = vmatpush.msra.mxu2 %v1011_v13  ;;  %2021 = vmatpush.msra.mxu1 %v1012_v28  ;;  %v2164_v13 = vld [vmem:[%s6078_s18 + $0x270] sm:$0xff]  ;;  %v1543_v28 = vpop.f32.mrf.mxu1 }
 0x641   :  { %1982 = vmatmul.f32.vlgmr.msra.gmra.mxu2 %v4321_v15  ;;  %2022 = vmatmul.f32.vlgmr.msra.gmra.mxu1 %v4321_v15 }
 0x642   :  { %2050 = vmatpush.msrb.mxu0 %v1178_v30  ;;  %2068 = vmatpush.msrb.mxu2 %v1448_v14  ;;  %v1253_v30 = vld [vmem:[%s6076_s16 + $0x7f0] sm:$0xff]  ;;  %v2147_v14 = vld [vmem:[%s6078_s18 + $0x1e8] sm:$0xff] }
 0x643   :  { %2324 = vmatpush.msrb.mxu3 %v2097_v4  ;;  %2340 = vmatpush.msrb.mxu1 %v2117_v31  ;;  %v2133_v4 = vld [vmem:[%s6078_s18 + $0x178] sm:$0xff]  ;;  %v2163_v31 = vld [vmem:[%s6078_s18 + $0x268] sm:$0xff] }
 0x644   :  { %2051 = vmatpush.msrb.mxu0 %v1163_v58  ;;  %2069 = vmatpush.msrb.mxu2 %v1433_v54  ;;  %v1544_v58 = vadd.f32 %v1543_v28, %v1454_v10  ;;  %v2103_v54 = vld [vmem:[%s6078_s18 + $0x88] sm:$0xff]  ;;  %v1583_v3 = vpop.f32.mrf.mxu0 }
 0x645   :  { %2325 = vmatpush.msrb.mxu3 %v2096_v32  ;;  %2341 = vmatpush.msrb.mxu1 %v2116_v18  ;;  %v2146_v32 = vld [vmem:[%s6078_s18 + $0x1e0] sm:$0xff]  ;;  %v1563_v18 = vpop.f32.mrf.mxu3 }
 0x646   :  { %2052 = vmatpush.msrb.mxu0 %v1148_v6  ;;  %2070 = vmatpush.msrb.mxu2 %v1418_v49  ;;  %v2132_v6 = vld [vmem:[%s6078_s18 + $0x170] sm:$0xff]  ;;  %v2162_v49 = vld [vmem:[%s6078_s18 + $0x260] sm:$0xff] }
 0x647   :  { %2326 = vmatpush.msrb.mxu3 %v2095_v34  ;;  %2342 = vmatpush.msrb.mxu1 %v2115_v36  ;;  %v2102_v34 = vld [vmem:[%s6078_s18 + $0x80] sm:$0xff]  ;;  %v2145_v36 = vld [vmem:[%s6078_s18 + $0x1d8] sm:$0xff] }
 0x648   :  { %2053 = vmatpush.msrb.mxu0 %v1133_v23  ;;  %2071 = vmatpush.msrb.mxu2 %v1403_v37  ;;  %v1564_v23 = vadd.f32 %v1563_v18, %v1544_v58  ;;  %v2161_v37 = vld [vmem:[%s6078_s18 + $0x258] sm:$0xff]  ;;  %v1643_v10 = vpop.f32.mrf.mxu1  ;;  %v2150_v58 = vld [vmem:[%s6078_s18 + $0x200] sm:$0xff] }
 0x649   :  { %2327 = vmatpush.msrb.mxu3 %v2094_v27  ;;  %2343 = vmatpush.msrb.mxu1 %v2114_v38  ;;  %v2181_v27 = vld [vmem:[%s6078_s18 + $0x2f8] sm:$0xff]  ;;  %v2130_v38 = vld [vmem:[%s6078_s18 + $0x160] sm:$0xff] }
 0x64a   :  { %2054 = vmatpush.msrb.mxu0 %v1118_v40  ;;  %2072 = vmatpush.msrb.mxu2 %v1388_v33  ;;  %v2144_v40 = vld [vmem:[%s6078_s18 + $0x1d0] sm:$0xff] }
 0x64b   :  { %2328 = vmatpush.msrb.mxu3 %v2093_v35  ;;  %2344 = vmatpush.msrb.mxu1 %v2113_v41  ;;  %v2160_v33 = vld [vmem:[%s6078_s18 + $0x250] sm:$0xff]  ;;  %v2129_v41 = vld [vmem:[%s6078_s18 + $0x158] sm:$0xff] }
 0x64c   :  { %2055 = vmatpush.msrb.mxu0 %v1103_v42  ;;  %2073 = vmatpush.msrb.mxu2 %v1373_v39  ;;  %v2180_v35 = vld [vmem:[%s6078_s18 + $0x2f0] sm:$0xff]  ;;  %v2143_v42 = vld [vmem:[%s6078_s18 + $0x1c8] sm:$0xff]  ;;  %v1683_v18 = vpop.f32.mrf.mxu0 }
 0x64d   :  { %2329 = vmatpush.msrb.mxu3 %v2092_v44  ;;  %2345 = vmatpush.msrb.mxu1 %v2112_v45  ;;  %v2159_v39 = vld [vmem:[%s6078_s18 + $0x248] sm:$0xff]  ;;  %v2128_v45 = vld [vmem:[%s6078_s18 + $0x150] sm:$0xff]  ;;  %v1623_v1 = vpop.f32.mrf.mxu3 }
 0x64e   :  { %2056 = vmatpush.msrb.mxu0 %v1088_v43  ;;  %2074 = vmatpush.msrb.mxu2 %v1358_v46  ;;  %v2179_v44 = vld [vmem:[%s6078_s18 + $0x2e8] sm:$0xff]  ;;  %v2142_v43 = vld [vmem:[%s6078_s18 + $0x1c0] sm:$0xff] }
 0x64f   :  { %2330 = vmatpush.msrb.mxu3 %v2091_v57  ;;  %2346 = vmatpush.msrb.mxu1 %v2111_v59  ;;  %v2158_v46 = vld [vmem:[%s6078_s18 + $0x240] sm:$0xff]  ;;  %v2127_v59 = vld [vmem:[%s6078_s18 + $0x148] sm:$0xff] }
 0x650   :  { %2057 = vmatpush.msrb.mxu0 %v1073_v47  ;;  %2075 = vmatpush.msrb.mxu2 %v1343_v60  ;;  %v2178_v57 = vld [vmem:[%s6078_s18 + $0x2e0] sm:$0xff]  ;;  %v2141_v47 = vld [vmem:[%s6078_s18 + $0x1b8] sm:$0xff] }
 0x651   :  { %2331 = vmatpush.msrb.mxu3 %v2090_v61  ;;  %2347 = vmatpush.msrb.mxu1 %v2110_v63  ;;  %v2157_v60 = vld [vmem:[%s6078_s18 + $0x238] sm:$0xff]  ;;  %v5535_v63 = vpop.f32.mrf.mxu2 }
 0x652   :  { %2058 = vmatpush.msrb.mxu0 %v1058_v53  ;;  %2076 = vmatpush.msrb.mxu2 %v1328_v11  ;;  %v2177_v61 = vld [vmem:[%s6078_s18 + $0x2d8] sm:$0xff]  ;;  %v2126_v53 = vld [vmem:[%s6078_s18 + $0x140] sm:$0xff]  ;;  %v2140_v11 = vld [vmem:[%s6078_s18 + $0x1b0] sm:$0xff] }
 0x653   :  { %2332 = vmatpush.msrb.mxu3 %v2089_v17  ;;  %2348 = vmatpush.msrb.mxu1 %v2109_v19  ;;  %v2176_v17 = vld [vmem:[%s6078_s18 + $0x2d0] sm:$0xff]  ;;  %v2125_v19 = vld [vmem:[%s6078_s18 + $0x138] sm:$0xff] }
 0x654   :  { %2059 = vmatpush.msrb.mxu0 %v1043_v21  ;;  %2077 = vmatpush.msrb.mxu2 %v1313_v22  ;;  %v2155_v21 = vld [vmem:[%s6078_s18 + $0x228] sm:$0xff] }
 0x655   :  { %2333 = vmatpush.msrb.mxu3 %v2088_v24  ;;  %2349 = vmatpush.msrb.mxu1 %v2108_v25  ;;  %v2175_v22 = vld [vmem:[%s6078_s18 + $0x2c8] sm:$0xff]  ;;  %v2124_v24 = vld [vmem:[%s6078_s18 + $0x130] sm:$0xff]  ;;  %v2138_v25 = vld [vmem:[%s6078_s18 + $0x1a0] sm:$0xff] }
 0x656   :  { %2060 = vmatpush.msrb.mxu0 %v1028_v62  ;;  %2078 = vmatpush.msrb.mxu2 %v1298_v26  ;;  %v2154_v62 = vld [vmem:[%s6078_s18 + $0x220] sm:$0xff] }
 0x657   :  { %2334 = vmatpush.msrb.mxu3 %v2087_v51  ;;  %2350 = vmatpush.msrb.mxu1 %v2107_v0  ;;  %v2174_v26 = vld [vmem:[%s6078_s18 + $0x2c0] sm:$0xff]  ;;  %v2123_v51 = vld [vmem:[%s6078_s18 + $0x128] sm:$0xff]  ;;  %v2137_v0 = vld [vmem:[%s6078_s18 + $0x198] sm:$0xff] }
 0x658   :  { %2061 = vmatpush.msrb.mxu0 %v1013_v48  ;;  %2079 = vmatpush.msrb.mxu2 %v1283_v52  ;;  %v1456_v48 = vperm.slane %v5372_v50, 3  ;;  %v1457_v52 = vperm.slane %v5372_v50, 4 }
 0x659   :  { %2335 = vmatpush.msrb.mxu3 %v2086_v55  ;;  %2351 = vmatpush.msrb.mxu1 %v2106_v56  ;;  %v2153_v55 = vld [vmem:[%s6078_s18 + $0x218] sm:$0xff] }
 0x65a   :  { %2062 = vmatmul.f32.vlgmr.msrb.gmra.mxu0 %v4321_v15  ;;  %2336 = vmatmul.f32.vlgmr.msrb.gmra.mxu3 %v1524_v2  ;;  %v2104_v15 = vld [vmem:[%s6078_s18 + $0x90] sm:$0xff]  ;;  %v2173_v56 = vld [vmem:[%s6078_s18 + $0x2b8] sm:$0xff]  ;;  %v1663_v2 = vpop.f32.mrf.mxu2  ;;  %v1624_v28 = vadd.f32 %v1623_v1, %v1456_v48  ;;  %v2242_v48 = vld [vmem:[%s6078_s18 + $0x4e0] sm:$0xff] }
 0x65b   :  { %2380 = vmatpush.msra.mxu0 %v2149_v5  ;;  %2400 = vmatpush.msra.mxu3 %v2165_v7  ;;  %v2122_v5 = vld [vmem:[%s6078_s18 + $0x120] sm:$0xff]  ;;  %v2136_v7 = vld [vmem:[%s6078_s18 + $0x190] sm:$0xff]  ;;  %v2241_v1 = vld [vmem:[%s6078_s18 + $0x4d8] sm:$0xff] }
 0x65c   :  { %2080 = vmatpush.msrb.mxu2 %v1268_v8  ;;  %2352 = vmatpush.msrb.mxu1 %v2105_v9  ;;  %v2152_v8 = vld [vmem:[%s6078_s18 + $0x210] sm:$0xff] }
 0x65d   :  { %2381 = vmatpush.msra.mxu0 %v2148_v12  ;;  %2401 = vmatpush.msra.mxu3 %v2164_v13  ;;  %v2172_v9 = vld [vmem:[%s6078_s18 + $0x2b0] sm:$0xff]  ;;  %v2121_v12 = vld [vmem:[%s6078_s18 + $0x118] sm:$0xff]  ;;  %v2135_v13 = vld [vmem:[%s6078_s18 + $0x188] sm:$0xff] }
 0x65e   :  { %2081 = vmatpush.msrb.mxu2 %v1253_v30  ;;  %2353 = vmatpush.msrb.mxu1 %v2104_v15  ;;  %v1664_v30 = vadd.f32 %v1663_v2, %v1457_v52  ;;  %v2151_v15 = vld [vmem:[%s6078_s18 + $0x208] sm:$0xff] }
 0x65f   :  { %2685 = vmatmul.msk.f32.vlgmr.msrb.gmra.mxu2 %vm242_vm5, %v4303_v29  ;;  %2382 = vmatpush.msra.mxu0 %v2147_v14  ;;  %v2131_v29 = vld [vmem:[%s6078_s18 + $0x168] sm:$0xff]  ;;  %vm2316_vm5 = vcmask 130048  }
 0x660   :  { %2360 = vmatpush.msra.mxu2 %v2133_v4  ;;  %2402 = vmatpush.msra.mxu3 %v2163_v31  ;;  %v2171_v14 = vld [vmem:[%s6078_s18 + $0x2a8] sm:$0xff]  ;;  %v2120_v4 = vld [vmem:[%s6078_s18 + $0x110] sm:$0xff]  ;;  %v2134_v31 = vld [vmem:[%s6078_s18 + $0x180] sm:$0xff] }
 0x661   :  { %2354 = vmatpush.msrb.mxu1 %v2103_v54  ;;  %2383 = vmatpush.msra.mxu0 %v2146_v32  ;;  %v2170_v54 = vld [vmem:[%s6078_s18 + $0x2a0] sm:$0xff]  ;;  %v1455_v32 = vperm.slane %v5372_v50, 2  ;;  %v2191_v52 = vld [vmem:[%s6078_s18 + $0x348] sm:$0xff] }
 0x662   :  { %2361 = vmatpush.msra.mxu2 %v2132_v6  ;;  %2403 = vmatpush.msra.mxu3 %v2162_v49  ;;  %v1644_v6 = vadd.f32 %v1643_v10, %v1624_v28  ;;  %v1684_v49 = vadd.f32 %v1683_v18, %v1664_v30  ;;  %v5734_v2 = vpop.f32.mrf.mxu2  ;;  %v2189_v10 = vld [vmem:[%s6078_s18 + $0x338] sm:$0xff]  ;;  %v2239_v28 = vld [vmem:[%s6078_s18 + $0x4c8] sm:$0xff]  ;;  %v2188_v30 = vld [vmem:[%s6078_s18 + $0x330] sm:$0xff]  ;;  %v1460_v18 = vperm.slane %v5372_v50, 7 }
 0x663   :  { %2355 = vmatpush.msrb.mxu1 %v2102_v34  ;;  %2384 = vmatpush.msra.mxu0 %v2145_v36  ;;  %v2213_v34 = vld [vmem:[%s6078_s18 + $0x3f8] sm:$0xff] }
 0x664   :  { %2356 = vmatmul.f32.vlgmr.msrb.gmra.mxu1 %v1564_v23  ;;  %2362 = vmatpush.msra.mxu2 %v2131_v29  ;;  %v2229_v36 = vld [vmem:[%s6078_s18 + $0x478] sm:$0xff]  ;;  %v2119_v29 = vld [vmem:[%s6078_s18 + $0x108] sm:$0xff] }
 0x665   :  { %2404 = vmatpush.msra.mxu3 %v2161_v37  ;;  %2420 = vmatpush.msra.mxu1 %v2181_v27  ;;  %v2169_v23 = vld [vmem:[%s6078_s18 + $0x298] sm:$0xff]  ;;  %v1458_v37 = vperm.slane %v5372_v50, 5  ;;  %v2212_v27 = vld [vmem:[%s6078_s18 + $0x3f0] sm:$0xff] }
 0x666   :  { %2363 = vmatpush.msra.mxu2 %v2130_v38  ;;  %2385 = vmatpush.msra.mxu0 %v2144_v40  ;;  %v2228_v38 = vld [vmem:[%s6078_s18 + $0x470] sm:$0xff]  ;;  %v1584_v40 = vadd.f32 %v1583_v3, %v1455_v32  ;;  %v2201_v32 = vld [vmem:[%s6078_s18 + $0x398] sm:$0xff] }
 0x667   :  { %2405 = vmatpush.msra.mxu3 %v2160_v33  ;;  %2421 = vmatpush.msra.mxu1 %v2180_v35  ;;  %v1703_v33 = vpop.f32.mrf.mxu1  ;;  %v2118_v35 = vld [vmem:[%s6078_s18 + $0x100] sm:$0xff]  ;;  %v2192_v3 = vld [vmem:[%s6078_s18 + $0x350] sm:$0xff] }
 0x668   :  { %2364 = vmatpush.msra.mxu2 %v2129_v41  ;;  %2386 = vmatpush.msra.mxu0 %v2143_v42  ;;  %v2168_v41 = vld [vmem:[%s6078_s18 + $0x290] sm:$0xff]  ;;  %v2211_v42 = vld [vmem:[%s6078_s18 + $0x3e8] sm:$0xff] }
 0x669   :  { %2406 = vmatpush.msra.mxu3 %v2159_v39  ;;  %2422 = vmatpush.msra.mxu1 %v2179_v44  ;;  %v1604_v39 = vadd.f32 %v5535_v63, %v1584_v40  ;;  %v2197_v44 = vld [vmem:[%s6078_s18 + $0x378] sm:$0xff]  ;;  %v1723_v63 = vpop.f32.mrf.mxu3  ;;  %v2236_v40 = vld [vmem:[%s6078_s18 + $0x4b0] sm:$0xff] }
 0x66a   :  { %2365 = vmatpush.msra.mxu2 %v2128_v45  ;;  %2387 = vmatpush.msra.mxu0 %v2142_v43  ;;  %v2227_v45 = vld [vmem:[%s6078_s18 + $0x468] sm:$0xff]  ;;  %v1704_v43 = vadd.f32 %v1703_v33, %v1458_v37  ;;  %v2200_v37 = vld [vmem:[%s6078_s18 + $0x390] sm:$0xff]  ;;  %v2185_v33 = vld [vmem:[%s6078_s18 + $0x318] sm:$0xff] }
 0x66b   :  { %2407 = vmatpush.msra.mxu3 %v2158_v46  ;;  %2423 = vmatpush.msra.mxu1 %v2178_v57  ;;  %v2167_v46 = vld [vmem:[%s6078_s18 + $0x288] sm:$0xff]  ;;  %v2210_v57 = vld [vmem:[%s6078_s18 + $0x3e0] sm:$0xff] }
 0x66c   :  { %2366 = vmatpush.msra.mxu2 %v2127_v59  ;;  %2388 = vmatpush.msra.mxu0 %v2141_v47  ;;  %v2196_v59 = vld [vmem:[%s6078_s18 + $0x370] sm:$0xff]  ;;  %v2226_v47 = vld [vmem:[%s6078_s18 + $0x460] sm:$0xff] }
 0x66d   :  { %2408 = vmatpush.msra.mxu3 %v2157_v60  ;;  %2424 = vmatpush.msra.mxu1 %v2177_v61  ;;  %v2166_v60 = vld [vmem:[%s6078_s18 + $0x280] sm:$0xff]  ;;  %v2209_v61 = vld [vmem:[%s6078_s18 + $0x3d8] sm:$0xff] }
 0x66e   :  { %2367 = vmatpush.msra.mxu2 %v2126_v53  ;;  %2389 = vmatpush.msra.mxu0 %v2140_v11  ;;  %v2195_v53 = vld [vmem:[%s6078_s18 + $0x368] sm:$0xff]  ;;  %v1724_v11 = vadd.f32 %v1723_v63, %v1704_v43  ;;  %v2198_v43 = vld [vmem:[%s6078_s18 + $0x380] sm:$0xff] }
 0x66f   :  { %2409 = vmatpush.msra.mxu3 %v2156_v16  ;;  %2425 = vmatpush.msra.mxu1 %v2176_v17  ;;  %v2225_v16 = vld [vmem:[%s6078_s18 + $0x458] sm:$0xff]  ;;  %v2183_v63 = vld [vmem:[%s6078_s18 + $0x308] sm:$0xff] }
 0x670   :  { %2368 = vmatpush.msra.mxu2 %v2125_v19  ;;  %2390 = vmatpush.msra.mxu0 %v2139_v20  ;;  %v2245_v17 = vld [vmem:[%s6078_s18 + $0x4f8] sm:$0xff]  ;;  %v2194_v19 = vld [vmem:[%s6078_s18 + $0x360] sm:$0xff]  ;;  %v2208_v20 = vld [vmem:[%s6078_s18 + $0x3d0] sm:$0xff] }
 0x671   :  { %2410 = vmatpush.msra.mxu3 %v2155_v21  ;;  %2426 = vmatpush.msra.mxu1 %v2175_v22  ;;  %v2224_v21 = vld [vmem:[%s6078_s18 + $0x450] sm:$0xff] }
 0x672   :  { %2369 = vmatpush.msra.mxu2 %v2124_v24  ;;  %2391 = vmatpush.msra.mxu0 %v2138_v25  ;;  %v2244_v22 = vld [vmem:[%s6078_s18 + $0x4f0] sm:$0xff]  ;;  %v2193_v24 = vld [vmem:[%s6078_s18 + $0x358] sm:$0xff]  ;;  %v2207_v25 = vld [vmem:[%s6078_s18 + $0x3c8] sm:$0xff] }
 0x673   :  { %2411 = vmatpush.msra.mxu3 %v2154_v62  ;;  %2427 = vmatpush.msra.mxu1 %v2174_v26  ;;  %v2223_v62 = vld [vmem:[%s6078_s18 + $0x448] sm:$0xff] }
 0x674   :  { %2370 = vmatpush.msra.mxu2 %v2123_v51  ;;  %2392 = vmatpush.msra.mxu0 %v2137_v0  ;;  %v2243_v26 = vld [vmem:[%s6078_s18 + $0x4e8] sm:$0xff]  ;;  %v2206_v51 = vld [vmem:[%s6078_s18 + $0x3c0] sm:$0xff] }
 0x675   :  { %2412 = vmatpush.msra.mxu3 %v2153_v55  ;;  %2428 = vmatpush.msra.mxu1 %v2173_v56  ;;  %v2222_v0 = vld [vmem:[%s6078_s18 + $0x440] sm:$0xff]  ;;  %v2205_v55 = vld [vmem:[%s6078_s18 + $0x3b8] sm:$0xff] }
 0x676   :  { %2371 = vmatpush.msra.mxu2 %v2122_v5  ;;  %2393 = vmatpush.msra.mxu0 %v2136_v7  ;;  %v2221_v56 = vld [vmem:[%s6078_s18 + $0x438] sm:$0xff]  ;;  %v2190_v5 = vld [vmem:[%s6078_s18 + $0x340] sm:$0xff]  ;;  %v2204_v7 = vld [vmem:[%s6078_s18 + $0x3b0] sm:$0xff] }
 0x677   :  { %2413 = vmatpush.msra.mxu3 %v2152_v8  ;;  %2429 = vmatpush.msra.mxu1 %v2172_v9  ;;  %v2220_v8 = vld [vmem:[%s6078_s18 + $0x430] sm:$0xff] }
 0x678   :  { %2372 = vmatpush.msra.mxu2 %v2121_v12  ;;  %2394 = vmatpush.msra.mxu0 %v2135_v13  ;;  %v2240_v9 = vld [vmem:[%s6078_s18 + $0x4d0] sm:$0xff]  ;;  %v2203_v12 = vld [vmem:[%s6078_s18 + $0x3a8] sm:$0xff] }
 0x679   :  { %2414 = vmatpush.msra.mxu3 %v2151_v15  ;;  %2430 = vmatpush.msra.mxu1 %v2171_v14  ;;  %v2219_v13 = vld [vmem:[%s6078_s18 + $0x428] sm:$0xff]  ;;  %v2202_v15 = vld [vmem:[%s6078_s18 + $0x3a0] sm:$0xff] }
 0x67a   :  { %2373 = vmatpush.msra.mxu2 %v2120_v4  ;;  %2395 = vmatpush.msra.mxu0 %v2134_v31  ;;  %v2218_v14 = vld [vmem:[%s6078_s18 + $0x420] sm:$0xff]  ;;  %v1743_v31 = vpop.f32.mrf.mxu0 }
 0x67b   :  { %2415 = vmatpush.msra.mxu3 %v2150_v58  ;;  %2431 = vmatpush.msra.mxu1 %v2170_v54  ;;  %v2238_v4 = vld [vmem:[%s6078_s18 + $0x4c0] sm:$0xff]  ;;  %v5775_v58 = vld [vmem:[%s6077_s17 + $0x8] sm:$0x7f] }
 0x67c   :  { %2396 = vmatmul.f32.vlgmr.msra.gmra.mxu0 %v1644_v6  ;;  %2416 = vmatmul.f32.vlgmr.msra.gmra.mxu3 %v1684_v49  ;;  %v2187_v54 = vld [vmem:[%s6078_s18 + $0x328] sm:$0xff]  ;;  %v1461_v6 = vperm.slane %v5775_v58, 0  ;;  %v2217_v49 = vld [vmem:[%s6078_s18 + $0x418] sm:$0xff] }
 0x67d   :  { %2460 = vmatpush.msrb.mxu0 %v2213_v34  ;;  %2480 = vmatpush.msrb.mxu3 %v2229_v36  ;;  %v2237_v34 = vld [vmem:[%s6078_s18 + $0x4b8] sm:$0xff]  ;;  %v1783_v36 = vpop.f32.mrf.mxu3 }
 0x67e   :  { %2374 = vmatpush.msra.mxu2 %v2119_v29  ;;  %2432 = vmatpush.msra.mxu1 %v2169_v23  ;;  %v2186_v23 = vld [vmem:[%s6078_s18 + $0x320] sm:$0xff] }
 0x67f   :  { %2461 = vmatpush.msrb.mxu0 %v2212_v27  ;;  %2481 = vmatpush.msrb.mxu3 %v2228_v38  ;;  %v1803_v27 = vpop.f32.mrf.mxu1  ;;  %v2216_v38 = vld [vmem:[%s6078_s18 + $0x410] sm:$0xff] }
 0x680   :  { %2375 = vmatpush.msra.mxu2 %v2118_v35  ;;  %2433 = vmatpush.msra.mxu1 %v2168_v41  ;;  %v2199_v35 = vld [vmem:[%s6078_s18 + $0x388] sm:$0xff]  ;;  %v1784_v41 = vadd.f32 %v1783_v36, %v1460_v18  ;;  %v2286_v36 = vld [vmem:[%s6078_s18 + $0x640] sm:$0xff] }
 0x681   :  { %2376 = vmatmul.f32.vlgmr.msra.gmra.mxu2 %v1604_v39  ;;  %2462 = vmatpush.msrb.mxu0 %v2211_v42  ;;  %v2215_v39 = vld [vmem:[%s6078_s18 + $0x408] sm:$0xff] }
 0x682   :  { %2440 = vmatpush.msrb.mxu2 %v2197_v44  ;;  %2482 = vmatpush.msrb.mxu3 %v2227_v45  ;;  %v2235_v44 = vld [vmem:[%s6078_s18 + $0x4a8] sm:$0xff]  ;;  %v2184_v45 = vld [vmem:[%s6078_s18 + $0x310] sm:$0xff] }
 0x683   :  { %2434 = vmatpush.msra.mxu1 %v2167_v46  ;;  %2463 = vmatpush.msrb.mxu0 %v2210_v57  ;;  %v1459_v46 = vperm.slane %v5372_v50, 6  ;;  %v2214_v57 = vld [vmem:[%s6078_s18 + $0x400] sm:$0xff]  ;;  %v2277_v50 = vld [vmem:[%s6078_s18 + $0x5f8] sm:$0xff]  ;;  %v2287_v18 = vld [vmem:[%s6078_s18 + $0x648] sm:$0xff] }
 0x684   :  { %2441 = vmatpush.msrb.mxu2 %v2196_v59  ;;  %2483 = vmatpush.msrb.mxu3 %v2226_v47  ;;  %v1823_v29 = vpop.f32.mrf.mxu2  ;;  %v2234_v59 = vld [vmem:[%s6078_s18 + $0x4a0] sm:$0xff]  ;;  %v1843_v47 = vpop.f32.mrf.mxu0 }
 0x685   :  { %2435 = vmatpush.msra.mxu1 %v2166_v60  ;;  %2464 = vmatpush.msrb.mxu0 %v2209_v61  ;;  %v1824_v42 = vadd.f32 %v1823_v29, %v1461_v6  ;;  %v1804_v60 = vadd.f32 %v1803_v27, %v1784_v41  ;;  %v2269_v6 = vld [vmem:[%s6078_s18 + $0x5b8] sm:$0xff]  ;;  %v2268_v29 = vld [vmem:[%s6078_s18 + $0x5b0] sm:$0xff]  ;;  %v2266_v41 = vld [vmem:[%s6078_s18 + $0x5a0] sm:$0xff] }
 0x686   :  { %2436 = vmatmul.f32.vlgmr.msra.gmra.mxu1 %v1724_v11  ;;  %2442 = vmatpush.msrb.mxu2 %v2195_v53  ;;  %v1462_v53 = vperm.slane %v5775_v58, 1  ;;  %v2233_v11 = vld [vmem:[%s6078_s18 + $0x498] sm:$0xff] }
 0x687   :  { %2484 = vmatpush.msrb.mxu3 %v2225_v16  ;;  %2500 = vmatpush.msrb.mxu1 %v2245_v17  ;;  %v1844_v61 = vadd.f32 %v1843_v47, %v1824_v42  ;;  %v2293_v16 = vld [vmem:[%s6078_s18 + $0x678] sm:$0xff]  ;;  %v1744_v17 = vadd.f32 %v1743_v31, %v1459_v46  ;;  %v2270_v31 = vld [vmem:[%s6078_s18 + $0x5c0] sm:$0xff] }
 0x688   :  { %2443 = vmatpush.msrb.mxu2 %v2194_v19  ;;  %2465 = vmatpush.msrb.mxu0 %v2208_v20  ;;  %v1863_v19 = vpop.f32.mrf.mxu1  ;;  %v2276_v20 = vld [vmem:[%s6078_s18 + $0x5f0] sm:$0xff]  ;;  %v2285_v27 = vld [vmem:[%s6078_s18 + $0x638] sm:$0xff]  ;;  %v2302_v42 = vld [vmem:[%s6078_s18 + $0x6c0] sm:$0xff] }
 0x689   :  { %2485 = vmatpush.msrb.mxu3 %v2224_v21  ;;  %2501 = vmatpush.msrb.mxu1 %v2244_v22  ;;  %v2182_v21 = vld [vmem:[%s6078_s18 + $0x300] sm:$0xff]  ;;  %v2232_v22 = vld [vmem:[%s6078_s18 + $0x490] sm:$0xff]  ;;  %v2301_v46 = vld [vmem:[%s6078_s18 + $0x6b8] sm:$0xff] }
 0x68a   :  { %2444 = vmatpush.msrb.mxu2 %v2193_v24  ;;  %2466 = vmatpush.msrb.mxu0 %v2207_v25  ;;  %v1764_v24 = vadd.f32 %v5734_v2, %v1744_v17  ;;  %v2261_v25 = vld [vmem:[%s6078_s18 + $0x578] sm:$0xff]  ;;  %v2250_v47 = vld [vmem:[%s6078_s18 + $0x520] sm:$0xff]  ;;  %v2299_v17 = vld [vmem:[%s6078_s18 + $0x6a8] sm:$0xff] }
 0x68b   :  { %2486 = vmatpush.msrb.mxu3 %v2223_v62  ;;  %2502 = vmatpush.msrb.mxu1 %v2243_v26  ;;  %v2275_v62 = vld [vmem:[%s6078_s18 + $0x5e8] sm:$0xff]  ;;  %v1864_v26 = vadd.f32 %v1863_v19, %v1462_v53  ;;  %v2281_v53 = vld [vmem:[%s6078_s18 + $0x618] sm:$0xff]  ;;  %v1463_v19 = vperm.slane %v5775_v58, 2 }
 0x68c   :  { %2445 = vmatpush.msrb.mxu2 %v2192_v3  ;;  %2467 = vmatpush.msrb.mxu0 %v2206_v51  ;;  %v2231_v3 = vld [vmem:[%s6078_s18 + $0x488] sm:$0xff]  ;;  %v2292_v51 = vld [vmem:[%s6078_s18 + $0x670] sm:$0xff] }
 0x68d   :  { %2487 = vmatpush.msrb.mxu3 %v2222_v0  ;;  %2503 = vmatpush.msrb.mxu1 %v2242_v48  ;;  %v2260_v0 = vld [vmem:[%s6078_s18 + $0x570] sm:$0xff]  ;;  %v2274_v48 = vld [vmem:[%s6078_s18 + $0x5e0] sm:$0xff] }
 0x68e   :  { %2446 = vmatpush.msrb.mxu2 %v2191_v52  ;;  %2468 = vmatpush.msrb.mxu0 %v2205_v55  ;;  %v2230_v52 = vld [vmem:[%s6078_s18 + $0x480] sm:$0xff]  ;;  %v2291_v55 = vld [vmem:[%s6078_s18 + $0x668] sm:$0xff] }
 0x68f   :  { %2488 = vmatpush.msrb.mxu3 %v2221_v56  ;;  %2504 = vmatpush.msrb.mxu1 %v2241_v1  ;;  %v1883_v56 = vpop.f32.mrf.mxu3  ;;  %v2259_v1 = vld [vmem:[%s6078_s18 + $0x568] sm:$0xff] }
 0x690   :  { %2447 = vmatpush.msrb.mxu2 %v2190_v5  ;;  %2469 = vmatpush.msrb.mxu0 %v2204_v7  ;;  %v1884_v2 = vadd.f32 %v1883_v56, %v1864_v26  ;;  %v2273_v5 = vld [vmem:[%s6078_s18 + $0x5d8] sm:$0xff] }
 0x691   :  { %2489 = vmatpush.msrb.mxu3 %v2220_v8  ;;  %2505 = vmatpush.msrb.mxu1 %v2240_v9  ;;  %v2309_v7 = vld [vmem:[%s6078_s18 + $0x6f8] sm:$0xff]  ;;  %v2258_v8 = vld [vmem:[%s6078_s18 + $0x560] sm:$0xff] }
 0x692   :  { %2448 = vmatpush.msrb.mxu2 %v2189_v10  ;;  %2470 = vmatpush.msrb.mxu0 %v2203_v12  ;;  %v2290_v9 = vld [vmem:[%s6078_s18 + $0x660] sm:$0xff]  ;;  %v2272_v10 = vld [vmem:[%s6078_s18 + $0x5d0] sm:$0xff] }
 0x693   :  { %2490 = vmatpush.msrb.mxu3 %v2219_v13  ;;  %2506 = vmatpush.msrb.mxu1 %v2239_v28  ;;  %v2308_v12 = vld [vmem:[%s6078_s18 + $0x6f0] sm:$0xff]  ;;  %v2257_v13 = vld [vmem:[%s6078_s18 + $0x558] sm:$0xff] }
 0x694   :  { %2449 = vmatpush.msrb.mxu2 %v2188_v30  ;;  %2471 = vmatpush.msrb.mxu0 %v2202_v15  ;;  %v2289_v28 = vld [vmem:[%s6078_s18 + $0x658] sm:$0xff]  ;;  %v2271_v30 = vld [vmem:[%s6078_s18 + $0x5c8] sm:$0xff] }
 0x695   :  { %2491 = vmatpush.msrb.mxu3 %v2218_v14  ;;  %2507 = vmatpush.msrb.mxu1 %v2238_v4  ;;  %v2307_v15 = vld [vmem:[%s6078_s18 + $0x6e8] sm:$0xff]  ;;  %v2256_v14 = vld [vmem:[%s6078_s18 + $0x550] sm:$0xff] }
 0x696   :  { %2450 = vmatpush.msrb.mxu2 %v2187_v54  ;;  %2472 = vmatpush.msrb.mxu0 %v2201_v32  ;;  %v2288_v4 = vld [vmem:[%s6078_s18 + $0x650] sm:$0xff]  ;;  %v2306_v54 = vld [vmem:[%s6078_s18 + $0x6e0] sm:$0xff]  ;;  %v2255_v32 = vld [vmem:[%s6078_s18 + $0x548] sm:$0xff] }
 0x697   :  { %2492 = vmatpush.msrb.mxu3 %v2217_v49  ;;  %2508 = vmatpush.msrb.mxu1 %v2237_v34  ;;  %v2305_v49 = vld [vmem:[%s6078_s18 + $0x6d8] sm:$0xff]  ;;  %v2254_v34 = vld [vmem:[%s6078_s18 + $0x540] sm:$0xff] }
 0x698   :  { %2451 = vmatpush.msrb.mxu2 %v2186_v23  ;;  %2473 = vmatpush.msrb.mxu0 %v2200_v37  ;;  %v2304_v23 = vld [vmem:[%s6078_s18 + $0x6d0] sm:$0xff]  ;;  %v2253_v37 = vld [vmem:[%s6078_s18 + $0x538] sm:$0xff] }
 0x699   :  { %2493 = vmatpush.msrb.mxu3 %v2216_v38  ;;  %2509 = vmatpush.msrb.mxu1 %v2236_v40  ;;  %v2267_v38 = vld [vmem:[%s6078_s18 + $0x5a8] sm:$0xff] }
 0x69a   :  { %2452 = vmatpush.msrb.mxu2 %v2185_v33  ;;  %2474 = vmatpush.msrb.mxu0 %v2199_v35  ;;  %v2303_v40 = vld [vmem:[%s6078_s18 + $0x6c8] sm:$0xff]  ;;  %v2252_v33 = vld [vmem:[%s6078_s18 + $0x530] sm:$0xff] }
 0x69b   :  { %2494 = vmatpush.msrb.mxu3 %v2215_v39  ;;  %2510 = vmatpush.msrb.mxu1 %v2235_v44  ;;  %v2284_v35 = vld [vmem:[%s6078_s18 + $0x630] sm:$0xff]  ;;  %v2251_v39 = vld [vmem:[%s6078_s18 + $0x528] sm:$0xff] }
 0x69c   :  { %2453 = vmatpush.msrb.mxu2 %v2184_v45  ;;  %2475 = vmatpush.msrb.mxu0 %v2198_v43  ;;  %v2283_v44 = vld [vmem:[%s6078_s18 + $0x628] sm:$0xff]  ;;  %v1464_v45 = vperm.slane %v5775_v58, 3  ;;  %v2265_v43 = vld [vmem:[%s6078_s18 + $0x598] sm:$0xff] }
 0x69d   :  { %2495 = vmatpush.msrb.mxu3 %v2214_v57  ;;  %2511 = vmatpush.msrb.mxu1 %v2234_v59  ;;  %v1963_v57 = vpop.f32.mrf.mxu1  ;;  %v1943_v59 = vpop.f32.mrf.mxu3 }
 0x69e   :  { %2476 = vmatmul.f32.vlgmr.msrb.gmra.mxu0 %v1804_v60  ;;  %2496 = vmatmul.f32.vlgmr.msrb.gmra.mxu3 %v1844_v61  ;;  %v2282_v60 = vld [vmem:[%s6078_s18 + $0x620] sm:$0xff]  ;;  %v2264_v61 = vld [vmem:[%s6078_s18 + $0x590] sm:$0xff] }
 0x69f   :  { %2540 = vmatpush.msra.mxu0 %v2277_v50  ;;  %2454 = vmatpush.msrb.mxu2 %v2183_v63  ;;  %v2300_v50 = vld [vmem:[%s6078_s18 + $0x6b0] sm:$0xff]  ;;  %v2249_v63 = vld [vmem:[%s6078_s18 + $0x518] sm:$0xff] }
 0x6a0   :  { %2512 = vmatpush.msrb.mxu1 %v2233_v11  ;;  %2560 = vmatpush.msra.mxu3 %v2293_v16  ;;  %v1944_v11 = vadd.f32 %v1943_v59, %v1464_v45  ;;  %v2263_v16 = vld [vmem:[%s6078_s18 + $0x588] sm:$0xff] }
 0x6a1   :  { %2541 = vmatpush.msra.mxu0 %v2276_v20  ;;  %2455 = vmatpush.msrb.mxu2 %v2182_v21  ;;  %v2248_v20 = vld [vmem:[%s6078_s18 + $0x510] sm:$0xff] }
 0x6a2   :  { %2513 = vmatpush.msrb.mxu1 %v2232_v22  ;;  %2456 = vmatmul.f32.vlgmr.msrb.gmra.mxu2 %v1764_v24  ;;  %v2280_v21 = vld [vmem:[%s6078_s18 + $0x610] sm:$0xff]  ;;  %v1903_v22 = vpop.f32.mrf.mxu0  ;;  %v2262_v24 = vld [vmem:[%s6078_s18 + $0x580] sm:$0xff]  ;;  %v1923_v26 = vpop.f32.mrf.mxu2 }
 0x6a3   :  { %2520 = vmatpush.msra.mxu2 %v2261_v25  ;;  %2542 = vmatpush.msra.mxu0 %v2275_v62  ;;  %v2298_v25 = vld [vmem:[%s6078_s18 + $0x6a0] sm:$0xff]  ;;  %v1466_v62 = vperm.slane %v5775_v58, 5 }
 0x6a4   :  { %2514 = vmatpush.msrb.mxu1 %v2231_v3  ;;  %2561 = vmatpush.msra.mxu3 %v2292_v51  ;;  %v2247_v3 = vld [vmem:[%s6078_s18 + $0x508] sm:$0xff]  ;;  %v1964_v51 = vadd.f32 %v1963_v57, %v1944_v11 }
 0x6a5   :  { %2521 = vmatpush.msra.mxu2 %v2260_v0  ;;  %2543 = vmatpush.msra.mxu0 %v2274_v48  ;;  %v2297_v0 = vld [vmem:[%s6078_s18 + $0x698] sm:$0xff]  ;;  %v2279_v48 = vld [vmem:[%s6078_s18 + $0x608] sm:$0xff] }
 0x6a6   :  { %2515 = vmatpush.msrb.mxu1 %v2230_v52  ;;  %2562 = vmatpush.msra.mxu3 %v2291_v55  ;;  %v1904_v52 = vadd.f32 %v1903_v22, %v1463_v19  ;;  %v2246_v55 = vld [vmem:[%s6078_s18 + $0x500] sm:$0xff] }
 0x6a7   :  { %2516 = vmatmul.f32.vlgmr.msrb.gmra.mxu1 %v1884_v2  ;;  %2522 = vmatpush.msra.mxu2 %v2259_v1  ;;  %v2296_v2 = vld [vmem:[%s6078_s18 + $0x690] sm:$0xff] }
 0x6a8   :  { %2544 = vmatpush.msra.mxu0 %v2273_v5  ;;  %2580 = vmatpush.msra.mxu1 %v2309_v7  ;;  %v1924_v5 = vadd.f32 %v1923_v26, %v1904_v52  ;;  %v2278_v7 = vld [vmem:[%s6078_s18 + $0x600] sm:$0xff] }
 0x6a9   :  { %2523 = vmatpush.msra.mxu2 %v2258_v8  ;;  %2563 = vmatpush.msra.mxu3 %v2290_v9  ;;  %v2311_v8 = vld [vmem:[%s6078_s18 + $0x708] sm:$0xff] }
 0x6aa   :  { %2545 = vmatpush.msra.mxu0 %v2272_v10  ;;  %2581 = vmatpush.msra.mxu1 %v2308_v12  ;;  %v2295_v9 = vld [vmem:[%s6078_s18 + $0x688] sm:$0xff]  ;;  %v1465_v10 = vperm.slane %v5775_v58, 4 }
 0x6ab   :  { %2524 = vmatpush.msra.mxu2 %v2257_v13  ;;  %2564 = vmatpush.msra.mxu3 %v2289_v28  ;;  %v2310_v13 = vld [vmem:[%s6078_s18 + $0x700] sm:$0xff] }
 0x6ac   :  { %2546 = vmatpush.msra.mxu0 %v2271_v30  ;;  %2582 = vmatpush.msra.mxu1 %v2307_v15  ;;  %v2294_v30 = vld [vmem:[%s6078_s18 + $0x680] sm:$0xff] }
 0x6ad   :  { %2525 = vmatpush.msra.mxu2 %v2256_v14  ;;  %2565 = vmatpush.msra.mxu3 %v2288_v4 }
 0x6ae   :  { %2547 = vmatpush.msra.mxu0 %v2270_v31  ;;  %2583 = vmatpush.msra.mxu1 %v2306_v54  ;;  %v1467_v54 = vperm.slane %v5775_v58, 6 }
 0x6af   :  { %2526 = vmatpush.msra.mxu2 %v2255_v32  ;;  %2566 = vmatpush.msra.mxu3 %v2287_v18 }
 0x6b0   :  { %2548 = vmatpush.msra.mxu0 %v2269_v6  ;;  %2584 = vmatpush.msra.mxu1 %v2305_v49 }
 0x6b1   :  { %2527 = vmatpush.msra.mxu2 %v2254_v34  ;;  %2567 = vmatpush.msra.mxu3 %v2286_v36  ;;  %v2693_v34 = vld [vmem:[%s6079_s19] ss:$0 sm:$0xff]  ;;  %s2760_s19 = smov [#allocation4]  }
 0x6b2   :  { %2549 = vmatpush.msra.mxu0 %v2268_v29  ;;  %2585 = vmatpush.msra.mxu1 %v2304_v23  ;;  %s2638_s20 = sshll.u32 %s2760_s19, 4  ;;  %s2639_s20 = int_to_ptr.vmem [resolvable:$true] %s2638_s20 }
 0x6b3   :  { %2528 = vmatpush.msra.mxu2 %v2253_v37  ;;  %2568 = vmatpush.msra.mxu3 %v2285_v27 }
 0x6b4   :  { %2550 = vmatpush.msra.mxu0 %v2267_v38  ;;  %2586 = vmatpush.msra.mxu1 %v2303_v40 }
 0x6b5   :  { %2529 = vmatpush.msra.mxu2 %v2252_v33  ;;  %2569 = vmatpush.msra.mxu3 %v2284_v35  ;;  %v2003_v4 = vpop.f32.mrf.mxu0 }
 0x6b6   :  { %2551 = vmatpush.msra.mxu0 %v2266_v41  ;;  %2587 = vmatpush.msra.mxu1 %v2302_v42 }
 0x6b7   :  { %2530 = vmatpush.msra.mxu2 %v2251_v39  ;;  %2570 = vmatpush.msra.mxu3 %v2283_v44 }
 0x6b8   :  { %2552 = vmatpush.msra.mxu0 %v2265_v43  ;;  %2588 = vmatpush.msra.mxu1 %v2301_v46 }
 0x6b9   :  { %2531 = vmatpush.msra.mxu2 %v2250_v47  ;;  %2571 = vmatpush.msra.mxu3 %v2282_v60 }
 0x6ba   :  { %2553 = vmatpush.msra.mxu0 %v2264_v61  ;;  %2589 = vmatpush.msra.mxu1 %v2300_v50 }
 0x6bb   :  { %2532 = vmatpush.msra.mxu2 %v2249_v63  ;;  %2572 = vmatpush.msra.mxu3 %v2281_v53  ;;  %v2043_v12 = vpop.f32.mrf.mxu3 }
 0x6bc   :  { %2554 = vmatpush.msra.mxu0 %v2263_v16  ;;  %2590 = vmatpush.msra.mxu1 %v2299_v17 }
 0x6bd   :  { %2533 = vmatpush.msra.mxu2 %v2248_v20  ;;  %2573 = vmatpush.msra.mxu3 %v2280_v21 }
 0x6be   :  { %2555 = vmatpush.msra.mxu0 %v2262_v24  ;;  %2591 = vmatpush.msra.mxu1 %v2298_v25  ;;  %v2023_v56 = vpop.f32.mrf.mxu1 }
 0x6bf   :  { %2556 = vmatmul.f32.vlgmr.msra.gmra.mxu0 %v1964_v51  ;;  %2534 = vmatpush.msra.mxu2 %v2247_v3  ;;  %v2024_v1 = vadd.f32 %v2023_v56, %v1466_v62 }
 0x6c0   :  { %2592 = vmatpush.msra.mxu1 %v2297_v0  ;;  %2574 = vmatpush.msra.mxu3 %v2279_v48 }
 0x6c1   :  { %2535 = vmatpush.msra.mxu2 %v2246_v55  ;;  %v2044_v28 = vadd.f32 %v2043_v12, %v2024_v1 }
 0x6c2   :  { %2536 = vmatmul.f32.vlgmr.msra.gmra.mxu2 %v1924_v5  ;;  %2593 = vmatpush.msra.mxu1 %v2296_v2 }
 0x6c3   :  { %2575 = vmatpush.msra.mxu3 %v2278_v7  ;;  %2614 = vmatpush.msrb.mxu2 %v2311_v8 }
 0x6c4   :  { %2594 = vmatpush.msra.mxu1 %v2295_v9  ;;  %v1983_v15 = vpop.f32.mrf.mxu2 }
 0x6c5   :  { %v1984_v14 = vadd.f32 %v1983_v15, %v1465_v10  ;;  %2615 = vmatpush.msrb.mxu2 %v2310_v13 }
 0x6c6   :  { %2595 = vmatpush.msra.mxu1 %v2294_v30 }
 0x6c7   :  { %2596 = vmatmul.f32.vlgmr.msra.gmra.mxu1 %v2044_v28  ;;  %v2004_v31 = vadd.f32 %v2003_v4, %v1984_v14 }
 0x6c9   :  { %2576 = vmatmul.f32.vlgmr.msra.gmra.mxu3 %v2004_v31 }
 0x6d7   :  { %v2063_v32 = vpop.f32.mrf.mxu0 }
 0x6d8   :  { %v2064_v18 = vadd.f32 %v2063_v32, %v1467_v54 }
 0x6dd   :  { %v2337_v58 = vpop.f32.mrf.mxu3 }
 0x6de   :  { %v2338_v36 = vadd.f32 %v2693_v34, %v2337_v58 }
 0x6e1   :  { %v2357_v29 = vpop.f32.mrf.mxu1 }
 0x6e2   :  { %v2083_v6 = vpop.f32.mrf.mxu2  ;;  %v2358_v37 = vadd.f32 %v2357_v29, %v2338_v36 }
 0x6e3   :  { %v2084_v49 = vadd.f32 %v2083_v6, %v2064_v18 }
 0x6e5   :  { %2686 = vmatmul.msk.f32.vlgmr.msrb.gmra.mxu2 %vm2316_vm5, %v2084_v49 }
 0x6f9   :  { %v2397_v38 = vpop.f32.mrf.mxu0 }
 0x6ff   :  { %v2417_v33 = vpop.f32.mrf.mxu3 }
 0x703   :  { %v2437_v41 = vpop.f32.mrf.mxu1 }
 0x704   :  { %v2377_v23 = vpop.f32.mrf.mxu2 }
 0x705   :  { %v2378_v27 = vadd.f32 %v2377_v23, %v2358_v37 }
 0x707   :  { %v2398_v40 = vadd.f32 %v2397_v38, %v2378_v27 }
 0x709   :  { %v2418_v35 = vadd.f32 %v2417_v33, %v2398_v40 }
 0x70b   :  { %v2438_v39 = vadd.f32 %v2437_v41, %v2418_v35 }
 0x71b   :  { %v2477_v45 = vpop.f32.mrf.mxu0 }
 0x721   :  { %v2497_v46 = vpop.f32.mrf.mxu3 }
 0x724   :  { %v2517_v59 = vpop.f32.mrf.mxu1 }
 0x725   :  { %v2457_v42 = vpop.f32.mrf.mxu2 }
 0x726   :  { %v2458_v44 = vadd.f32 %v2457_v42, %v2438_v39 }
 0x728   :  { %v2478_v43 = vadd.f32 %v2477_v45, %v2458_v44 }
 0x72a   :  { %v2498_v57 = vadd.f32 %v2497_v46, %v2478_v43 }
 0x72c   :  { %v2518_v60 = vadd.f32 %v2517_v59, %v2498_v57 }
 0x73c   :  { %v2557_v50 = vpop.f32.mrf.mxu0 }
 0x744   :  { %v2597_v16 = vpop.f32.mrf.mxu1 }
 0x745   :  { %v2537_v47 = vpop.f32.mrf.mxu2 }
 0x746   :  { %v2538_v61 = vadd.f32 %v2537_v47, %v2518_v60 }
 0x748   :  { %v2558_v53 = vadd.f32 %v2557_v50, %v2538_v61 }
 0x74c   :  { %v2577_v63 = vpop.f32.mrf.mxu3 }
 0x74d   :  { %v2578_v11 = vadd.f32 %v2577_v63, %v2558_v53 }
 0x74f   :  { %v2598_v17 = vadd.f32 %v2597_v16, %v2578_v11 }
 0x768   :  { %v2617_v19 = vpop.f32.mrf.mxu2 }
 0x769   :  { %v2618_v20 = vadd.f32 %v2617_v19, %v2598_v17 }
 0x76b   :  { %2621 = vst.msk [vmem:[#allocation4] sm:$0x3] %vm2620_vm8, %v2618_v20 }
 0x76c   :  { %2643 = dma.vmem_to_hbm [thread:$0]  %s2639_s20, 32, %s2641_s3, [#allocation5]  }
 0x76d   :  { %2754 = dma.done.wait [#allocation3], 32  }
 0x76e   :  { %2755 = vsyncadd [#allocation3], 4294967264 }
 0x76f   :  { %2756 = dma.done.wait [#allocation5], 32  }
 0x770   :  { %2757 = vsyncadd [#allocation5], 4294967264 }
 0x771   :  { %2652 = vsyncpa [#allocation3], 1 }
 0x772   :  { %2653 = vsyncpa [#allocation5], 1 }

</bundles_post_ra>
